<compile_context>
chip_gen: v5e
topology: v5e:2x2
jax: 0.10.0
libtpu: 0.0.40
codegen_flags: <defaults>
</compile_context>

<pallas_src>
import jax
import jax.numpy as jnp
import numpy as np
from jax.experimental import pallas as pl
from jax.experimental.pallas import tpu as pltpu

C1_PAD = 128     # conv1 out channels 100 -> 128 lanes
C2_PAD = 256     # conv2 out channels 200 -> 256 lanes
CLS_PAD = 128    # logits 10 -> 128 lanes
ROWS1 = 88       # 64 pooled pixels + 24 zero rows (shift head-room for conv2)


def _round_up(x, m):
    return (x + m - 1) // m * m


# ----------------------------------------------------------------------------
# Kernel 1: conv1 (im2col matmul) + bias + relu + 3x3/3 max-pool, one image.
# ----------------------------------------------------------------------------
def _conv1_relu_pool_kernel(p_ref, w_ref, b_ref, o_ref):
    # p_ref: (1, 576, 25) bf16  patch rows ordered (window_slot, pool_h, pool_w)
    # w_ref: (25, 128)    bf16  conv1 weights (kh*kw*Cin, Cout_pad)
    # b_ref: (1, 128)     f32
    # o_ref: (1, 88, 128) bf16  rows 0:64 = pooled output (ph*8+pw); 64:88 = 0
    acc = jnp.dot(p_ref[0], w_ref[...], preferred_element_type=jnp.float32)
    acc = jnp.maximum(acc + b_ref[...], 0.0)            # (576, 128)
    # 3x3/stride-3 pool = max over the 9 window slots (aligned 64-row groups).
    m = acc[0:64, :]
    for s in range(1, 9):
        m = jnp.maximum(m, acc[64 * s:64 * (s + 1), :])
    o_ref[0, 0:64, :] = m.astype(o_ref.dtype)
    o_ref[0, 64:88, :] = jnp.zeros((24, 128), o_ref.dtype)


def conv1_relu_pool(patches, w1k, b1k):
    n, rows, k = patches.shape                          # (N, 576, 25*Cin)
    return pl.pallas_call(
        _conv1_relu_pool_kernel,
        out_shape=jax.ShapeDtypeStruct((n, ROWS1, C1_PAD), jnp.bfloat16),
        grid=(n,),
        in_specs=[
            pl.BlockSpec((1, rows, k), lambda i: (i, 0, 0)),
            pl.BlockSpec((k, C1_PAD), lambda i: (0, 0)),
            pl.BlockSpec((1, C1_PAD), lambda i: (0, 0)),
        ],
        out_specs=pl.BlockSpec((1, ROWS1, C1_PAD), lambda i: (i, 0, 0)),
        compiler_params=pltpu.CompilerParams(dimension_semantics=("parallel",)),
    )(patches, w1k, b1k)


# ----------------------------------------------------------------------------
# Kernel 2: conv2 via 9 in-kernel shifted-slice matmuls + relu + 3x3/3 pool.
# ----------------------------------------------------------------------------
def _conv2_relu_pool_kernel(x_ref, w_ref, b_ref, o_ref):
    # x_ref: (1, 88, 128)  bf16 pooled conv1 activation, row = ph*8+pw (+24 zero rows)
    # w_ref: (9, 128, 256) bf16 per-tap weights, tap = ki*3+kj
    # b_ref: (1, 256)      f32
    # o_ref: (1, 4, 256)   bf16 pooled conv2 output, row = poh*2+pow
    x32 = x_ref[0].astype(jnp.float32)                  # f32 so row shifts stay 32-bit
    acc = jnp.zeros((64, 256), jnp.float32)
    for ki in range(3):
        for kj in range(3):
            off = ki * 8 + kj
            lhs = x32[off:off + 64, :].astype(jnp.bfloat16)
            acc = acc + jnp.dot(lhs, w_ref[ki * 3 + kj],
                                preferred_element_type=jnp.float32)
    acc = jnp.maximum(acc + b_ref[...], 0.0)            # (64,256), row = oh*8+ow
    # 3x3 stride-3 max pool over the valid 6x6 grid embedded in the 8x8 rows.
    for poh in range(2):
        blk = acc[(3 * poh) * 8:(3 * poh + 1) * 8, :]
        blk = jnp.maximum(blk, acc[(3 * poh + 1) * 8:(3 * poh + 2) * 8, :])
        blk = jnp.maximum(blk, acc[(3 * poh + 2) * 8:(3 * poh + 3) * 8, :])
        for pw in range(2):
            r = jnp.maximum(blk[3 * pw:3 * pw + 1, :],
                            blk[3 * pw + 1:3 * pw + 2, :])
            r = jnp.maximum(r, blk[3 * pw + 2:3 * pw + 3, :])
            p = poh * 2 + pw
            o_ref[0, p:p + 1, :] = r.astype(o_ref.dtype)


def conv2_relu_pool(h1, w2k, b2k):
    n = h1.shape[0]
    return pl.pallas_call(
        _conv2_relu_pool_kernel,
        out_shape=jax.ShapeDtypeStruct((n, 4, C2_PAD), jnp.bfloat16),
        grid=(n,),
        in_specs=[
            pl.BlockSpec((1, ROWS1, C1_PAD), lambda i: (i, 0, 0)),
            pl.BlockSpec((9, C1_PAD, C2_PAD), lambda i: (0, 0, 0)),
            pl.BlockSpec((1, C2_PAD), lambda i: (0, 0)),
        ],
        out_specs=pl.BlockSpec((1, 4, C2_PAD), lambda i: (i, 0, 0)),
        compiler_params=pltpu.CompilerParams(dimension_semantics=("parallel",)),
    )(h1, w2k, b2k)


# ----------------------------------------------------------------------------
# Kernel 3: linear1 + linear2 fused, M-tiled.
# ----------------------------------------------------------------------------
def _mlp_kernel(x_ref, w1_ref, b1_ref, w2_ref, b2_ref, o_ref):
    h = jnp.dot(x_ref[...], w1_ref[...], preferred_element_type=jnp.float32)
    h = (h + b1_ref[...]).astype(jnp.bfloat16)
    o = jnp.dot(h, w2_ref[...], preferred_element_type=jnp.float32)
    o_ref[...] = o + b2_ref[...]


def mlp(feats, l1k, b3k, l2k, b4k):
    n, k = feats.shape                                  # k = 4*C2_PAD = 1024
    tile_m = _round_up(n, 8) if n <= 512 else 512
    mp = _round_up(n, tile_m)
    xp = feats if mp == n else jnp.zeros((mp, k), feats.dtype).at[:n].set(feats)
    out = pl.pallas_call(
        _mlp_kernel,
        out_shape=jax.ShapeDtypeStruct((mp, CLS_PAD), jnp.float32),
        grid=(mp // tile_m,),
        in_specs=[
            pl.BlockSpec((tile_m, k), lambda i: (i, 0)),
            pl.BlockSpec((k, 512), lambda i: (0, 0)),
            pl.BlockSpec((1, 512), lambda i: (0, 0)),
            pl.BlockSpec((512, CLS_PAD), lambda i: (0, 0)),
            pl.BlockSpec((1, CLS_PAD), lambda i: (0, 0)),
        ],
        out_specs=pl.BlockSpec((tile_m, CLS_PAD), lambda i: (i, 0)),
        compiler_params=pltpu.CompilerParams(dimension_semantics=("parallel",)),
    )(xp, l1k, b3k, l2k, b4k)
    return out[:n, :]


# ----------------------------------------------------------------------------
# Glue: conv1 im2col, slot-major row order (tiny: 25*Cin feature columns only)
# ----------------------------------------------------------------------------
def _im2col_slot_major(x, kh, kw, pool):
    # x: (N,H,W,C) NHWC -> (N, pool*pool*ph*pw, kh*kw*C) bf16 patch matrix.
    # Conv output pixels ordered (window_slot, pool_h, pool_w) so the max-pool
    # becomes a max over 9 aligned 64-row groups inside the conv kernel.
    n, h, w, c = x.shape
    oh, ow = h - kh + 1, w - kw + 1
    ph, pw = oh // pool, ow // pool
    cols = [x[:, i:i + oh, j:j + ow, :] for i in range(kh) for j in range(kw)]
    p = jnp.stack(cols, axis=3)                         # (N, oh, ow, kh*kw, C)
    p = p.reshape(n, ph, pool, pw, pool, kh * kw, c)
    p = p.transpose(0, 2, 4, 1, 3, 5, 6)                # (N, di, dj, ph, pw, k, C)
    return p.reshape(n, pool * pool * ph * pw, kh * kw * c).astype(jnp.bfloat16)


# ----------------------------------------------------------------------------
# Parameters: init (PyTorch-style) + one-time repacking into kernel layouts
# ----------------------------------------------------------------------------
def init_params(key, in_channel=1, num_classes=10):
    ks = jax.random.split(key, 8)

    def u(k, shape, fan_in):
        bound = 1.0 / np.sqrt(fan_in)
        return jax.random.uniform(k, shape, jnp.float32, -bound, bound)

    return {
        "conv1_w": u(ks[0], (100, in_channel, 5, 5), in_channel * 25),
        "conv1_b": u(ks[1], (100,), in_channel * 25),
        "conv2_w": u(ks[2], (200, 100, 3, 3), 100 * 9),
        "conv2_b": u(ks[3], (200,), 100 * 9),
        "lin1_w": u(ks[4], (512, 800), 800),   # PyTorch Linear layout (out, in)
        "lin1_b": u(ks[5], (512,), 800),
        "lin2_w": u(ks[6], (num_classes, 512), 512),
        "lin2_b": u(ks[7], (512,), 512) if False else u(ks[7], (num_classes,), 512),
    }


def pack_params(params):
    """One-time pad/transpose of all weights into kernel layouts (bf16 + f32 bias)."""
    c_in = params["conv1_w"].shape[1]
    num_classes = params["lin2_w"].shape[0]
    # conv1: (O,C,kh,kw) -> (kh,kw,C,O) -> (25*C, 128)
    w1 = jnp.transpose(params["conv1_w"], (2, 3, 1, 0)).reshape(25 * c_in, 100)
    w1k = jnp.zeros((25 * c_in, C1_PAD), jnp.float32).at[:, :100].set(w1)
    b1k = jnp.zeros((1, C1_PAD), jnp.float32).at[0, :100].set(params["conv1_b"])
    # conv2: (O,C,kh,kw) -> (kh,kw,C,O), pad C->128 / O->256 -> (9,128,256)
    w2 = jnp.transpose(params["conv2_w"], (2, 3, 1, 0))          # (3,3,100,200)
    w2k = jnp.zeros((3, 3, C1_PAD, C2_PAD), jnp.float32).at[:, :, :100, :200].set(w2)
    w2k = w2k.reshape(9, C1_PAD, C2_PAD)
    b2k = jnp.zeros((1, C2_PAD), jnp.float32).at[0, :200].set(params["conv2_b"])
    # linear1: torch flatten order (c,h,w); ours is (p=h*2+w, c_padded)
    l1 = params["lin1_w"].reshape(512, 200, 2, 2)                # (o,c,h,w)
    l1 = jnp.transpose(l1, (0, 2, 3, 1))                         # (o,h,w,c)
    l1p = jnp.zeros((512, 2, 2, C2_PAD), jnp.float32).at[:, :, :, :200].set(l1)
    l1k = l1p.reshape(512, 4 * C2_PAD).T                         # (1024, 512)
    b3k = params["lin1_b"].reshape(1, 512).astype(jnp.float32)
    # linear2: (num_classes,512) -> (512,128)
    l2k = jnp.zeros((512, CLS_PAD), jnp.float32).at[:, :num_classes].set(
        params["lin2_w"].T)
    b4k = jnp.zeros((1, CLS_PAD), jnp.float32).at[0, :num_classes].set(
        params["lin2_b"])
    return {
        "w1k": w1k.astype(jnp.bfloat16), "b1k": b1k,
        "w2k": w2k.astype(jnp.bfloat16), "b2k": b2k,
        "l1k": l1k.astype(jnp.bfloat16), "b3k": b3k,
        "l2k": l2k.astype(jnp.bfloat16), "b4k": b4k,
    }


# ----------------------------------------------------------------------------
# Forward
# ----------------------------------------------------------------------------
def scratch_mnist_forward(packed, x_nchw, num_classes=10):
    assert x_nchw.shape[2:] == (28, 28), "scratch_mnist expects 28x28 inputs"
    n = x_nchw.shape[0]
    x = jnp.transpose(x_nchw, (0, 2, 3, 1)).astype(jnp.float32)  # NCHW -> NHWC
    patches = _im2col_slot_major(x, 5, 5, 3)                     # (N, 576, 25*C)
    h1 = conv1_relu_pool(patches, packed["w1k"], packed["b1k"])  # (N, 88, 128)
    h2 = conv2_relu_pool(h1, packed["w2k"], packed["b2k"])       # (N, 4, 256)
    feats = h2.reshape(n, 4 * C2_PAD)                            # (N, 1024)
    logits = mlp(feats, packed["l1k"], packed["b3k"],
                 packed["l2k"], packed["b4k"])                   # (N, 128)
    return logits[:, :num_classes]


# Pure-JAX f32 reference with the exact PyTorch semantics (NCHW throughout).
def _reference_forward(params, x_nchw):
    hp = jax.lax.Precision.HIGHEST
    x = x_nchw.astype(jnp.float32)

    def conv(x, w, b):
        y = jax.lax.conv_general_dilated(
            x, w, (1, 1), "VALID",
            dimension_numbers=("NCHW", "OIHW", "NCHW"), precision=hp)
        return jnp.maximum(y + b[None, :, None, None], 0.0)

    def pool(x):
        n, c, h, w = x.shape
        return jnp.max(x.reshape(n, c, h // 3, 3, w // 3, 3), axis=(3, 5))

    x = pool(conv(x, params["conv1_w"], params["conv1_b"]))
    x = pool(conv(x, params["conv2_w"], params["conv2_b"]))
    x = x.reshape(x.shape[0], -1)
    x = jnp.dot(x, params["lin1_w"].T, precision=hp) + params["lin1_b"]
    x = jnp.dot(x, params["lin2_w"].T, precision=hp) + params["lin2_b"]
    return x


if __name__ == "__main__":
    key = jax.random.PRNGKey(0)
    k_param, k_x = jax.random.split(key)
    params = init_params(k_param, in_channel=1, num_classes=10)
    packed = pack_params(params)                 # one-time weight repacking
    x = jax.random.normal(k_x, (2, 1, 28, 28), dtype=jnp.float32)

    fwd = jax.jit(scratch_mnist_forward)
    out = jax.block_until_ready(fwd(packed, x))
    assert out.shape == (2, 10), out.shape
    assert bool(jnp.all(jnp.isfinite(out)))

    ref = jax.block_until_ready(_reference_forward(params, x))
    np.testing.assert_allclose(np.asarray(out), np.asarray(ref),
                               rtol=5e-2, atol=5e-2)

    print("KERNEL_OK")
</pallas_src>

<mosaic_0001>
module attributes {stable_mosaic.version = 11 : i64} {
  func.func @_conv1_relu_pool_kernel(%arg0: i32, %arg1: memref<1x576x25xbf16, #tpu.memory_space<vmem>>, %arg2: memref<25x128xbf16, #tpu.memory_space<vmem>>, %arg3: memref<1x128xf32, #tpu.memory_space<vmem>>, %arg4: memref<1x88x128xbf16, #tpu.memory_space<vmem>>) attributes {dimension_semantics = [#tpu.dimension_semantics<parallel>], iteration_bounds = array<i64: 2>, scalar_prefetch = 0 : i64, scratch_operands = 0 : i64, tpu.core_type = #tpu.core_type<tc>, window_params = [{transform_indices = @transform_0, window_bounds = array<i64: 1, 576, 25>}, {pipeline_mode = #tpu.pipeline_mode<synchronous>, transform_indices = @transform_1, window_bounds = array<i64: 25, 128>}, {pipeline_mode = #tpu.pipeline_mode<synchronous>, transform_indices = @transform_2, window_bounds = array<i64: 1, 128>}, {transform_indices = @transform_3, window_bounds = array<i64: 1, 88, 128>}]} {
    %c0 = arith.constant 0 : index
    %c0_0 = arith.constant 0 : index
    %c0_1 = arith.constant 0 : index
    %0 = vector.load %arg1[%c0, %c0_0, %c0_1] : memref<1x576x25xbf16, #tpu.memory_space<vmem>>, vector<1x576x25xbf16>
    %1 = vector.shape_cast %0 : vector<1x576x25xbf16> to vector<576x25xbf16>
    %c0_2 = arith.constant 0 : index
    %c0_3 = arith.constant 0 : index
    %2 = vector.load %arg2[%c0_2, %c0_3] : memref<25x128xbf16, #tpu.memory_space<vmem>>, vector<25x128xbf16>
    %cst = arith.constant dense<0.000000e+00> : vector<576x128xf32>
    %3 = tpu.matmul %1, %2, %cst {dimension_numbers = #tpu.dot_dimension_numbers<[1], [0], [0], [1], [0, 0, 1, 1], [], []>} : vector<576x25xbf16>, vector<25x128xbf16>, vector<576x128xf32> -> vector<576x128xf32>
    %c0_4 = arith.constant 0 : index
    %c0_5 = arith.constant 0 : index
    %4 = vector.load %arg3[%c0_4, %c0_5] : memref<1x128xf32, #tpu.memory_space<vmem>>, vector<1x128xf32>
    %5 = vector.broadcast %4 : vector<1x128xf32> to vector<576x128xf32>
    %6 = arith.addf %3, %5 : vector<576x128xf32>
    %cst_6 = arith.constant 0.000000e+00 : f32
    %7 = vector.broadcast %cst_6 : f32 to vector<576x128xf32>
    %8 = arith.maximumf %6, %7 : vector<576x128xf32>
    %9 = vector.extract_strided_slice %8 {offsets = [0, 0], sizes = [64, 128], strides = [1, 1]} : vector<576x128xf32> to vector<64x128xf32>
    %10 = vector.extract_strided_slice %8 {offsets = [64, 0], sizes = [64, 128], strides = [1, 1]} : vector<576x128xf32> to vector<64x128xf32>
    %11 = arith.maximumf %9, %10 : vector<64x128xf32>
    %12 = vector.extract_strided_slice %8 {offsets = [128, 0], sizes = [64, 128], strides = [1, 1]} : vector<576x128xf32> to vector<64x128xf32>
    %13 = arith.maximumf %11, %12 : vector<64x128xf32>
    %14 = vector.extract_strided_slice %8 {offsets = [192, 0], sizes = [64, 128], strides = [1, 1]} : vector<576x128xf32> to vector<64x128xf32>
    %15 = arith.maximumf %13, %14 : vector<64x128xf32>
    %16 = vector.extract_strided_slice %8 {offsets = [256, 0], sizes = [64, 128], strides = [1, 1]} : vector<576x128xf32> to vector<64x128xf32>
    %17 = arith.maximumf %15, %16 : vector<64x128xf32>
    %18 = vector.extract_strided_slice %8 {offsets = [320, 0], sizes = [64, 128], strides = [1, 1]} : vector<576x128xf32> to vector<64x128xf32>
    %19 = arith.maximumf %17, %18 : vector<64x128xf32>
    %20 = vector.extract_strided_slice %8 {offsets = [384, 0], sizes = [64, 128], strides = [1, 1]} : vector<576x128xf32> to vector<64x128xf32>
    %21 = arith.maximumf %19, %20 : vector<64x128xf32>
    %22 = vector.extract_strided_slice %8 {offsets = [448, 0], sizes = [64, 128], strides = [1, 1]} : vector<576x128xf32> to vector<64x128xf32>
    %23 = arith.maximumf %21, %22 : vector<64x128xf32>
    %24 = vector.extract_strided_slice %8 {offsets = [512, 0], sizes = [64, 128], strides = [1, 1]} : vector<576x128xf32> to vector<64x128xf32>
    %25 = arith.maximumf %23, %24 : vector<64x128xf32>
    %26 = arith.truncf %25 : vector<64x128xf32> to vector<64x128xbf16>
    %c0_7 = arith.constant 0 : index
    %c0_8 = arith.constant 0 : index
    %c0_9 = arith.constant 0 : index
    %27 = vector.load %arg4[%c0_7, %c0_8, %c0_9] : memref<1x88x128xbf16, #tpu.memory_space<vmem>>, vector<1x64x128xbf16>
    %28 = vector.shape_cast %27 : vector<1x64x128xbf16> to vector<64x128xbf16>
    %29 = vector.shape_cast %26 : vector<64x128xbf16> to vector<1x64x128xbf16>
    tpu.vector_store %arg4[%c0_7, %c0_8, %c0_9], %29 {strides = array<i32>} : memref<1x88x128xbf16, #tpu.memory_space<vmem>>, vector<1x64x128xbf16>,
    %cst_10 = arith.constant 0.000000e+00 : bf16
    %30 = vector.broadcast %cst_10 : bf16 to vector<24x128xbf16>
    %c0_11 = arith.constant 0 : index
    %c64 = arith.constant 64 : index
    %c0_12 = arith.constant 0 : index
    %31 = vector.load %arg4[%c0_11, %c64, %c0_12] : memref<1x88x128xbf16, #tpu.memory_space<vmem>>, vector<1x24x128xbf16>
    %32 = vector.shape_cast %31 : vector<1x24x128xbf16> to vector<24x128xbf16>
    %33 = vector.shape_cast %30 : vector<24x128xbf16> to vector<1x24x128xbf16>
    tpu.vector_store %arg4[%c0_11, %c64, %c0_12], %33 {strides = array<i32>} : memref<1x88x128xbf16, #tpu.memory_space<vmem>>, vector<1x24x128xbf16>,
    return
  }
  func.func @transform_0(%arg0: i32) -> (i32, i32, i32) {
    %c0_i32 = arith.constant 0 : i32
    %c0_i32_0 = arith.constant 0 : i32
    %c0_i32_1 = arith.constant 0 : i32
    return %arg0, %c0_i32, %c0_i32_0 : i32, i32, i32
  }
  func.func @transform_1(%arg0: i32) -> (i32, i32) {
    %c0_i32 = arith.constant 0 : i32
    %c0_i32_0 = arith.constant 0 : i32
    %c0_i32_1 = arith.constant 0 : i32
    return %c0_i32, %c0_i32_0 : i32, i32
  }
  func.func @transform_2(%arg0: i32) -> (i32, i32) {
    %c0_i32 = arith.constant 0 : i32
    %c0_i32_0 = arith.constant 0 : i32
    %c0_i32_1 = arith.constant 0 : i32
    return %c0_i32, %c0_i32_0 : i32, i32
  }
  func.func @transform_3(%arg0: i32) -> (i32, i32, i32) {
    %c0_i32 = arith.constant 0 : i32
    %c0_i32_0 = arith.constant 0 : i32
    %c0_i32_1 = arith.constant 0 : i32
    return %arg0, %c0_i32, %c0_i32_0 : i32, i32, i32
  }
}

module attributes {stable_mosaic.version = 11 : i64} {
  func.func @_conv2_relu_pool_kernel(%arg0: i32, %arg1: memref<1x88x128xbf16, #tpu.memory_space<vmem>>, %arg2: memref<9x128x256xbf16, #tpu.memory_space<vmem>>, %arg3: memref<1x256xf32, #tpu.memory_space<vmem>>, %arg4: memref<1x4x256xbf16, #tpu.memory_space<vmem>>) attributes {dimension_semantics = [#tpu.dimension_semantics<parallel>], iteration_bounds = array<i64: 2>, scalar_prefetch = 0 : i64, scratch_operands = 0 : i64, tpu.core_type = #tpu.core_type<tc>, window_params = [{transform_indices = @transform_0, window_bounds = array<i64: 1, 88, 128>}, {pipeline_mode = #tpu.pipeline_mode<synchronous>, transform_indices = @transform_1, window_bounds = array<i64: 9, 128, 256>}, {pipeline_mode = #tpu.pipeline_mode<synchronous>, transform_indices = @transform_2, window_bounds = array<i64: 1, 256>}, {transform_indices = @transform_3, window_bounds = array<i64: 1, 4, 256>}]} {
    %c0 = arith.constant 0 : index
    %c0_0 = arith.constant 0 : index
    %c0_1 = arith.constant 0 : index
    %0 = vector.load %arg1[%c0, %c0_0, %c0_1] : memref<1x88x128xbf16, #tpu.memory_space<vmem>>, vector<1x88x128xbf16>
    %1 = vector.shape_cast %0 : vector<1x88x128xbf16> to vector<88x128xbf16>
    %2 = arith.extf %1 : vector<88x128xbf16> to vector<88x128xf32>
    %cst = arith.constant 0.000000e+00 : f32
    %3 = vector.broadcast %cst : f32 to vector<64x256xf32>
    %4 = vector.extract_strided_slice %2 {offsets = [0, 0], sizes = [64, 128], strides = [1, 1]} : vector<88x128xf32> to vector<64x128xf32>
    %5 = arith.truncf %4 : vector<64x128xf32> to vector<64x128xbf16>
    %c0_2 = arith.constant 0 : index
    %c0_3 = arith.constant 0 : index
    %c0_4 = arith.constant 0 : index
    %6 = vector.load %arg2[%c0_2, %c0_3, %c0_4] : memref<9x128x256xbf16, #tpu.memory_space<vmem>>, vector<1x128x256xbf16>
    %7 = vector.shape_cast %6 : vector<1x128x256xbf16> to vector<128x256xbf16>
    %cst_5 = arith.constant dense<0.000000e+00> : vector<64x256xf32>
    %8 = tpu.matmul %5, %7, %cst_5 {dimension_numbers = #tpu.dot_dimension_numbers<[1], [0], [0], [1], [0, 0, 1, 1], [], []>} : vector<64x128xbf16>, vector<128x256xbf16>, vector<64x256xf32> -> vector<64x256xf32>
    %9 = arith.addf %3, %8 : vector<64x256xf32>
    %10 = vector.extract_strided_slice %2 {offsets = [1, 0], sizes = [64, 128], strides = [1, 1]} : vector<88x128xf32> to vector<64x128xf32>
    %11 = arith.truncf %10 : vector<64x128xf32> to vector<64x128xbf16>
    %c1 = arith.constant 1 : index
    %c0_6 = arith.constant 0 : index
    %c0_7 = arith.constant 0 : index
    %12 = vector.load %arg2[%c1, %c0_6, %c0_7] : memref<9x128x256xbf16, #tpu.memory_space<vmem>>, vector<1x128x256xbf16>
    %13 = vector.shape_cast %12 : vector<1x128x256xbf16> to vector<128x256xbf16>
    %cst_8 = arith.constant dense<0.000000e+00> : vector<64x256xf32>
    %14 = tpu.matmul %11, %13, %cst_8 {dimension_numbers = #tpu.dot_dimension_numbers<[1], [0], [0], [1], [0, 0, 1, 1], [], []>} : vector<64x128xbf16>, vector<128x256xbf16>, vector<64x256xf32> -> vector<64x256xf32>
    %15 = arith.addf %9, %14 : vector<64x256xf32>
    %16 = vector.extract_strided_slice %2 {offsets = [2, 0], sizes = [64, 128], strides = [1, 1]} : vector<88x128xf32> to vector<64x128xf32>
    %17 = arith.truncf %16 : vector<64x128xf32> to vector<64x128xbf16>
    %c2 = arith.constant 2 : index
    %c0_9 = arith.constant 0 : index
    %c0_10 = arith.constant 0 : index
    %18 = vector.load %arg2[%c2, %c0_9, %c0_10] : memref<9x128x256xbf16, #tpu.memory_space<vmem>>, vector<1x128x256xbf16>
    %19 = vector.shape_cast %18 : vector<1x128x256xbf16> to vector<128x256xbf16>
    %cst_11 = arith.constant dense<0.000000e+00> : vector<64x256xf32>
    %20 = tpu.matmul %17, %19, %cst_11 {dimension_numbers = #tpu.dot_dimension_numbers<[1], [0], [0], [1], [0, 0, 1, 1], [], []>} : vector<64x128xbf16>, vector<128x256xbf16>, vector<64x256xf32> -> vector<64x256xf32>
    %21 = arith.addf %15, %20 : vector<64x256xf32>
    %22 = vector.extract_strided_slice %2 {offsets = [8, 0], sizes = [64, 128], strides = [1, 1]} : vector<88x128xf32> to vector<64x128xf32>
    %23 = arith.truncf %22 : vector<64x128xf32> to vector<64x128xbf16>
    %c3 = arith.constant 3 : index
    %c0_12 = arith.constant 0 : index
    %c0_13 = arith.constant 0 : index
    %24 = vector.load %arg2[%c3, %c0_12, %c0_13] : memref<9x128x256xbf16, #tpu.memory_space<vmem>>, vector<1x128x256xbf16>
    %25 = vector.shape_cast %24 : vector<1x128x256xbf16> to vector<128x256xbf16>
    %cst_14 = arith.constant dense<0.000000e+00> : vector<64x256xf32>
    %26 = tpu.matmul %23, %25, %cst_14 {dimension_numbers = #tpu.dot_dimension_numbers<[1], [0], [0], [1], [0, 0, 1, 1], [], []>} : vector<64x128xbf16>, vector<128x256xbf16>, vector<64x256xf32> -> vector<64x256xf32>
    %27 = arith.addf %21, %26 : vector<64x256xf32>
    %28 = vector.extract_strided_slice %2 {offsets = [9, 0], sizes = [64, 128], strides = [1, 1]} : vector<88x128xf32> to vector<64x128xf32>
    %29 = arith.truncf %28 : vector<64x128xf32> to vector<64x128xbf16>
    %c4 = arith.constant 4 : index
    %c0_15 = arith.constant 0 : index
    %c0_16 = arith.constant 0 : index
    %30 = vector.load %arg2[%c4, %c0_15, %c0_16] : memref<9x128x256xbf16, #tpu.memory_space<vmem>>, vector<1x128x256xbf16>
    %31 = vector.shape_cast %30 : vector<1x128x256xbf16> to vector<128x256xbf16>
    %cst_17 = arith.constant dense<0.000000e+00> : vector<64x256xf32>
    %32 = tpu.matmul %29, %31, %cst_17 {dimension_numbers = #tpu.dot_dimension_numbers<[1], [0], [0], [1], [0, 0, 1, 1], [], []>} : vector<64x128xbf16>, vector<128x256xbf16>, vector<64x256xf32> -> vector<64x256xf32>
    %33 = arith.addf %27, %32 : vector<64x256xf32>
    %34 = vector.extract_strided_slice %2 {offsets = [10, 0], sizes = [64, 128], strides = [1, 1]} : vector<88x128xf32> to vector<64x128xf32>
    %35 = arith.truncf %34 : vector<64x128xf32> to vector<64x128xbf16>
    %c5 = arith.constant 5 : index
    %c0_18 = arith.constant 0 : index
    %c0_19 = arith.constant 0 : index
    %36 = vector.load %arg2[%c5, %c0_18, %c0_19] : memref<9x128x256xbf16, #tpu.memory_space<vmem>>, vector<1x128x256xbf16>
    %37 = vector.shape_cast %36 : vector<1x128x256xbf16> to vector<128x256xbf16>
    %cst_20 = arith.constant dense<0.000000e+00> : vector<64x256xf32>
    %38 = tpu.matmul %35, %37, %cst_20 {dimension_numbers = #tpu.dot_dimension_numbers<[1], [0], [0], [1], [0, 0, 1, 1], [], []>} : vector<64x128xbf16>, vector<128x256xbf16>, vector<64x256xf32> -> vector<64x256xf32>
    %39 = arith.addf %33, %38 : vector<64x256xf32>
    %40 = vector.extract_strided_slice %2 {offsets = [16, 0], sizes = [64, 128], strides = [1, 1]} : vector<88x128xf32> to vector<64x128xf32>
    %41 = arith.truncf %40 : vector<64x128xf32> to vector<64x128xbf16>
    %c6 = arith.constant 6 : index
    %c0_21 = arith.constant 0 : index
    %c0_22 = arith.constant 0 : index
    %42 = vector.load %arg2[%c6, %c0_21, %c0_22] : memref<9x128x256xbf16, #tpu.memory_space<vmem>>, vector<1x128x256xbf16>
    %43 = vector.shape_cast %42 : vector<1x128x256xbf16> to vector<128x256xbf16>
    %cst_23 = arith.constant dense<0.000000e+00> : vector<64x256xf32>
    %44 = tpu.matmul %41, %43, %cst_23 {dimension_numbers = #tpu.dot_dimension_numbers<[1], [0], [0], [1], [0, 0, 1, 1], [], []>} : vector<64x128xbf16>, vector<128x256xbf16>, vector<64x256xf32> -> vector<64x256xf32>
    %45 = arith.addf %39, %44 : vector<64x256xf32>
    %46 = vector.extract_strided_slice %2 {offsets = [17, 0], sizes = [64, 128], strides = [1, 1]} : vector<88x128xf32> to vector<64x128xf32>
    %47 = arith.truncf %46 : vector<64x128xf32> to vector<64x128xbf16>
    %c7 = arith.constant 7 : index
    %c0_24 = arith.constant 0 : index
    %c0_25 = arith.constant 0 : index
    %48 = vector.load %arg2[%c7, %c0_24, %c0_25] : memref<9x128x256xbf16, #tpu.memory_space<vmem>>, vector<1x128x256xbf16>
    %49 = vector.shape_cast %48 : vector<1x128x256xbf16> to vector<128x256xbf16>
    %cst_26 = arith.constant dense<0.000000e+00> : vector<64x256xf32>
    %50 = tpu.matmul %47, %49, %cst_26 {dimension_numbers = #tpu.dot_dimension_numbers<[1], [0], [0], [1], [0, 0, 1, 1], [], []>} : vector<64x128xbf16>, vector<128x256xbf16>, vector<64x256xf32> -> vector<64x256xf32>
    %51 = arith.addf %45, %50 : vector<64x256xf32>
    %52 = vector.extract_strided_slice %2 {offsets = [18, 0], sizes = [64, 128], strides = [1, 1]} : vector<88x128xf32> to vector<64x128xf32>
    %53 = arith.truncf %52 : vector<64x128xf32> to vector<64x128xbf16>
    %c8 = arith.constant 8 : index
    %c0_27 = arith.constant 0 : index
    %c0_28 = arith.constant 0 : index
    %54 = vector.load %arg2[%c8, %c0_27, %c0_28] : memref<9x128x256xbf16, #tpu.memory_space<vmem>>, vector<1x128x256xbf16>
    %55 = vector.shape_cast %54 : vector<1x128x256xbf16> to vector<128x256xbf16>
    %cst_29 = arith.constant dense<0.000000e+00> : vector<64x256xf32>
    %56 = tpu.matmul %53, %55, %cst_29 {dimension_numbers = #tpu.dot_dimension_numbers<[1], [0], [0], [1], [0, 0, 1, 1], [], []>} : vector<64x128xbf16>, vector<128x256xbf16>, vector<64x256xf32> -> vector<64x256xf32>
    %57 = arith.addf %51, %56 : vector<64x256xf32>
    %c0_30 = arith.constant 0 : index
    %c0_31 = arith.constant 0 : index
    %58 = vector.load %arg3[%c0_30, %c0_31] : memref<1x256xf32, #tpu.memory_space<vmem>>, vector<1x256xf32>
    %59 = vector.broadcast %58 : vector<1x256xf32> to vector<64x256xf32>
    %60 = arith.addf %57, %59 : vector<64x256xf32>
    %cst_32 = arith.constant 0.000000e+00 : f32
    %61 = vector.broadcast %cst_32 : f32 to vector<64x256xf32>
    %62 = arith.maximumf %60, %61 : vector<64x256xf32>
    %63 = vector.extract_strided_slice %62 {offsets = [0, 0], sizes = [8, 256], strides = [1, 1]} : vector<64x256xf32> to vector<8x256xf32>
    %64 = vector.extract_strided_slice %62 {offsets = [8, 0], sizes = [8, 256], strides = [1, 1]} : vector<64x256xf32> to vector<8x256xf32>
    %65 = arith.maximumf %63, %64 : vector<8x256xf32>
    %66 = vector.extract_strided_slice %62 {offsets = [16, 0], sizes = [8, 256], strides = [1, 1]} : vector<64x256xf32> to vector<8x256xf32>
    %67 = arith.maximumf %65, %66 : vector<8x256xf32>
    %68 = vector.extract_strided_slice %67 {offsets = [0, 0], sizes = [1, 256], strides = [1, 1]} : vector<8x256xf32> to vector<1x256xf32>
    %69 = vector.extract_strided_slice %67 {offsets = [1, 0], sizes = [1, 256], strides = [1, 1]} : vector<8x256xf32> to vector<1x256xf32>
    %70 = arith.maximumf %68, %69 : vector<1x256xf32>
    %71 = vector.extract_strided_slice %67 {offsets = [2, 0], sizes = [1, 256], strides = [1, 1]} : vector<8x256xf32> to vector<1x256xf32>
    %72 = arith.maximumf %70, %71 : vector<1x256xf32>
    %73 = arith.truncf %72 : vector<1x256xf32> to vector<1x256xbf16>
    %c0_33 = arith.constant 0 : index
    %c0_34 = arith.constant 0 : index
    %c0_35 = arith.constant 0 : index
    %74 = vector.load %arg4[%c0_33, %c0_34, %c0_35] : memref<1x4x256xbf16, #tpu.memory_space<vmem>>, vector<1x1x256xbf16>
    %75 = vector.shape_cast %74 : vector<1x1x256xbf16> to vector<1x256xbf16>
    %76 = vector.shape_cast %73 : vector<1x256xbf16> to vector<1x1x256xbf16>
    tpu.vector_store %arg4[%c0_33, %c0_34, %c0_35], %76 {strides = array<i32>} : memref<1x4x256xbf16, #tpu.memory_space<vmem>>, vector<1x1x256xbf16>,
    %77 = vector.extract_strided_slice %67 {offsets = [3, 0], sizes = [1, 256], strides = [1, 1]} : vector<8x256xf32> to vector<1x256xf32>
    %78 = vector.extract_strided_slice %67 {offsets = [4, 0], sizes = [1, 256], strides = [1, 1]} : vector<8x256xf32> to vector<1x256xf32>
    %79 = arith.maximumf %77, %78 : vector<1x256xf32>
    %80 = vector.extract_strided_slice %67 {offsets = [5, 0], sizes = [1, 256], strides = [1, 1]} : vector<8x256xf32> to vector<1x256xf32>
    %81 = arith.maximumf %79, %80 : vector<1x256xf32>
    %82 = arith.truncf %81 : vector<1x256xf32> to vector<1x256xbf16>
    %c0_36 = arith.constant 0 : index
    %c1_37 = arith.constant 1 : index
    %c0_38 = arith.constant 0 : index
    %83 = vector.load %arg4[%c0_36, %c1_37, %c0_38] : memref<1x4x256xbf16, #tpu.memory_space<vmem>>, vector<1x1x256xbf16>
    %84 = vector.shape_cast %83 : vector<1x1x256xbf16> to vector<1x256xbf16>
    %85 = vector.shape_cast %82 : vector<1x256xbf16> to vector<1x1x256xbf16>
    tpu.vector_store %arg4[%c0_36, %c1_37, %c0_38], %85 {strides = array<i32>} : memref<1x4x256xbf16, #tpu.memory_space<vmem>>, vector<1x1x256xbf16>,
    %86 = vector.extract_strided_slice %62 {offsets = [24, 0], sizes = [8, 256], strides = [1, 1]} : vector<64x256xf32> to vector<8x256xf32>
    %87 = vector.extract_strided_slice %62 {offsets = [32, 0], sizes = [8, 256], strides = [1, 1]} : vector<64x256xf32> to vector<8x256xf32>
    %88 = arith.maximumf %86, %87 : vector<8x256xf32>
    %89 = vector.extract_strided_slice %62 {offsets = [40, 0], sizes = [8, 256], strides = [1, 1]} : vector<64x256xf32> to vector<8x256xf32>
    %90 = arith.maximumf %88, %89 : vector<8x256xf32>
    %91 = vector.extract_strided_slice %90 {offsets = [0, 0], sizes = [1, 256], strides = [1, 1]} : vector<8x256xf32> to vector<1x256xf32>
    %92 = vector.extract_strided_slice %90 {offsets = [1, 0], sizes = [1, 256], strides = [1, 1]} : vector<8x256xf32> to vector<1x256xf32>
    %93 = arith.maximumf %91, %92 : vector<1x256xf32>
    %94 = vector.extract_strided_slice %90 {offsets = [2, 0], sizes = [1, 256], strides = [1, 1]} : vector<8x256xf32> to vector<1x256xf32>
    %95 = arith.maximumf %93, %94 : vector<1x256xf32>
    %96 = arith.truncf %95 : vector<1x256xf32> to vector<1x256xbf16>
    %c0_39 = arith.constant 0 : index
    %c2_40 = arith.constant 2 : index
    %c0_41 = arith.constant 0 : index
    %97 = vector.load %arg4[%c0_39, %c2_40, %c0_41] : memref<1x4x256xbf16, #tpu.memory_space<vmem>>, vector<1x1x256xbf16>
    %98 = vector.shape_cast %97 : vector<1x1x256xbf16> to vector<1x256xbf16>
    %99 = vector.shape_cast %96 : vector<1x256xbf16> to vector<1x1x256xbf16>
    tpu.vector_store %arg4[%c0_39, %c2_40, %c0_41], %99 {strides = array<i32>} : memref<1x4x256xbf16, #tpu.memory_space<vmem>>, vector<1x1x256xbf16>,
    %100 = vector.extract_strided_slice %90 {offsets = [3, 0], sizes = [1, 256], strides = [1, 1]} : vector<8x256xf32> to vector<1x256xf32>
    %101 = vector.extract_strided_slice %90 {offsets = [4, 0], sizes = [1, 256], strides = [1, 1]} : vector<8x256xf32> to vector<1x256xf32>
    %102 = arith.maximumf %100, %101 : vector<1x256xf32>
    %103 = vector.extract_strided_slice %90 {offsets = [5, 0], sizes = [1, 256], strides = [1, 1]} : vector<8x256xf32> to vector<1x256xf32>
    %104 = arith.maximumf %102, %103 : vector<1x256xf32>
    %105 = arith.truncf %104 : vector<1x256xf32> to vector<1x256xbf16>
    %c0_42 = arith.constant 0 : index
    %c3_43 = arith.constant 3 : index
    %c0_44 = arith.constant 0 : index
    %106 = vector.load %arg4[%c0_42, %c3_43, %c0_44] : memref<1x4x256xbf16, #tpu.memory_space<vmem>>, vector<1x1x256xbf16>
    %107 = vector.shape_cast %106 : vector<1x1x256xbf16> to vector<1x256xbf16>
    %108 = vector.shape_cast %105 : vector<1x256xbf16> to vector<1x1x256xbf16>
    tpu.vector_store %arg4[%c0_42, %c3_43, %c0_44], %108 {strides = array<i32>} : memref<1x4x256xbf16, #tpu.memory_space<vmem>>, vector<1x1x256xbf16>,
    return
  }
  func.func @transform_0(%arg0: i32) -> (i32, i32, i32) {
    %c0_i32 = arith.constant 0 : i32
    %c0_i32_0 = arith.constant 0 : i32
    %c0_i32_1 = arith.constant 0 : i32
    return %arg0, %c0_i32, %c0_i32_0 : i32, i32, i32
  }
  func.func @transform_1(%arg0: i32) -> (i32, i32, i32) {
    %c0_i32 = arith.constant 0 : i32
    %c0_i32_0 = arith.constant 0 : i32
    %c0_i32_1 = arith.constant 0 : i32
    %c0_i32_2 = arith.constant 0 : i32
    return %c0_i32, %c0_i32_0, %c0_i32_1 : i32, i32, i32
  }
  func.func @transform_2(%arg0: i32) -> (i32, i32) {
    %c0_i32 = arith.constant 0 : i32
    %c0_i32_0 = arith.constant 0 : i32
    %c0_i32_1 = arith.constant 0 : i32
    return %c0_i32, %c0_i32_0 : i32, i32
  }
  func.func @transform_3(%arg0: i32) -> (i32, i32, i32) {
    %c0_i32 = arith.constant 0 : i32
    %c0_i32_0 = arith.constant 0 : i32
    %c0_i32_1 = arith.constant 0 : i32
    return %arg0, %c0_i32, %c0_i32_0 : i32, i32, i32
  }
}

module attributes {stable_mosaic.version = 11 : i64} {
  func.func @_mlp_kernel(%arg0: i32, %arg1: memref<8x1024xbf16, #tpu.memory_space<vmem>>, %arg2: memref<1024x512xbf16, #tpu.memory_space<vmem>>, %arg3: memref<1x512xf32, #tpu.memory_space<vmem>>, %arg4: memref<512x128xbf16, #tpu.memory_space<vmem>>, %arg5: memref<1x128xf32, #tpu.memory_space<vmem>>, %arg6: memref<8x128xf32, #tpu.memory_space<vmem>>) attributes {dimension_semantics = [#tpu.dimension_semantics<parallel>], iteration_bounds = array<i64: 1>, scalar_prefetch = 0 : i64, scratch_operands = 0 : i64, tpu.core_type = #tpu.core_type<tc>, window_params = [{transform_indices = @transform_0, window_bounds = array<i64: 8, 1024>}, {pipeline_mode = #tpu.pipeline_mode<synchronous>, transform_indices = @transform_1, window_bounds = array<i64: 1024, 512>}, {pipeline_mode = #tpu.pipeline_mode<synchronous>, transform_indices = @transform_2, window_bounds = array<i64: 1, 512>}, {pipeline_mode = #tpu.pipeline_mode<synchronous>, transform_indices = @transform_3, window_bounds = array<i64: 512, 128>}, {pipeline_mode = #tpu.pipeline_mode<synchronous>, transform_indices = @transform_4, window_bounds = array<i64: 1, 128>}, {transform_indices = @transform_5, window_bounds = array<i64: 8, 128>}]} {
    %c0 = arith.constant 0 : index
    %c0_0 = arith.constant 0 : index
    %0 = vector.load %arg1[%c0, %c0_0] : memref<8x1024xbf16, #tpu.memory_space<vmem>>, vector<8x1024xbf16>
    %c0_1 = arith.constant 0 : index
    %c0_2 = arith.constant 0 : index
    %1 = vector.load %arg2[%c0_1, %c0_2] : memref<1024x512xbf16, #tpu.memory_space<vmem>>, vector<1024x512xbf16>
    %cst = arith.constant dense<0.000000e+00> : vector<8x512xf32>
    %2 = tpu.matmul %0, %1, %cst {dimension_numbers = #tpu.dot_dimension_numbers<[1], [0], [0], [1], [0, 0, 1, 1], [], []>} : vector<8x1024xbf16>, vector<1024x512xbf16>, vector<8x512xf32> -> vector<8x512xf32>
    %c0_3 = arith.constant 0 : index
    %c0_4 = arith.constant 0 : index
    %3 = vector.load %arg3[%c0_3, %c0_4] : memref<1x512xf32, #tpu.memory_space<vmem>>, vector<1x512xf32>
    %4 = vector.broadcast %3 : vector<1x512xf32> to vector<8x512xf32>
    %5 = arith.addf %2, %4 : vector<8x512xf32>
    %6 = arith.truncf %5 : vector<8x512xf32> to vector<8x512xbf16>
    %c0_5 = arith.constant 0 : index
    %c0_6 = arith.constant 0 : index
    %7 = vector.load %arg4[%c0_5, %c0_6] : memref<512x128xbf16, #tpu.memory_space<vmem>>, vector<512x128xbf16>
    %cst_7 = arith.constant dense<0.000000e+00> : vector<8x128xf32>
    %8 = tpu.matmul %6, %7, %cst_7 {dimension_numbers = #tpu.dot_dimension_numbers<[1], [0], [0], [1], [0, 0, 1, 1], [], []>} : vector<8x512xbf16>, vector<512x128xbf16>, vector<8x128xf32> -> vector<8x128xf32>
    %c0_8 = arith.constant 0 : index
    %c0_9 = arith.constant 0 : index
    %9 = vector.load %arg5[%c0_8, %c0_9] : memref<1x128xf32, #tpu.memory_space<vmem>>, vector<1x128xf32>
    %10 = vector.broadcast %9 : vector<1x128xf32> to vector<8x128xf32>
    %11 = arith.addf %8, %10 : vector<8x128xf32>
    %c0_10 = arith.constant 0 : index
    %c0_11 = arith.constant 0 : index
    %12 = vector.load %arg6[%c0_10, %c0_11] : memref<8x128xf32, #tpu.memory_space<vmem>>, vector<8x128xf32>
    tpu.vector_store %arg6[%c0_10, %c0_11], %11 {strides = array<i32>} : memref<8x128xf32, #tpu.memory_space<vmem>>, vector<8x128xf32>,
    return
  }
  func.func @transform_0(%arg0: i32) -> (i32, i32) {
    %c0_i32 = arith.constant 0 : i32
    %c0_i32_0 = arith.constant 0 : i32
    return %arg0, %c0_i32 : i32, i32
  }
  func.func @transform_1(%arg0: i32) -> (i32, i32) {
    %c0_i32 = arith.constant 0 : i32
    %c0_i32_0 = arith.constant 0 : i32
    %c0_i32_1 = arith.constant 0 : i32
    return %c0_i32, %c0_i32_0 : i32, i32
  }
  func.func @transform_2(%arg0: i32) -> (i32, i32) {
    %c0_i32 = arith.constant 0 : i32
    %c0_i32_0 = arith.constant 0 : i32
    %c0_i32_1 = arith.constant 0 : i32
    return %c0_i32, %c0_i32_0 : i32, i32
  }
  func.func @transform_3(%arg0: i32) -> (i32, i32) {
    %c0_i32 = arith.constant 0 : i32
    %c0_i32_0 = arith.constant 0 : i32
    %c0_i32_1 = arith.constant 0 : i32
    return %c0_i32, %c0_i32_0 : i32, i32
  }
  func.func @transform_4(%arg0: i32) -> (i32, i32) {
    %c0_i32 = arith.constant 0 : i32
    %c0_i32_0 = arith.constant 0 : i32
    %c0_i32_1 = arith.constant 0 : i32
    return %c0_i32, %c0_i32_0 : i32, i32
  }
  func.func @transform_5(%arg0: i32) -> (i32, i32) {
    %c0_i32 = arith.constant 0 : i32
    %c0_i32_0 = arith.constant 0 : i32
    return %arg0, %c0_i32 : i32, i32
  }
}

</mosaic_0001>

<bundles_post_ra>
// kernel: scratch_mnist_forward.3
= control target key start
LH: loop header
LB: loop body
LE: loop exit
PB: predicated region body
PF: predicated region fallthrough
CT: control target
= control target key end

     0   :  { %s1265_s12 = smov 0   ;;  %s1666_s0 = inlined_call_operand.vmem [shape: bf16[2,576,25], index: 0, kind: input, shape index: {}]   ;;  %s1667_s1 = inlined_call_operand.vmem [shape: bf16[25,128], index: 1, kind: input, shape index: {}]   ;;  %s1668_s2 = inlined_call_operand.vmem [shape: f32[1,128], index: 2, kind: input, shape index: {}]   ;;  %s1669_s3 = inlined_call_operand.vmem [shape: bf16[2,88,128], index: 3, kind: output, shape index: {}]  }
   0x1 LB: > { %s958_s13 = sadd.s32 4294967295, %s1241_s12   ;;  %p962_p0 = scmp.ge.s32.totalorder %s1241_s12, 1  ;;  %s1241_s12 = sphi %s1265_s12, %s13_s12  }
   0x2   : > { %p137_p1 = scmp.lt.s32.totalorder %s1241_s12, 3 }
   0x4   : > { %p138_p2 = pnand %p962_p0, %p137_p1 }
   0x5   : > { %p161_p3 = scmp.lt.s32.totalorder (!%p138_p2), %s958_s13, 1 }
   0x6   : > { %141 = sbr.rel (%p138_p2) target bundleno = 307 (0x133), region = 32 }
   0xb   : > { %v1115_v0 = vld [vmem:[%s1667_s1 + $0x8] sm:$0xf]  ;;  %v1192_v1 = vld [vmem:[%s1667_s1 + $0x8] sm:$0x10]  ;;  %vm552_vm0 = vcmask 1043456   ;;  %vm553_vm1 = vcmask 1044480  }
   0xc   : > { %v1116_v2 = vor.u32 %v1192_v1, %v1115_v0  ;;  %v1243_v3 = vmov 65535   ;;  %s1671_s13 = smov (!%p161_p3, %s958_s13), 1  ;;  %v1191_v7 = vld [vmem:[%s1667_s1] sm:$0xff]  ;;  %vm443_vm2 = vcmask 203776  }
   0xd   : > { %v554_v4 = vsel %vm552_vm0, 4294967295, %v1243_v3  ;;  %s1222_s18 = smul.u32 288, %s1671_s13 }
   0xe   : > { %v555_v5 = vsel %vm553_vm1, %v554_v4, 0  ;;  %s1223_s26 = smul.u32 44, %s1671_s13 }
   0xf   : > { %v557_v6 = vand.u32 %v1116_v2, %v555_v5  ;;  %s1288_s23 = scalar_lea.vmem %s1666_s0, %s1222_s18 }
  0x10   : > { %v1155_v8 = vld [vmem:[%s1288_s23] sm:$0xff]  ;;  %v1164_v9 = vld [vmem:[%s1288_s23 + $0x48] sm:$0xff]  ;;  %v1173_v10 = vld [vmem:[%s1288_s23 + $0x90] sm:$0xff]  ;;  %s1567_s29 = scalar_lea.vmem %s1669_s3, %s1223_s26 }
  0x11   : > { %565 = vmatpush.bf16.msra.mxu0 %v557_v6  ;;  %1216 = vmatpush.bf16.msra.mxu1 %v557_v6  ;;  %v1182_v11 = vld [vmem:[%s1288_s23 + $0xd8] sm:$0xff]  ;;  %v1156_v12 = vld [vmem:[%s1288_s23 + $0x8] sm:$0xff]  ;;  %v1165_v13 = vld [vmem:[%s1288_s23 + $0x50] sm:$0xff] }
  0x12   : > { %1217 = vmatpush.bf16.msra.mxu2 %v557_v6  ;;  %1218 = vmatpush.bf16.msra.mxu3 %v557_v6  ;;  %v1174_v14 = vld [vmem:[%s1288_s23 + $0x98] sm:$0xff]  ;;  %v1183_v15 = vld [vmem:[%s1288_s23 + $0xe0] sm:$0xff]  ;;  %v1157_v16 = vld [vmem:[%s1288_s23 + $0x10] sm:$0xff] }
  0x13   : > { %v1166_v17 = vld [vmem:[%s1288_s23 + $0x58] sm:$0xff]  ;;  %v1175_v18 = vld [vmem:[%s1288_s23 + $0xa0] sm:$0xff]  ;;  %v1184_v19 = vld [vmem:[%s1288_s23 + $0xe8] sm:$0xff] }
  0x14   : > { %v1158_v20 = vld [vmem:[%s1288_s23 + $0x18] sm:$0xff]  ;;  %v1167_v21 = vld [vmem:[%s1288_s23 + $0x60] sm:$0xff]  ;;  %v1176_v22 = vld [vmem:[%s1288_s23 + $0xa8] sm:$0xff] }
  0x15   : > { %566 = vmatpush.bf16.msra.mxu0 %v1191_v7  ;;  %1219 = vmatpush.bf16.msra.mxu1 %v1191_v7  ;;  %v1185_v23 = vld [vmem:[%s1288_s23 + $0xf0] sm:$0xff]  ;;  %v1159_v24 = vld [vmem:[%s1288_s23 + $0x20] sm:$0xff]  ;;  %v1168_v25 = vld [vmem:[%s1288_s23 + $0x68] sm:$0xff] }
  0x16   : > { %1220 = vmatpush.bf16.msra.mxu2 %v1191_v7  ;;  %1221 = vmatpush.bf16.msra.mxu3 %v1191_v7  ;;  %v1177_v26 = vld [vmem:[%s1288_s23 + $0xb0] sm:$0xff]  ;;  %v1186_v27 = vld [vmem:[%s1288_s23 + $0xf8] sm:$0xff]  ;;  %v1160_v28 = vld [vmem:[%s1288_s23 + $0x28] sm:$0xff] }
  0x17   : > { %v1169_v29 = vld [vmem:[%s1288_s23 + $0x70] sm:$0xff]  ;;  %v1178_v30 = vld [vmem:[%s1288_s23 + $0xb8] sm:$0xff]  ;;  %v1187_v31 = vld [vmem:[%s1288_s23 + $0x100] sm:$0xff] }
  0x18   : > { %1117 = vmatmul.msk.bf16.vlgmr.msra.gmra.mxu0 %vm443_vm2, %v1155_v8  ;;  %1126 = vmatmul.msk.bf16.vlgmr.msra.gmra.mxu1 %vm443_vm2, %v1164_v9  ;;  %v1161_v32 = vld [vmem:[%s1288_s23 + $0x30] sm:$0xff]  ;;  %v1170_v33 = vld [vmem:[%s1288_s23 + $0x78] sm:$0xff]  ;;  %v1179_v34 = vld [vmem:[%s1288_s23 + $0xc0] sm:$0xff] }
  0x19   : > { %1135 = vmatmul.msk.bf16.vlgmr.msra.gmra.mxu2 %vm443_vm2, %v1173_v10  ;;  %1144 = vmatmul.msk.bf16.vlgmr.msra.gmra.mxu3 %vm443_vm2, %v1182_v11  ;;  %v1188_v35 = vld [vmem:[%s1288_s23 + $0x108] sm:$0xff]  ;;  %v1162_v36 = vld [vmem:[%s1288_s23 + $0x38] sm:$0xff]  ;;  %v1171_v37 = vld [vmem:[%s1288_s23 + $0x80] sm:$0xff] }
  0x1a   : > { %v1180_v38 = vld [vmem:[%s1288_s23 + $0xc8] sm:$0xff]  ;;  %v1189_v39 = vld [vmem:[%s1288_s23 + $0x110] sm:$0xff]  ;;  %v1163_v40 = vld [vmem:[%s1288_s23 + $0x40] sm:$0xff] }
  0x1b   : > { %v1172_v41 = vld [vmem:[%s1288_s23 + $0x88] sm:$0xff]  ;;  %v1181_v44 = vld [vmem:[%s1288_s23 + $0xd0] sm:$0xff]  ;;  %v1190_v45 = vld [vmem:[%s1288_s23 + $0x118] sm:$0xff] }
  0x1c   : > { %v1413_v10 = vld [vmem:[%s1668_s2] ss:$0 sm:$0xff] }
  0x28   : > { %1118 = vmatmul.msk.bf16.gmra.mxu0 %vm443_vm2, %v1156_v12  ;;  %1127 = vmatmul.msk.bf16.gmra.mxu1 %vm443_vm2, %v1165_v13 }
  0x29   : > { %1136 = vmatmul.msk.bf16.gmra.mxu2 %vm443_vm2, %v1174_v14  ;;  %1145 = vmatmul.msk.bf16.gmra.mxu3 %vm443_vm2, %v1183_v15 }
  0x38   : > { %1119 = vmatmul.msk.bf16.gmra.mxu0 %vm443_vm2, %v1157_v16  ;;  %1128 = vmatmul.msk.bf16.gmra.mxu1 %vm443_vm2, %v1166_v17 }
  0x39   : > { %1137 = vmatmul.msk.bf16.gmra.mxu2 %vm443_vm2, %v1175_v18  ;;  %1146 = vmatmul.msk.bf16.gmra.mxu3 %vm443_vm2, %v1184_v19 }
  0x48   : > { %1120 = vmatmul.msk.bf16.gmra.mxu0 %vm443_vm2, %v1158_v20  ;;  %1129 = vmatmul.msk.bf16.gmra.mxu1 %vm443_vm2, %v1167_v21 }
  0x49   : > { %1138 = vmatmul.msk.bf16.gmra.mxu2 %vm443_vm2, %v1176_v22  ;;  %1147 = vmatmul.msk.bf16.gmra.mxu3 %vm443_vm2, %v1185_v23 }
  0x58   : > { %1121 = vmatmul.msk.bf16.gmra.mxu0 %vm443_vm2, %v1159_v24  ;;  %1130 = vmatmul.msk.bf16.gmra.mxu1 %vm443_vm2, %v1168_v25 }
  0x59   : > { %1139 = vmatmul.msk.bf16.gmra.mxu2 %vm443_vm2, %v1177_v26  ;;  %1148 = vmatmul.msk.bf16.gmra.mxu3 %vm443_vm2, %v1186_v27 }
  0x68   : > { %1122 = vmatmul.msk.bf16.gmra.mxu0 %vm443_vm2, %v1160_v28  ;;  %1131 = vmatmul.msk.bf16.gmra.mxu1 %vm443_vm2, %v1169_v29 }
  0x69   : > { %1140 = vmatmul.msk.bf16.gmra.mxu2 %vm443_vm2, %v1178_v30  ;;  %1149 = vmatmul.msk.bf16.gmra.mxu3 %vm443_vm2, %v1187_v31 }
  0x78   : > { %1123 = vmatmul.msk.bf16.gmra.mxu0 %vm443_vm2, %v1161_v32  ;;  %1132 = vmatmul.msk.bf16.gmra.mxu1 %vm443_vm2, %v1170_v33 }
  0x79   : > { %1141 = vmatmul.msk.bf16.gmra.mxu2 %vm443_vm2, %v1179_v34  ;;  %1150 = vmatmul.msk.bf16.gmra.mxu3 %vm443_vm2, %v1188_v35 }
  0x88   : > { %1124 = vmatmul.msk.bf16.gmra.mxu0 %vm443_vm2, %v1162_v36  ;;  %1133 = vmatmul.msk.bf16.gmra.mxu1 %vm443_vm2, %v1171_v37 }
  0x89   : > { %1142 = vmatmul.msk.bf16.gmra.mxu2 %vm443_vm2, %v1180_v38  ;;  %1151 = vmatmul.msk.bf16.gmra.mxu3 %vm443_vm2, %v1189_v39 }
  0x95   : > { %v568_v42 = vpop.f32.mrf.mxu0  ;;  %v613_v43 = vpop.f32.mrf.mxu1 }
  0x96   : > { %v569_v11 = vadd.f32 %v1413_v10, %v568_v42  ;;  %v614_v29 = vadd.f32 %v1413_v10, %v613_v43 }
  0x98   : > { %1125 = vmatmul.msk.bf16.gmra.mxu0 %vm443_vm2, %v1163_v40  ;;  %1134 = vmatmul.msk.bf16.gmra.mxu1 %vm443_vm2, %v1172_v41  ;;  %v748_v17 = vmax.f32 %v569_v11, 0.0  ;;  %v766_v34 = vmax.f32 %v614_v29, 0.0 }
  0x99   : > { %1143 = vmatmul.msk.bf16.gmra.mxu2 %vm443_vm2, %v1181_v44  ;;  %1152 = vmatmul.msk.bf16.gmra.mxu3 %vm443_vm2, %v1190_v45 }
  0x9c   : > { %v1362_v46 = vpop.f32.mrf.mxu2  ;;  %v1364_v47 = vpop.f32.mrf.mxu3 }
  0x9d   : > { %v1366_v48 = vpop.f32.mrf.mxu0  ;;  %v615_v49 = vpop.f32.mrf.mxu1 }
  0x9e   : > { %v616_v43 = vadd.f32 %v1413_v10, %v615_v49 }
  0xa4   : > { %v1368_v50 = vpop.f32.mrf.mxu2  ;;  %v1370_v51 = vpop.f32.mrf.mxu3 }
  0xa5   : > { %v573_v52 = vpop.f32.mrf.mxu0  ;;  %v1372_v53 = vpop.f32.mrf.mxu1 }
  0xa6   : > { %v574_v24 = vadd.f32 %v1413_v10, %v573_v52  ;;  %v619_v49 = vadd.f32 %v1413_v10, %v1372_v53 }
  0xa8   : > { %v750_v31 = vmax.f32 %v574_v24, 0.0 }
  0xac   : > { %v1374_v54 = vpop.f32.mrf.mxu2  ;;  %v1376_v55 = vpop.f32.mrf.mxu3 }
  0xad   : > { %v575_v56 = vpop.f32.mrf.mxu0  ;;  %v1378_v57 = vpop.f32.mrf.mxu1 }
  0xae   : > { %v576_v36 = vadd.f32 %v1413_v10, %v575_v56 }
  0xb0   : > { %v751_v52 = vmax.f32 %v576_v36, 0.0 }
  0xb4   : > { %v1380_v58 = vpop.f32.mrf.mxu2  ;;  %v1382_v59 = vpop.f32.mrf.mxu3 }
  0xb5   : > { %v578_v60 = vpop.f32.mrf.mxu0  ;;  %v1384_v61 = vpop.f32.mrf.mxu1 }
  0xb6   : > { %v579_v56 = vadd.f32 %v1413_v10, %v578_v60  ;;  %v659_v60 = vadd.f32 %v1413_v10, %v1362_v46  ;;  %v621_v46 = vadd.f32 %v1413_v10, %v1378_v57 }
  0xbc   : > { %v1386_v62 = vpop.f32.mrf.mxu2  ;;  %v1388_v63 = vpop.f32.mrf.mxu3 }
  0xbd   : > { %v1390_v0 = vpop.f32.mrf.mxu0  ;;  %v1392_v1 = vpop.f32.mrf.mxu1 }
  0xc4   : > { %v1394_v2 = vpop.f32.mrf.mxu2  ;;  %v1396_v3 = vpop.f32.mrf.mxu3 }
  0xc5   : > { %v1398_v4 = vpop.f32.mrf.mxu0  ;;  %v1400_v5 = vpop.f32.mrf.mxu1 }
  0xcc   : > { %v1402_v6 = vpop.f32.mrf.mxu2  ;;  %v1404_v7 = vpop.f32.mrf.mxu3 }
  0xcd   : > { %v1406_v8 = vpop.f32.mrf.mxu0  ;;  %v1408_v9 = vpop.f32.mrf.mxu1 }
  0xd4   : > { %v1416_v12 = vpop.f32.mrf.mxu2  ;;  %v1418_v13 = vpop.f32.mrf.mxu3 }
  0xd5   : > { %v588_v14 = vpop.f32.mrf.mxu0  ;;  %v633_v15 = vpop.f32.mrf.mxu1 }
  0xd6   : > { %v589_v16 = vadd.f32 %v1413_v10, %v588_v14  ;;  %v634_v32 = vadd.f32 %v1413_v10, %v633_v15  ;;  %v767_v14 = vmax.f32 %v616_v43, 0.0 }
  0xd8   : > { %v756_v18 = vmax.f32 %v589_v16, 0.0  ;;  %v774_v37 = vmax.f32 %v634_v32, 0.0 }
  0xda   : > { %v1421_v19 = vmax.f32 %v748_v17, %v756_v18 }
  0xdc   : > { %v678_v20 = vpop.f32.mrf.mxu2  ;;  %v1423_v21 = vpop.f32.mrf.mxu3 }
  0xdd   : > { %v1425_v22 = vpop.f32.mrf.mxu0  ;;  %v1427_v23 = vpop.f32.mrf.mxu1  ;;  %v679_v36 = vadd.f32 %v1413_v10, %v678_v20 }
  0xe4   : > { %v1430_v25 = vpop.f32.mrf.mxu2  ;;  %v1432_v26 = vpop.f32.mrf.mxu3 }
  0xe5   : > { %v593_v27 = vpop.f32.mrf.mxu0  ;;  %v638_v28 = vpop.f32.mrf.mxu1 }
  0xe6   : > { %v594_v30 = vadd.f32 %v1413_v10, %v593_v27 }
  0xe8   : > { %v758_v33 = vmax.f32 %v594_v30, 0.0  ;;  %v752_v30 = vmax.f32 %v579_v56, 0.0 }
  0xea   : > { %v822_v35 = vmax.f32 %v750_v31, %v758_v33  ;;  %v639_v31 = vadd.f32 %v1413_v10, %v638_v28  ;;  %v768_v33 = vmax.f32 %v619_v49, 0.0  ;;  %v784_v28 = vmax.f32 %v659_v60, 0.0 }
  0xeb   : > { %v769_v49 = vmax.f32 %v621_v46, 0.0 }
  0xec   : > { %v830_v38 = vmax.f32 %v822_v35, %v766_v34  ;;  %v1438_v39 = vpop.f32.mrf.mxu2  ;;  %v1440_v40 = vpop.f32.mrf.mxu3  ;;  %v581_v35 = vadd.f32 %v1413_v10, %v1390_v0  ;;  %v792_v0 = vmax.f32 %v679_v36, 0.0  ;;  %v624_v36 = vadd.f32 %v1413_v10, %v1384_v61 }
  0xed   : > { %v595_v41 = vpop.f32.mrf.mxu0  ;;  %v640_v42 = vpop.f32.mrf.mxu1 }
  0xee   : > { %v596_v44 = vadd.f32 %v1413_v10, %v595_v41  ;;  %v1444_v45 = vmax.f32 %v830_v38, %v774_v37  ;;  %v776_v37 = vmax.f32 %v639_v31, 0.0  ;;  %v641_v20 = vadd.f32 %v1413_v10, %v640_v42 }
  0xef   : > { %v584_v31 = vadd.f32 %v1413_v10, %v1398_v4  ;;  %v1484_v42 = vadd.f32 %v1413_v10, %v1364_v47  ;;  %v664_v47 = vadd.f32 %v1413_v10, %v1374_v54  ;;  %v1515_v54 = vadd.f32 %v1413_v10, %v1386_v62 }
  0xf0   : > { %v759_v11 = vmax.f32 %v596_v44, 0.0  ;;  %v777_v57 = vmax.f32 %v641_v20, 0.0 }
  0xf1   : > { %v754_v46 = vmax.f32 %v584_v31, 0.0 }
  0xf2   : > { %v823_v15 = vmax.f32 %v751_v52, %v759_v11 }
  0xf4   : > { %v1447_v16 = vmax.f32 %v823_v15, %v767_v14  ;;  %v1449_v17 = vpop.f32.mrf.mxu2  ;;  %v1451_v18 = vpop.f32.mrf.mxu3  ;;  %v753_v14 = vmax.f32 %v581_v35, 0.0 }
  0xf5   : > { %v598_v24 = vpop.f32.mrf.mxu0  ;;  %v643_v27 = vpop.f32.mrf.mxu1 }
  0xf6   : > { %v599_v29 = vadd.f32 %v1413_v10, %v598_v24  ;;  %v661_v24 = vadd.f32 %v1413_v10, %v1368_v50  ;;  %v644_v61 = vadd.f32 %v1413_v10, %v643_v27  ;;  %v786_v27 = vmax.f32 %v664_v47, 0.0 }
  0xf8   : > { %v760_v32 = vmax.f32 %v599_v29, 0.0  ;;  %v785_v50 = vmax.f32 %v661_v24, 0.0  ;;  %v778_v24 = vmax.f32 %v644_v61, 0.0 }
  0xfa   : > { %v824_v34 = vmax.f32 %v752_v30, %v760_v32 }
  0xfc   : > { %v832_v38 = vmax.f32 %v824_v34, %v768_v33  ;;  %v1462_v41 = vpop.f32.mrf.mxu2  ;;  %v1464_v53 = vpop.f32.mrf.mxu3 }
  0xfd   : > { %v600_v43 = vpop.f32.mrf.mxu0  ;;  %v1466_v44 = vpop.f32.mrf.mxu1 }
  0xfe   : > { %v840_v52 = vmax.f32 %v832_v38, %v776_v37  ;;  %v601_v11 = vadd.f32 %v1413_v10, %v600_v43  ;;  %v1493_v38 = vadd.f32 %v1413_v10, %v1366_v48  ;;  %v1497_v43 = vadd.f32 %v1413_v10, %v1370_v51 }
  0xff   : > { %v1510_v48 = vadd.f32 %v1413_v10, %v1380_v58  ;;  %v802_v51 = vmax.f32 %v1484_v42, 0.0  ;;  %v684_v58 = vadd.f32 %v1413_v10, %v1438_v39 }
 0x100   : > { %v761_v15 = vmax.f32 %v601_v11, 0.0  ;;  %v848_v56 = vmax.f32 %v840_v52, %v784_v28  ;;  %v1503_v28 = vadd.f32 %v1413_v10, %v1376_v55  ;;  %v749_v55 = vmax.f32 %v1493_v38, 0.0 }
 0x101   : > { %v803_v20 = vmax.f32 %v1497_v43, 0.0  ;;  %v787_v31 = vmax.f32 %v1510_v48, 0.0  ;;  %v794_v47 = vmax.f32 %v684_v58, 0.0 }
 0x102   : > { %v825_v29 = vmax.f32 %v753_v14, %v761_v15  ;;  %v1474_v30 = vmax.f32 %v848_v56, %v792_v0  ;;  %v770_v14 = vmax.f32 %v624_v36, 0.0  ;;  %v586_v15 = vadd.f32 %v1413_v10, %v1406_v8 }
 0x103   : > { %v804_v56 = vmax.f32 %v1503_v28, 0.0  ;;  %v1533_v8 = vadd.f32 %v1413_v10, %v1388_v63  ;;  %v1548_v63 = vadd.f32 %v1413_v10, %v1396_v3  ;;  %v674_v3 = vadd.f32 %v1413_v10, %v1402_v6 }
 0x104   : > { %v833_v32 = vmax.f32 %v825_v29, %v769_v49  ;;  %v1478_v60 = vpop.f32.mrf.mxu2  ;;  %v1480_v33 = vpop.f32.mrf.mxu3  ;;  %v591_v6 = vadd.f32 %v1413_v10, %v1425_v22  ;;  %v1581_v22 = vadd.f32 %v1413_v10, %v1408_v9 }
 0x105   : > { %v603_v34 = vpop.f32.mrf.mxu0  ;;  %v1486_v35 = vpop.f32.mrf.mxu1 }
 0x106   : > { %v841_v37 = vmax.f32 %v833_v32, %v777_v57  ;;  %v604_v4 = vadd.f32 %v1413_v10, %v603_v34  ;;  %v1529_v57 = vadd.f32 %v1413_v10, %v1382_v59  ;;  %v626_v32 = vadd.f32 %v1413_v10, %v1392_v1 }
 0x107   : > { %v788_v34 = vmax.f32 %v1515_v54, 0.0  ;;  %v629_v1 = vadd.f32 %v1413_v10, %v1400_v5 }
 0x108   : > { %v762_v52 = vmax.f32 %v604_v4, 0.0  ;;  %v1506_v11 = vmax.f32 %v841_v37, %v785_v50  ;;  %v1542_v50 = vadd.f32 %v1413_v10, %v1394_v2  ;;  %v755_v37 = vmax.f32 %v586_v15, 0.0 }
 0x109   : > { %v724_v4 = vadd.f32 %v1413_v10, %v1423_v21  ;;  %v646_v2 = vadd.f32 %v1413_v10, %v1466_v44  ;;  %v771_v48 = vmax.f32 %v626_v32, 0.0  ;;  %v807_v44 = vmax.f32 %v1548_v63, 0.0 }
 0x10a   : > { %v826_v0 = vmax.f32 %v754_v46, %v762_v52  ;;  %v806_v52 = vmax.f32 %v1533_v8, 0.0  ;;  %v789_v5 = vmax.f32 %v1542_v50, 0.0  ;;  %v1244_v15 = vmov 0  }
 0x10b   : > { %900 = vst [vmem:[%s1567_s29 + $0x20] sm:$0xf] %v1244_v15  ;;  %v810_v58 = vmax.f32 %v724_v4, 0.0  ;;  %v691_v8 = vadd.f32 %v1413_v10, %v1478_v60 }
 0x10c   : > { %v834_v49 = vmax.f32 %v826_v0, %v770_v14  ;;  %v693_v29 = vpop.f32.mrf.mxu2  ;;  %v1524_v62 = vpop.f32.mrf.mxu3  ;;  %v1561_v14 = vadd.f32 %v1413_v10, %v1404_v7  ;;  %v686_v7 = vadd.f32 %v1413_v10, %v1449_v17  ;;  %901 = vst [vmem:[%s1567_s29 + $0x24] sm:$0xf] %v1244_v15  ;;  %v1585_v17 = vadd.f32 %v1413_v10, %v1416_v12 }
 0x10d   : > { %v605_v42 = vpop.f32.mrf.mxu0  ;;  %v1537_v39 = vpop.f32.mrf.mxu1  ;;  %902 = vst [vmem:[%s1567_s29 + $0x28] sm:$0xf] %v1244_v15  ;;  %v694_v12 = vadd.f32 %v1413_v10, %v693_v29 }
 0x10e   : > { %v842_v36 = vmax.f32 %v834_v49, %v778_v24  ;;  %v606_v59 = vadd.f32 %v1413_v10, %v605_v42  ;;  %v779_v24 = vmax.f32 %v646_v2, 0.0  ;;  %v795_v9 = vmax.f32 %v686_v7, 0.0 }
 0x10f   : > { %v651_v43 = vadd.f32 %v1413_v10, %v1537_v39 }
 0x110   : > { %v850_v46 = vmax.f32 %v842_v36, %v786_v27  ;;  %v763_v61 = vmax.f32 %v606_v59, 0.0  ;;  %v772_v27 = vmax.f32 %v629_v1, 0.0  ;;  %v790_v59 = vmax.f32 %v674_v3, 0.0 }
 0x111   : > { %v808_v1 = vmax.f32 %v1561_v14, 0.0  ;;  %v649_v3 = vadd.f32 %v1413_v10, %v1486_v35  ;;  %v791_v35 = vmax.f32 %v1585_v17, 0.0 }
 0x112   : > { %v827_v0 = vmax.f32 %v755_v37, %v763_v61  ;;  %v858_v21 = vmax.f32 %v850_v46, %v794_v47  ;;  %v757_v61 = vmax.f32 %v591_v6, 0.0  ;;  %v681_v6 = vadd.f32 %v1413_v10, %v1430_v25 }
 0x113   : > { %v798_v25 = vmax.f32 %v694_v12, 0.0 }
 0x114   : > { %v835_v49 = vmax.f32 %v827_v0, %v771_v48  ;;  %v695_v32 = vpop.f32.mrf.mxu2  ;;  %v1575_v42 = vpop.f32.mrf.mxu3  ;;  %v866_v36 = vmax.f32 %v858_v21, %v802_v51  ;;  %v636_v48 = vadd.f32 %v1413_v10, %v1427_v23  ;;  %v1606_v23 = vadd.f32 %v1413_v10, %v1432_v26 }
 0x115   : > { %v608_v37 = vpop.f32.mrf.mxu0  ;;  %v653_v4 = vpop.f32.mrf.mxu1  ;;  %v741_v28 = vadd.f32 %v1413_v10, %v1575_v42 }
 0x116   : > { %v843_v47 = vmax.f32 %v835_v49, %v779_v24  ;;  %v609_v2 = vadd.f32 %v1413_v10, %v608_v37  ;;  %v654_v51 = vadd.f32 %v1413_v10, %v653_v4  ;;  %v1590_v46 = vmax.f32 %v866_v36, %v810_v58 }
 0x117   : > { %v773_v24 = vmax.f32 %v1581_v22, 0.0  ;;  %v1600_v49 = vadd.f32 %v1413_v10, %v1418_v13  ;;  %v821_v58 = vmax.f32 %v749_v55, %v757_v61  ;;  %v775_v36 = vmax.f32 %v636_v48, 0.0 }
 0x118   : > { %v851_v0 = vmax.f32 %v843_v47, %v787_v31  ;;  %v764_v21 = vmax.f32 %v609_v2, 0.0  ;;  %v782_v15 = vmax.f32 %v654_v51, 0.0  ;;  %v689_v13 = vadd.f32 %v1413_v10, %v1462_v41 }
 0x119   : > { %v780_v22 = vmax.f32 %v649_v3, 0.0  ;;  %v839_v51 = vmax.f32 %v1447_v16, %v775_v36  ;;  %v817_v50 = vmax.f32 %v741_v28, 0.0 }
 0x11a   : > { %v828_v29 = vmax.f32 %v1421_v19, %v764_v21  ;;  %v846_v31 = vmax.f32 %v1444_v45, %v782_v15  ;;  %v859_v7 = vmax.f32 %v851_v0, %v795_v9  ;;  %v793_v19 = vmax.f32 %v681_v6, 0.0 }
 0x11b   : > { %v811_v45 = vmax.f32 %v1606_v23, 0.0  ;;  %v729_v21 = vadd.f32 %v1413_v10, %v1440_v40  ;;  %v734_v15 = vadd.f32 %v1413_v10, %v1464_v53  ;;  %v781_v40 = vmax.f32 %v651_v43, 0.0 }
 0x11c   : > { %v836_v37 = vmax.f32 %v828_v29, %v772_v27  ;;  %v854_v4 = vmax.f32 %v846_v31, %v790_v59  ;;  %v698_v26 = vpop.f32.mrf.mxu2  ;;  %v743_v47 = vpop.f32.mrf.mxu3  ;;  %v867_v17 = vmax.f32 %v859_v7, %v803_v20  ;;  %v796_v59 = vmax.f32 %v689_v13, 0.0 }
 0x11d   : > { %v699_v2 = vadd.f32 %v1413_v10, %v698_v26  ;;  %v610_v38 = vpop.f32.mrf.mxu0  ;;  %v655_v55 = vpop.f32.mrf.mxu1  ;;  %v696_v20 = vadd.f32 %v1413_v10, %v695_v32  ;;  %v744_v39 = vadd.f32 %v1413_v10, %v743_v47  ;;  %v731_v32 = vadd.f32 %v1413_v10, %v1451_v18 }
 0x11e   : > { %v844_v61 = vmax.f32 %v836_v37, %v780_v22  ;;  %v862_v41 = vmax.f32 %v854_v4, %v798_v25  ;;  %v611_v48 = vadd.f32 %v1413_v10, %v610_v38  ;;  %v656_v27 = vadd.f32 %v1413_v10, %v655_v55 }
 0x11f   : > { %v800_v9 = vmax.f32 %v699_v2, 0.0  ;;  %v799_v29 = vmax.f32 %v696_v20, 0.0  ;;  %v818_v13 = vmax.f32 %v744_v39, 0.0  ;;  %v797_v37 = vmax.f32 %v691_v8, 0.0 }
 0x120   : > { %v852_v3 = vmax.f32 %v844_v61, %v788_v34  ;;  %v870_v12 = vmax.f32 %v862_v41, %v806_v52  ;;  %v765_v16 = vmax.f32 %v611_v48, 0.0  ;;  %v783_v0 = vmax.f32 %v656_v27, 0.0 }
 0x121   : > { %v864_v6 = vmax.f32 %v1474_v30, %v800_v9  ;;  %v736_v52 = vadd.f32 %v1413_v10, %v1480_v33  ;;  %v739_v33 = vadd.f32 %v1413_v10, %v1524_v62  ;;  %v809_v62 = vmax.f32 %v1600_v49, 0.0 }
 0x122   : > { %v860_v54 = vmax.f32 %v852_v3, %v796_v59  ;;  %v829_v34 = vmax.f32 %v821_v58, %v765_v16  ;;  %v847_v23 = vmax.f32 %v839_v51, %v783_v0  ;;  %v814_v58 = vmax.f32 %v734_v15, 0.0 }
 0x123   : > { %v872_v53 = vmax.f32 %v864_v6, %v808_v1  ;;  %v857_v1 = vmax.f32 %v1506_v11, %v793_v19  ;;  %v815_v4 = vmax.f32 %v736_v52, 0.0  ;;  %v882_v2 = vmax.f32 %v1590_v46, %v818_v13 }
 0x124   : > { %v868_v30 = vmax.f32 %v860_v54, %v804_v56  ;;  %v837_v31 = vmax.f32 %v829_v34, %v773_v24  ;;  %v855_v7 = vmax.f32 %v847_v23, %v791_v35  ;;  %v700_v18 = vpop.f32.mrf.mxu2  ;;  %v745_v36 = vpop.f32.mrf.mxu3  ;;  %v875_v35 = vmax.f32 %v867_v17, %v811_v45 }
 0x125   : > { %v701_v22 = vadd.f32 %v1413_v10, %v700_v18  ;;  %v746_v60 = vadd.f32 %v1413_v10, %v745_v36  ;;  %v805_v10 = vmax.f32 %v1529_v57, 0.0  ;;  %v878_v42 = vmax.f32 %v870_v12, %v814_v58 }
 0x126   : > { %v845_v25 = vmax.f32 %v837_v31, %v781_v40  ;;  %v863_v14 = vmax.f32 %v855_v7, %v799_v29  ;;  %v816_v45 = vmax.f32 %v739_v33, 0.0  ;;  %v813_v55 = vmax.f32 %v731_v32, 0.0 }
 0x127   : > { %v801_v56 = vmax.f32 %v701_v22, 0.0  ;;  %v819_v24 = vmax.f32 %v746_v60, 0.0 }
 0x128   : > { %v853_v26 = vmax.f32 %v845_v25, %v789_v5  ;;  %v871_v47 = vmax.f32 %v863_v14, %v807_v44  ;;  %v812_v44 = vmax.f32 %v729_v21, 0.0  ;;  %v880_v46 = vmax.f32 %v872_v53, %v816_v45 }
 0x129   : > { %v865_v38 = vmax.f32 %v857_v1, %v801_v56  ;;  %v883_v11 = vmax.f32 %v875_v35, %v819_v24 }
 0x12a   : > { %v861_v17 = vmax.f32 %v853_v26, %v797_v37  ;;  %v879_v19 = vmax.f32 %v871_v47, %v815_v4  ;;  %v876_v41 = vmax.f32 %v868_v30, %v812_v44 }
 0x12b   : > { %v873_v5 = vmax.f32 %v865_v38, %v809_v62  ;;  %v1211_v63 = vpack.c.bf16 %v883_v11, %v882_v2 }
 0x12c   : > { %v869_v49 = vmax.f32 %v861_v17, %v805_v10  ;;  %v1201_v51 = vpack.c.bf16 %v879_v19, %v878_v42 }
 0x12d   : > { %v881_v61 = vmax.f32 %v873_v5, %v817_v50  ;;  %1215 = vst [vmem:[%s1567_s29 + $0x18] sm:$0xff] %v1211_v63  }
 0x12e   : > { %v877_v48 = vmax.f32 %v869_v49, %v813_v55  ;;  %1213 = vst [vmem:[%s1567_s29 + $0x8] sm:$0xff] %v1201_v51  }
 0x12f   : > { %v1206_v57 = vpack.c.bf16 %v881_v61, %v880_v46 }
 0x130   : > { %v1196_v27 = vpack.c.bf16 %v877_v48, %v876_v41 }
 0x131   : > { %1214 = vst [vmem:[%s1567_s29 + $0x10] sm:$0xff] %v1206_v57  }
 0x132   : > { %1197 = vst [vmem:[%s1567_s29] sm:$0xff] %v1196_v27  }
 0x133 PF: > { %s13_s12 = sadd.s32 1, %s1241_s12  }
 0x134   : > { %p10_p4 = scmp.ge.s32.totalorder %s13_s12, 4  }
 0x136   :  { %12 = sbr.rel (!%p10_p4) target bundleno = 1 (0x1), region = 62 }

// kernel: scratch_mnist_forward.4
= control target key start
LH: loop header
LB: loop body
LE: loop exit
PB: predicated region body
PF: predicated region fallthrough
CT: control target
= control target key end

     0   :  { %s2929_s12 = smov 0   ;;  %s4168_s0 = inlined_call_operand.vmem [shape: bf16[2,88,128], index: 0, kind: input, shape index: {}]   ;;  %s4169_s1 = inlined_call_operand.vmem [shape: bf16[9,128,256], index: 1, kind: input, shape index: {}]   ;;  %s4170_s2 = inlined_call_operand.vmem [shape: f32[1,256], index: 2, kind: input, shape index: {}]   ;;  %s4171_s3 = inlined_call_operand.vmem [shape: bf16[2,4,256], index: 3, kind: output, shape index: {}]  }
   0x1 LB: > { %s1967_s13 = sadd.s32 4294967295, %s2907_s12   ;;  %p1971_p0 = scmp.ge.s32.totalorder %s2907_s12, 1  ;;  %s2907_s12 = sphi %s2929_s12, %s13_s12  }
   0x2   : > { %p137_p1 = scmp.lt.s32.totalorder %s2907_s12, 3 }
   0x4   : > { %p138_p2 = pnand %p1971_p0, %p137_p1 }
   0x5   : > { %p161_p3 = scmp.lt.s32.totalorder (!%p138_p2), %s1967_s13, 1 }
   0x6   : > { %141 = sbr.rel (%p138_p2) target bundleno = 478 (0x1de), region = 32 }
   0xb   : > { %v2049_v0 = vld [vmem:[%s4169_s1 + $0xf0] sm:$0xf]  ;;  %v2714_v1 = vld [vmem:[%s4169_s1 + $0xf4] sm:$0xf0]  ;;  %v2713_v2 = vld [vmem:[%s4169_s1 + $0xf4] sm:$0xf] }
   0xc   : > { %v2050_v3 = vor.u32 %v2714_v1, %v2049_v0  ;;  %v2051_v4 = vld [vmem:[%s4169_s1 + $0xf8] sm:$0xf0]  ;;  %v2041_v5 = vld [vmem:[%s4169_s1 + $0xe0] sm:$0xf]  ;;  %v2712_v6 = vld [vmem:[%s4169_s1 + $0xe4] sm:$0xf0] }
   0xd   : > { %v2054_v7 = vor.u32 %v2713_v2, %v2051_v4  ;;  %v2711_v8 = vld [vmem:[%s4169_s1 + $0xe4] sm:$0xf]  ;;  %v2043_v9 = vld [vmem:[%s4169_s1 + $0xe8] sm:$0xf0]  ;;  %v2042_v10 = vor.u32 %v2712_v6, %v2041_v5  ;;  %v2033_v12 = vld [vmem:[%s4169_s1 + $0xd0] sm:$0xf] }
   0xe   : > { %352 = vmatpush.bf16.msra.mxu0 %v2050_v3  ;;  %2872 = vmatpush.bf16.msra.mxu2 %v2050_v3  ;;  %v2046_v11 = vor.u32 %v2711_v8, %v2043_v9  ;;  %v2710_v13 = vld [vmem:[%s4169_s1 + $0xd4] sm:$0xf0]  ;;  %v2709_v14 = vld [vmem:[%s4169_s1 + $0xd4] sm:$0xf]  ;;  %v2035_v15 = vld [vmem:[%s4169_s1 + $0xd8] sm:$0xf0] }
   0xf   : > { %379 = vmatpush.bf16.msra.mxu1 %v2054_v7  ;;  %2880 = vmatpush.bf16.msra.mxu3 %v2054_v7  ;;  %v2034_v16 = vor.u32 %v2710_v13, %v2033_v12  ;;  %v2038_v17 = vor.u32 %v2709_v14, %v2035_v15  ;;  %v2025_v18 = vld [vmem:[%s4169_s1 + $0xc0] sm:$0xf]  ;;  %v2708_v19 = vld [vmem:[%s4169_s1 + $0xc4] sm:$0xf0]  ;;  %v2707_v20 = vld [vmem:[%s4169_s1 + $0xc4] sm:$0xf] }
  0x10   : > { %v2027_v21 = vld [vmem:[%s4169_s1 + $0xc8] sm:$0xf0]  ;;  %v2026_v22 = vor.u32 %v2708_v19, %v2025_v18  ;;  %v2017_v24 = vld [vmem:[%s4169_s1 + $0xb0] sm:$0xf]  ;;  %v2706_v25 = vld [vmem:[%s4169_s1 + $0xb4] sm:$0xf0] }
  0x11   : > { %v2030_v23 = vor.u32 %v2707_v20, %v2027_v21  ;;  %s4179_s13 = smov (!%p161_p3, %s1967_s13), 1  ;;  %v2705_v26 = vld [vmem:[%s4169_s1 + $0xb4] sm:$0xf]  ;;  %v2019_v27 = vld [vmem:[%s4169_s1 + $0xb8] sm:$0xf0]  ;;  %v2018_v28 = vor.u32 %v2706_v25, %v2017_v24  ;;  %vm562_vm1 = vcmask 1046528  }
  0x12   : > { %353 = vmatpush.bf16.msra.mxu0 %v2042_v10  ;;  %2873 = vmatpush.bf16.msra.mxu2 %v2042_v10  ;;  %s2888_s29 = smul.u32 44, %s4179_s13  ;;  %v2022_v29 = vor.u32 %v2705_v26, %v2019_v27  ;;  %v2009_v30 = vld [vmem:[%s4169_s1 + $0xa0] sm:$0xf]  ;;  %v2704_v31 = vld [vmem:[%s4169_s1 + $0xa4] sm:$0xf0]  ;;  %vm1844_vm2 = vcmask 1040384  }
  0x13   : > { %380 = vmatpush.bf16.msra.mxu1 %v2046_v11  ;;  %2881 = vmatpush.bf16.msra.mxu3 %v2046_v11  ;;  %v2703_v32 = vld [vmem:[%s4169_s1 + $0xa4] sm:$0xf]  ;;  %v2011_v33 = vld [vmem:[%s4169_s1 + $0xa8] sm:$0xf0]  ;;  %v2001_v36 = vld [vmem:[%s4169_s1 + $0x90] sm:$0xf]  ;;  %v2010_v37 = vor.u32 %v2704_v31, %v2009_v30 }
  0x14   : > { %s3016_s11 = scalar_lea.vmem %s4168_s0, %s2888_s29  ;;  %v2702_v38 = vld [vmem:[%s4169_s1 + $0x94] sm:$0xf0]  ;;  %v2014_v42 = vor.u32 %v2703_v32, %v2011_v33  ;;  %v2701_v44 = vld [vmem:[%s4169_s1 + $0x94] sm:$0xf]  ;;  %v2003_v45 = vld [vmem:[%s4169_s1 + $0x98] sm:$0xf0] }
  0x15   : > { %v3022_v34 = vld [vmem:[%s3016_s11] sm:$0xff]   ;;  %v3025_v35 = vld [vmem:[%s3016_s11 + $0x10] sm:$0xff]   ;;  %v3034_v39 = vld [vmem:[%s3016_s11 + $0x8] sm:$0xff]   ;;  %v2002_v46 = vor.u32 %v2702_v38, %v2001_v36  ;;  %v2006_v55 = vor.u32 %v2701_v44, %v2003_v45  ;;  %vm231_vm0 = vsmask.f32 7424  ;;  %s2682_s17 = sshll.u32 %s4179_s13, 2 }
  0x16   : > { %354 = vmatpush.bf16.msra.mxu0 %v2034_v16  ;;  %2874 = vmatpush.bf16.msra.mxu2 %v2034_v16  ;;  %v235_v40 = vshll.u32 %v3022_v34, 16  ;;  %v248_v41 = vshll.u32 %v3025_v35, 16  ;;  %v3039_v43 = vld [vmem:[%s3016_s11 + $0x18] sm:$0xff]   ;;  %v1993_v47 = vld [vmem:[%s4169_s1 + $0x80] sm:$0xf]  ;;  %v233_v48 = vshrl.u32 %v3022_v34, 16  ;;  %s4122_s20 = scalar_lea.vmem %s4171_s3, %s2682_s17 }
  0x17   : > { %381 = vmatpush.bf16.msra.mxu1 %v2038_v17  ;;  %2882 = vmatpush.bf16.msra.mxu3 %v2038_v17  ;;  %v240_v49 = vshll.u32 %v3034_v39, 16  ;;  %v2700_v50 = vld [vmem:[%s4169_s1 + $0x84] sm:$0xf0]  ;;  %v252_v53 = vshrl.u32 %v3025_v35, 16  ;;  %v256_v54 = vshll.u32 %v3039_v43, 16  ;;  %v3089_v6 = vld [vmem:[%s3016_s11 + $0x20] sm:$0xff]  }
  0x18   : > { %v237_v51 = vrot.slane %v235_v40, 1  ;;  %v3055_v52 = vrot.slane %v248_v41, 1  ;;  %v2699_v56 = vld [vmem:[%s4169_s1 + $0x84] sm:$0xf]  ;;  %v1995_v57 = vld [vmem:[%s4169_s1 + $0x88] sm:$0xf0]  ;;  %v1994_v59 = vor.u32 %v2700_v50, %v1993_v47  ;;  %v3116_v17 = vunpack.c.l.bf16 %v3089_v6 }
  0x19   : > { %v2113_v58 = vld [vmem:[%s4169_s1 + $0x70] sm:$0xf]  ;;  %v2698_v60 = vld [vmem:[%s4169_s1 + $0x74] sm:$0xf0]  ;;  %v2697_v61 = vld [vmem:[%s4169_s1 + $0x74] sm:$0xf]  ;;  %v1998_v3 = vor.u32 %v2699_v56, %v1995_v57 }
  0x1a   : > { %355 = vmatpush.bf16.msra.mxu0 %v2026_v22  ;;  %2875 = vmatpush.bf16.msra.mxu2 %v2026_v22  ;;  %v2115_v62 = vld [vmem:[%s4169_s1 + $0x78] sm:$0xf0]  ;;  %v238_v63 = vor.u32 %v237_v51, %v233_v48  ;;  %v3077_v0 = vrot.slane %v240_v49, 1  ;;  %v254_v1 = vor.u32 %v252_v53, %v3055_v52  ;;  %v3080_v2 = vrot.slane %v256_v54, 1  ;;  %v2193_v4 = vld [vmem:[%s4169_s1 + $0x170] sm:$0xf] }
  0x1b   : > { %382 = vmatpush.bf16.msra.mxu1 %v2030_v23  ;;  %2883 = vmatpush.bf16.msra.mxu3 %v2030_v23  ;;  %v2730_v5 = vld [vmem:[%s4169_s1 + $0x174] sm:$0xf0]  ;;  %v2114_v7 = vor.u32 %v2698_v60, %v2113_v58  ;;  %v2118_v8 = vor.u32 %v2697_v61, %v2115_v62  ;;  %v2729_v9 = vld [vmem:[%s4169_s1 + $0x174] sm:$0xf]  ;;  %v2195_v10 = vld [vmem:[%s4169_s1 + $0x178] sm:$0xf0]  ;;  %v3146_v30 = vpack.c.bf16 %v3116_v17, %v3116_v17 }
  0x1c   : > { %v2105_v11 = vld [vmem:[%s4169_s1 + $0x60] sm:$0xf]  ;;  %v2696_v12 = vld [vmem:[%s4169_s1 + $0x64] sm:$0xf0]  ;;  %v2695_v13 = vld [vmem:[%s4169_s1 + $0x64] sm:$0xf]  ;;  %v243_v15 = vsel %vm231_vm0, %v238_v63, %v3077_v0  ;;  %v3113_v16 = vsel %vm231_vm0, %v254_v1, %v3080_v2  ;;  %v2194_v18 = vor.u32 %v2730_v5, %v2193_v4  ;;  %v2198_v19 = vor.u32 %v2729_v9, %v2195_v10 }
  0x1d   : > { %v2107_v14 = vld [vmem:[%s4169_s1 + $0x68] sm:$0xf0]  ;;  %v2185_v20 = vld [vmem:[%s4169_s1 + $0x160] sm:$0xf]  ;;  %v2728_v21 = vld [vmem:[%s4169_s1 + $0x164] sm:$0xf0]  ;;  %v2106_v22 = vor.u32 %v2696_v12, %v2105_v11 }
  0x1e   : > { %356 = vmatpush.bf16.msra.mxu0 %v2018_v28  ;;  %2876 = vmatpush.bf16.msra.mxu2 %v2018_v28  ;;  %v2110_v23 = vor.u32 %v2695_v13, %v2107_v14  ;;  %v2727_v24 = vld [vmem:[%s4169_s1 + $0x164] sm:$0xf]  ;;  %v2187_v25 = vld [vmem:[%s4169_s1 + $0x168] sm:$0xf0]  ;;  %v2097_v26 = vld [vmem:[%s4169_s1 + $0x50] sm:$0xf]  ;;  %v2186_v31 = vor.u32 %v2728_v21, %v2185_v20 }
  0x1f   : > { %383 = vmatpush.bf16.msra.mxu1 %v2022_v29  ;;  %2884 = vmatpush.bf16.msra.mxu3 %v2022_v29  ;;  %v2694_v27 = vld [vmem:[%s4169_s1 + $0x54] sm:$0xf0]  ;;  %v2693_v28 = vld [vmem:[%s4169_s1 + $0x54] sm:$0xf]  ;;  %v2099_v29 = vld [vmem:[%s4169_s1 + $0x58] sm:$0xf0]  ;;  %v2190_v32 = vor.u32 %v2727_v24, %v2187_v25 }
  0x20   : > { %v2177_v33 = vld [vmem:[%s4169_s1 + $0x150] sm:$0xf]  ;;  %v2726_v36 = vld [vmem:[%s4169_s1 + $0x154] sm:$0xf0]  ;;  %v2102_v38 = vor.u32 %v2693_v28, %v2099_v29  ;;  %v2725_v40 = vld [vmem:[%s4169_s1 + $0x154] sm:$0xf] }
  0x21   : > { %v2179_v41 = vld [vmem:[%s4169_s1 + $0x158] sm:$0xf0]  ;;  %v2692_v44 = vld [vmem:[%s4169_s1 + $0x44] sm:$0xf0]  ;;  %v2691_v45 = vld [vmem:[%s4169_s1 + $0x44] sm:$0xf]  ;;  %v2178_v50 = vor.u32 %v2726_v36, %v2177_v33 }
  0x22   : > { %357 = vmatpush.bf16.msra.mxu0 %v2010_v37  ;;  %2877 = vmatpush.bf16.msra.mxu2 %v2010_v37  ;;  %v2098_v37 = vor.u32 %v2694_v27, %v2097_v26  ;;  %v244_v47 = vshrl.u32 %v3034_v39, 16  ;;  %v260_v48 = vshrl.u32 %v3039_v43, 16  ;;  %v264_v49 = vshll.u32 %v3146_v30, 16  ;;  %v2169_v53 = vld [vmem:[%s4169_s1 + $0x140] sm:$0xf] }
  0x23   : > { %384 = vmatpush.bf16.msra.mxu1 %v2014_v42  ;;  %2885 = vmatpush.bf16.msra.mxu3 %v2014_v42  ;;  %v2089_v42 = vld [vmem:[%s4169_s1 + $0x40] sm:$0xf]  ;;  %v2182_v51 = vor.u32 %v2725_v40, %v2179_v41  ;;  %v2724_v54 = vld [vmem:[%s4169_s1 + $0x144] sm:$0xf0]  ;;  %v2723_v57 = vld [vmem:[%s4169_s1 + $0x144] sm:$0xf] }
  0x24   : > { %v2171_v58 = vld [vmem:[%s4169_s1 + $0x148] sm:$0xf0]  ;;  %v2690_v60 = vld [vmem:[%s4169_s1 + $0x34] sm:$0xf0]  ;;  %v2689_v61 = vld [vmem:[%s4169_s1 + $0x34] sm:$0xf]  ;;  %v246_v63 = vor.u32 %v244_v47, %v3077_v0  ;;  %v3201_v1 = vor.u32 %v260_v48, %v3080_v2  ;;  %v2170_v4 = vor.u32 %v2724_v54, %v2169_v53 }
  0x25   : > { %v2083_v62 = vld [vmem:[%s4169_s1 + $0x38] sm:$0xf0]  ;;  %v2174_v5 = vor.u32 %v2723_v57, %v2171_v58  ;;  %v2721_v2 = vld [vmem:[%s4169_s1 + $0x134] sm:$0xf]  ;;  %v2073_v11 = vld [vmem:[%s4169_s1 + $0x20] sm:$0xf] }
  0x26   : > { %358 = vmatpush.bf16.msra.mxu0 %v2002_v46  ;;  %2878 = vmatpush.bf16.msra.mxu2 %v2002_v46  ;;  %v2091_v46 = vld [vmem:[%s4169_s1 + $0x48] sm:$0xf0]  ;;  %v2086_v0 = vor.u32 %v2689_v61, %v2083_v62  ;;  %v2163_v10 = vld [vmem:[%s4169_s1 + $0x138] sm:$0xf0]  ;;  %v2688_v12 = vld [vmem:[%s4169_s1 + $0x24] sm:$0xf0] }
  0x27   : > { %385 = vmatpush.bf16.msra.mxu1 %v2006_v55  ;;  %2886 = vmatpush.bf16.msra.mxu3 %v2006_v55  ;;  %v2090_v55 = vor.u32 %v2692_v44, %v2089_v42  ;;  %v2094_v56 = vor.u32 %v2691_v45, %v2091_v46  ;;  %v2687_v13 = vld [vmem:[%s4169_s1 + $0x24] sm:$0xf]  ;;  %v2075_v14 = vld [vmem:[%s4169_s1 + $0x28] sm:$0xf0]  ;;  %v2166_v20 = vor.u32 %v2721_v2, %v2163_v10  ;;  %v2153_v21 = vld [vmem:[%s4169_s1 + $0x120] sm:$0xf] }
  0x28   : > { %v2719_v24 = vld [vmem:[%s4169_s1 + $0x124] sm:$0xf]  ;;  %v2155_v25 = vld [vmem:[%s4169_s1 + $0x128] sm:$0xf0]  ;;  %v2065_v26 = vld [vmem:[%s4169_s1 + $0x10] sm:$0xf] }
  0x29   : > { %v2686_v27 = vld [vmem:[%s4169_s1 + $0x14] sm:$0xf0]  ;;  %v2685_v28 = vld [vmem:[%s4169_s1 + $0x14] sm:$0xf]  ;;  %v2067_v29 = vld [vmem:[%s4169_s1 + $0x18] sm:$0xf0] }
  0x2a   : > { %359 = vmatpush.bf16.msra.mxu0 %v1994_v59  ;;  %2879 = vmatpush.bf16.msra.mxu2 %v1994_v59  ;;  %v2081_v59 = vld [vmem:[%s4169_s1 + $0x30] sm:$0xf]  ;;  %v2718_v36 = vld [vmem:[%s4169_s1 + $0x114] sm:$0xf0]  ;;  %v2070_v40 = vor.u32 %v2685_v28, %v2067_v29  ;;  %v2147_v41 = vld [vmem:[%s4169_s1 + $0x118] sm:$0xf0] }
  0x2b   : > { %386 = vmatpush.bf16.msra.mxu1 %v1998_v3  ;;  %2887 = vmatpush.bf16.msra.mxu3 %v1998_v3  ;;  %v266_v3 = vrot.slane %v264_v49, 1  ;;  %v2082_v9 = vor.u32 %v2690_v60, %v2081_v59  ;;  %v2145_v33 = vld [vmem:[%s4169_s1 + $0x110] sm:$0xf]  ;;  %v2057_v42 = vld [vmem:[%s4169_s1] sm:$0xf]  ;;  %v564_v2 = vrot.slane %v3034_v39, 1 }
  0x2c   : > { %v2684_v44 = vld [vmem:[%s4169_s1 + $0x4] sm:$0xf0]  ;;  %v2683_v45 = vld [vmem:[%s4169_s1 + $0x4] sm:$0xf]  ;;  %v2059_v46 = vld [vmem:[%s4169_s1 + $0x8] sm:$0xf0] }
  0x2d   : > { %360 = vmatmul.bf16.vlgmr.msra.gmra.mxu0 %v243_v15  ;;  %370 = vmatmul.bf16.vlgmr.msra.gmra.mxu2 %v3113_v16  ;;  %v2273_v47 = vld [vmem:[%s4169_s1 + $0x1f0] sm:$0xf]  ;;  %v2746_v48 = vld [vmem:[%s4169_s1 + $0x1f4] sm:$0xf0]  ;;  %v2745_v49 = vld [vmem:[%s4169_s1 + $0x1f4] sm:$0xf]  ;;  %v2062_v57 = vor.u32 %v2683_v45, %v2059_v46 }
  0x2e   : > { %486 = vmatpush.bf16.msrb.mxu2 %v2114_v7  ;;  %387 = vmatmul.bf16.vlgmr.msra.gmra.mxu1 %v243_v15  ;;  %v2161_v7 = vld [vmem:[%s4169_s1 + $0x130] sm:$0xf]  ;;  %v3229_v15 = vsel %vm231_vm0, %v246_v63, %v3055_v52  ;;  %v2078_v52 = vor.u32 %v2687_v13, %v2075_v14  ;;  %v2137_v54 = vld [vmem:[%s4169_s1 + $0x100] sm:$0xf]  ;;  %v2715_v58 = vld [vmem:[%s4169_s1 + $0x104] sm:$0xf]  ;;  %v2274_v61 = vor.u32 %v2746_v48, %v2273_v47 }
  0x2f   : > { %513 = vmatpush.bf16.msrb.mxu3 %v2118_v8  ;;  %656 = vmatpush.bf16.msrb.mxu0 %v2194_v18  ;;  %v2722_v8 = vld [vmem:[%s4169_s1 + $0x134] sm:$0xf0]  ;;  %v267_v18 = vsel %vm231_vm0, %v3201_v1, %v266_v3  ;;  %v2139_v59 = vld [vmem:[%s4169_s1 + $0x108] sm:$0xf0]  ;;  %v2353_v60 = vld [vmem:[%s4169_s1 + $0x270] sm:$0xf] }
  0x30   : > { %397 = vmatmul.bf16.vlgmr.msra.gmra.mxu3 %v3113_v16  ;;  %683 = vmatpush.bf16.msrb.mxu1 %v2198_v19  ;;  %v2162_v19 = vor.u32 %v2722_v8, %v2161_v7  ;;  %v2762_v63 = vld [vmem:[%s4169_s1 + $0x274] sm:$0xf0]  ;;  %v2761_v3 = vld [vmem:[%s4169_s1 + $0x274] sm:$0xf]  ;;  %v2743_v7 = vld [vmem:[%s4169_s1 + $0x1e4] sm:$0xf] }
  0x31   : > { %v2267_v8 = vld [vmem:[%s4169_s1 + $0x1e8] sm:$0xf0]  ;;  %v2265_v10 = vld [vmem:[%s4169_s1 + $0x1e0] sm:$0xf]  ;;  %v2337_v29 = vld [vmem:[%s4169_s1 + $0x250] sm:$0xf] }
  0x32   : > { %487 = vmatpush.bf16.msrb.mxu2 %v2106_v22  ;;  %v2720_v22 = vld [vmem:[%s4169_s1 + $0x124] sm:$0xf0]  ;;  %v2345_v14 = vld [vmem:[%s4169_s1 + $0x260] sm:$0xf]  ;;  %v2755_v48 = vld [vmem:[%s4169_s1 + $0x244] sm:$0xf] }
  0x33   : > { %514 = vmatpush.bf16.msrb.mxu3 %v2110_v23  ;;  %657 = vmatpush.bf16.msrb.mxu0 %v2186_v31  ;;  %v2074_v23 = vor.u32 %v2688_v12, %v2073_v11  ;;  %v2154_v31 = vor.u32 %v2720_v22, %v2153_v21  ;;  %v2744_v11 = vld [vmem:[%s4169_s1 + $0x1e4] sm:$0xf0]  ;;  %v2354_v12 = vor.u32 %v2762_v63, %v2353_v60  ;;  %v2347_v21 = vld [vmem:[%s4169_s1 + $0x268] sm:$0xf0]  ;;  %v2741_v22 = vld [vmem:[%s4169_s1 + $0x1d4] sm:$0xf] }
  0x34   : > { %684 = vmatpush.bf16.msrb.mxu1 %v2190_v32  ;;  %v2158_v32 = vor.u32 %v2719_v24, %v2155_v25  ;;  %v2266_v24 = vor.u32 %v2744_v11, %v2265_v10  ;;  %v2257_v25 = vld [vmem:[%s4169_s1 + $0x1d0] sm:$0xf]  ;;  %v2329_v45 = vld [vmem:[%s4169_s1 + $0x240] sm:$0xf]  ;;  %v2756_v47 = vld [vmem:[%s4169_s1 + $0x244] sm:$0xf0] }
  0x35   : > { %v2754_v60 = vld [vmem:[%s4169_s1 + $0x234] sm:$0xf0]  ;;  %v2735_v63 = vld [vmem:[%s4169_s1 + $0x1a4] sm:$0xf]  ;;  %vm1845_vm3 = vsmask.f32 256 }
  0x36   : > { %488 = vmatpush.bf16.msrb.mxu2 %v2098_v37  ;;  %v2717_v37 = vld [vmem:[%s4169_s1 + $0x114] sm:$0xf]  ;;  %vm1847_vm4 = vcmask 1042434   ;;  %vm1848_vm5 = vsmask.f32 2304  ;;  %vm4115_vm6 = vmand %vm1844_vm2, %vm1845_vm3  ;;  %vm1839_vm8 = vcmask 1041408  }
  0x37   : > { %515 = vmatpush.bf16.msrb.mxu3 %v2102_v38  ;;  %658 = vmatpush.bf16.msrb.mxu0 %v2178_v50  ;;  %v2066_v38 = vor.u32 %v2686_v27, %v2065_v26  ;;  %v2275_v50 = vld [vmem:[%s4169_s1 + $0x1f8] sm:$0xf0]  ;;  %v2150_v53 = vor.u32 %v2717_v37, %v2147_v41  ;;  %v2742_v26 = vld [vmem:[%s4169_s1 + $0x1d4] sm:$0xf0]  ;;  %v2739_v37 = vld [vmem:[%s4169_s1 + $0x1c4] sm:$0xf] }
  0x38   : > { %685 = vmatpush.bf16.msrb.mxu1 %v2182_v51  ;;  %v2146_v51 = vor.u32 %v2718_v36, %v2145_v33  ;;  %v2278_v62 = vor.u32 %v2745_v49, %v2275_v50  ;;  %v2757_v33 = vld [vmem:[%s4169_s1 + $0x254] sm:$0xf]  ;;  %v2339_v36 = vld [vmem:[%s4169_s1 + $0x258] sm:$0xf0]  ;;  %v2249_v41 = vld [vmem:[%s4169_s1 + $0x1c0] sm:$0xf] }
  0x39   : > { %v2331_v49 = vld [vmem:[%s4169_s1 + $0x248] sm:$0xf0]  ;;  %v2737_v50 = vld [vmem:[%s4169_s1 + $0x1b4] sm:$0xf]  ;;  %vm4125_vm7 = vmand %vm1847_vm4, %vm1848_vm5  ;;  %vm1858_vm10 = vsmask.f32 7938 }
  0x3a   : > { %489 = vmatpush.bf16.msrb.mxu2 %v2090_v55  ;;  %v2716_v55 = vld [vmem:[%s4169_s1 + $0x104] sm:$0xf0]  ;;  %vm1850_vm9 = vmor %vm4125_vm7, %vm4115_vm6  ;;  %vm1860_vm11 = vsmask.f32 7946  ;;  %vm1893_vm15 = vcmask 1041409  }
  0x3b   : > { %516 = vmatpush.bf16.msrb.mxu3 %v2094_v56  ;;  %659 = vmatpush.bf16.msrb.mxu0 %v2170_v4  ;;  %v2058_v56 = vor.u32 %v2684_v44, %v2057_v42  ;;  %v2355_v4 = vld [vmem:[%s4169_s1 + $0x278] sm:$0xf0]  ;;  %v2342_v44 = vor.u32 %v2757_v33, %v2339_v36  ;;  %v2750_v33 = vld [vmem:[%s4169_s1 + $0x214] sm:$0xf0]  ;;  %v2749_v36 = vld [vmem:[%s4169_s1 + $0x214] sm:$0xf] }
  0x3c   : > { %686 = vmatpush.bf16.msrb.mxu1 %v2174_v5  ;;  %v2138_v5 = vor.u32 %v2716_v55, %v2137_v54  ;;  %v2358_v13 = vor.u32 %v2761_v3, %v2355_v4  ;;  %v2241_v54 = vld [vmem:[%s4169_s1 + $0x1b0] sm:$0xf]  ;;  %v2738_v55 = vld [vmem:[%s4169_s1 + $0x1b4] sm:$0xf0]  ;;  %v2235_v3 = vld [vmem:[%s4169_s1 + $0x1a8] sm:$0xf0] }
  0x3d   : > { %365 = vmatmul.bf16.gmra.mxu0 %v3229_v15  ;;  %375 = vmatmul.bf16.gmra.mxu2 %v267_v18  ;;  %v566_v4 = vrot.slane %v3025_v35, 1  ;;  %v2238_v10 = vor.u32 %v2735_v63, %v2235_v3  ;;  %v2515_v63 = vld [vmem:[%s4169_s1 + $0x378] sm:$0xf0]  ;;  %vm4143_vm12 = vmand %vm1844_vm2, %vm1858_vm10  ;;  %vm1897_vm2 = vsmask.f32 3328 }
  0x3e   : > { %490 = vmatpush.bf16.msrb.mxu2 %v2082_v9  ;;  %392 = vmatmul.bf16.gmra.mxu1 %v3229_v15  ;;  %v2142_v9 = vor.u32 %v2715_v58, %v2139_v59  ;;  %v2321_v58 = vld [vmem:[%s4169_s1 + $0x230] sm:$0xf]  ;;  %vm1861_vm13 = vmand %vm1847_vm4, %vm1860_vm11  ;;  %vm1904_vm6 = vsmask.f32 7942  ;;  %vm1906_vm7 = vsmask.f32 7950 }
  0x3f   : > { %517 = vmatpush.bf16.msrb.mxu3 %v2086_v0  ;;  %660 = vmatpush.bf16.msrb.mxu0 %v2162_v19  ;;  %v563_v0 = vrot.slane %v3022_v34, 1  ;;  %v2760_v19 = vld [vmem:[%s4169_s1 + $0x264] sm:$0xf0]  ;;  %v3438_v11 = vsel %vm562_vm1, %v564_v2, %v566_v4  ;;  %vm1862_vm14 = vmor %vm1861_vm13, %vm4143_vm12 }
  0x40   : > { %402 = vmatmul.bf16.gmra.mxu3 %v267_v18  ;;  %687 = vmatpush.bf16.msrb.mxu1 %v2166_v20  ;;  %v2270_v18 = vor.u32 %v2743_v7, %v2267_v8  ;;  %v2759_v20 = vld [vmem:[%s4169_s1 + $0x264] sm:$0xf]  ;;  %v2346_v27 = vor.u32 %v2760_v19, %v2345_v14  ;;  %v2233_v7 = vld [vmem:[%s4169_s1 + $0x1a0] sm:$0xf]  ;;  %v2736_v8 = vld [vmem:[%s4169_s1 + $0x1a4] sm:$0xf0] }
  0x41   : > { %v2350_v28 = vor.u32 %v2759_v20, %v2347_v21  ;;  %v2733_v14 = vld [vmem:[%s4169_s1 + $0x194] sm:$0xf]  ;;  %v2313_v19 = vld [vmem:[%s4169_s1 + $0x220] sm:$0xf]  ;;  %v2752_v20 = vld [vmem:[%s4169_s1 + $0x224] sm:$0xf0] }
  0x42   : > { %491 = vmatpush.bf16.msrb.mxu2 %v2074_v23  ;;  %v2259_v23 = vld [vmem:[%s4169_s1 + $0x1d8] sm:$0xf0] }
  0x43   : > { %518 = vmatpush.bf16.msrb.mxu3 %v2078_v52  ;;  %661 = vmatpush.bf16.msrb.mxu0 %v2154_v31  ;;  %v565_v52 = vsel %vm562_vm1, %v563_v0, %v564_v2  ;;  %v2262_v31 = vor.u32 %v2741_v22, %v2259_v23  ;;  %v2734_v2 = vld [vmem:[%s4169_s1 + $0x194] sm:$0xf0]  ;;  %v2314_v22 = vor.u32 %v2752_v20, %v2313_v19  ;;  %v2751_v23 = vld [vmem:[%s4169_s1 + $0x224] sm:$0xf]  ;;  %v2419_v19 = vld [vmem:[%s4169_s1 + $0x2d8] sm:$0xf0] }
  0x44   : > { %688 = vmatpush.bf16.msrb.mxu1 %v2158_v32  ;;  %v2758_v32 = vld [vmem:[%s4169_s1 + $0x254] sm:$0xf0]  ;;  %v2505_v20 = vld [vmem:[%s4169_s1 + $0x360] sm:$0xf] }
  0x45   : > { %v2338_v42 = vor.u32 %v2758_v32, %v2337_v29  ;;  %v2305_v32 = vld [vmem:[%s4169_s1 + $0x210] sm:$0xf] }
  0x46   : > { %492 = vmatpush.bf16.msrb.mxu2 %v2066_v38  ;;  %v2251_v38 = vld [vmem:[%s4169_s1 + $0x1c8] sm:$0xf0] }
  0x47   : > { %519 = vmatpush.bf16.msrb.mxu3 %v2070_v40  ;;  %662 = vmatpush.bf16.msrb.mxu0 %v2146_v51  ;;  %v2258_v40 = vor.u32 %v2742_v26, %v2257_v25  ;;  %v2254_v46 = vor.u32 %v2739_v37, %v2251_v38  ;;  %v2243_v51 = vld [vmem:[%s4169_s1 + $0x1b8] sm:$0xf0]  ;;  %v2732_v26 = vld [vmem:[%s4169_s1 + $0x184] sm:$0xf0]  ;;  %v2306_v37 = vor.u32 %v2750_v33, %v2305_v32  ;;  %v2497_v33 = vld [vmem:[%s4169_s1 + $0x350] sm:$0xf] }
  0x48   : > { %689 = vmatpush.bf16.msrb.mxu1 %v2150_v53  ;;  %v2246_v59 = vor.u32 %v2737_v50, %v2243_v51  ;;  %v2307_v38 = vld [vmem:[%s4169_s1 + $0x218] sm:$0xf0]  ;;  %v2778_v50 = vld [vmem:[%s4169_s1 + $0x2f4] sm:$0xf0]  ;;  %v2777_v51 = vld [vmem:[%s4169_s1 + $0x2f4] sm:$0xf] }
  0x4a   : > { %493 = vmatpush.bf16.msrb.mxu2 %v2058_v56  ;;  %v2330_v56 = vor.u32 %v2756_v47, %v2329_v45  ;;  %v3505_v45 = vrot.slane %v3039_v43, 1 }
  0x4b   : > { %520 = vmatpush.bf16.msrb.mxu3 %v2062_v57  ;;  %663 = vmatpush.bf16.msrb.mxu0 %v2138_v5  ;;  %v2334_v57 = vor.u32 %v2755_v48, %v2331_v49  ;;  %v2242_v5 = vor.u32 %v2738_v55, %v2241_v54  ;;  %v2433_v49 = vld [vmem:[%s4169_s1 + $0x2f0] sm:$0xf]  ;;  %v2425_v54 = vld [vmem:[%s4169_s1 + $0x2e0] sm:$0xf]  ;;  %v2776_v55 = vld [vmem:[%s4169_s1 + $0x2e4] sm:$0xf0] }
  0x4c   : > { %690 = vmatpush.bf16.msrb.mxu1 %v2142_v9  ;;  %v2322_v9 = vor.u32 %v2754_v60, %v2321_v58  ;;  %v3509_v48 = vsel %vm562_vm1, %v566_v4, %v3505_v45  ;;  %v2427_v58 = vld [vmem:[%s4169_s1 + $0x2e8] sm:$0xf0]  ;;  %v2426_v60 = vor.u32 %v2776_v55, %v2425_v54  ;;  %v2788_v54 = vld [vmem:[%s4169_s1 + $0x344] sm:$0xf0] }
  0x4d   : > { %494 = vmatmul.bf16.vlgmr.msrb.gmra.mxu2 %v3022_v34 }
  0x4e   : > { %823 = vmatpush.bf16.msra.mxu2 %v2274_v61  ;;  %664 = vmatmul.bf16.vlgmr.msrb.gmra.mxu0 %v565_v52  ;;  %v2753_v61 = vld [vmem:[%s4169_s1 + $0x234] sm:$0xf] }
  0x4f   : > { %850 = vmatpush.bf16.msra.mxu3 %v2278_v62  ;;  %1027 = vmatpush.bf16.msra.mxu0 %v2354_v12  ;;  %v2323_v62 = vld [vmem:[%s4169_s1 + $0x238] sm:$0xf0]  ;;  %v2234_v12 = vor.u32 %v2736_v8, %v2233_v7  ;;  %v3552_v7 = vld [vmem:[%s3016_s11 + $0x4] sm:$0xff]   ;;  %v570_v8 = vrot.slane %v3146_v30, 1  ;;  %v2417_v30 = vld [vmem:[%s4169_s1 + $0x2d0] sm:$0xf] }
  0x50   : > { %1054 = vmatpush.bf16.msra.mxu1 %v2358_v13  ;;  %521 = vmatmul.bf16.vlgmr.msrb.gmra.mxu3 %v3022_v34  ;;  %v2740_v34 = vld [vmem:[%s4169_s1 + $0x1c4] sm:$0xf0]  ;;  %v2326_v0 = vor.u32 %v2753_v61, %v2323_v62  ;;  %v2225_v13 = vld [vmem:[%s4169_s1 + $0x190] sm:$0xf]  ;;  %v2794_v61 = vld [vmem:[%s4169_s1 + $0x374] sm:$0xf0] }
  0x51   : > { %691 = vmatmul.bf16.vlgmr.msrb.gmra.mxu1 %v565_v52  ;;  %v2250_v53 = vor.u32 %v2740_v34, %v2249_v41  ;;  %v2315_v52 = vld [vmem:[%s4169_s1 + $0x228] sm:$0xf0]  ;;  %v2310_v41 = vor.u32 %v2749_v36, %v2307_v38  ;;  %v2748_v34 = vld [vmem:[%s4169_s1 + $0x204] sm:$0xf0]  ;;  %v2793_v62 = vld [vmem:[%s4169_s1 + $0x374] sm:$0xf] }
  0x52   : > { %824 = vmatpush.bf16.msra.mxu2 %v2266_v24  ;;  %v2217_v24 = vld [vmem:[%s4169_s1 + $0x180] sm:$0xf]  ;;  %v2318_v25 = vor.u32 %v2751_v23, %v2315_v52  ;;  %v2791_v52 = vld [vmem:[%s4169_s1 + $0x364] sm:$0xf]  ;;  %v2790_v36 = vld [vmem:[%s4169_s1 + $0x354] sm:$0xf0] }
  0x53   : > { %851 = vmatpush.bf16.msra.mxu3 %v2270_v18  ;;  %1028 = vmatpush.bf16.msra.mxu0 %v2346_v27  ;;  %v2226_v18 = vor.u32 %v2734_v2, %v2225_v13  ;;  %v2731_v27 = vld [vmem:[%s4169_s1 + $0x184] sm:$0xf]  ;;  %v2218_v29 = vor.u32 %v2732_v26, %v2217_v24  ;;  %v2507_v24 = vld [vmem:[%s4169_s1 + $0x368] sm:$0xf0]  ;;  %v2498_v38 = vor.u32 %v2790_v36, %v2497_v33  ;;  %v2377_v33 = vld [vmem:[%s4169_s1 + $0x280] sm:$0xf] }
  0x54   : > { %1055 = vmatpush.bf16.msra.mxu1 %v2350_v28  ;;  %v2219_v28 = vld [vmem:[%s4169_s1 + $0x188] sm:$0xf0]  ;;  %v2510_v26 = vor.u32 %v2791_v52, %v2507_v24  ;;  %v2473_v52 = vld [vmem:[%s4169_s1 + $0x320] sm:$0xf]  ;;  %v2784_v24 = vld [vmem:[%s4169_s1 + $0x324] sm:$0xf0] }
  0x55   : > { %v2764_v36 = vld [vmem:[%s4169_s1 + $0x284] sm:$0xf0] }
  0x56   : > { %825 = vmatpush.bf16.msra.mxu2 %v2258_v40  ;;  %v2297_v40 = vld [vmem:[%s4169_s1 + $0x200] sm:$0xf] }
  0x57   : > { %852 = vmatpush.bf16.msra.mxu3 %v2262_v31  ;;  %1029 = vmatpush.bf16.msra.mxu0 %v2338_v42  ;;  %v2222_v31 = vor.u32 %v2731_v27, %v2219_v28  ;;  %v2747_v42 = vld [vmem:[%s4169_s1 + $0x204] sm:$0xf]  ;;  %v2772_v27 = vld [vmem:[%s4169_s1 + $0x2c4] sm:$0xf0] }
  0x58   : > { %1056 = vmatpush.bf16.msra.mxu1 %v2342_v44  ;;  %v2299_v44 = vld [vmem:[%s4169_s1 + $0x208] sm:$0xf0]  ;;  %v2771_v28 = vld [vmem:[%s4169_s1 + $0x2c4] sm:$0xf] }
  0x59   : > { %v2302_v47 = vor.u32 %v2747_v42, %v2299_v44 }
  0x5a   : > { %826 = vmatpush.bf16.msra.mxu2 %v2250_v53  ;;  %v2434_v53 = vor.u32 %v2778_v50, %v2433_v49  ;;  %v2770_v49 = vld [vmem:[%s4169_s1 + $0x2b4] sm:$0xf0]  ;;  %v2769_v50 = vld [vmem:[%s4169_s1 + $0x2b4] sm:$0xf] }
  0x5b   : > { %853 = vmatpush.bf16.msra.mxu3 %v2254_v46  ;;  %1030 = vmatpush.bf16.msra.mxu0 %v2330_v56  ;;  %v2298_v46 = vor.u32 %v2748_v34, %v2297_v40  ;;  %v2499_v40 = vld [vmem:[%s4169_s1 + $0x358] sm:$0xf0] }
  0x5c   : > { %1057 = vmatpush.bf16.msra.mxu1 %v2334_v57  ;;  %v2775_v57 = vld [vmem:[%s4169_s1 + $0x2e4] sm:$0xf] }
  0x5d   : > { %499 = vmatmul.bf16.gmra.mxu2 %v3034_v39  ;;  %v2430_v3 = vor.u32 %v2775_v57, %v2427_v58  ;;  %v2787_v57 = vld [vmem:[%s4169_s1 + $0x344] sm:$0xf]  ;;  %v2491_v58 = vld [vmem:[%s4169_s1 + $0x348] sm:$0xf0] }
  0x5e   : > { %827 = vmatpush.bf16.msra.mxu2 %v2242_v5  ;;  %669 = vmatmul.bf16.gmra.mxu0 %v3438_v11  ;;  %v2518_v5 = vor.u32 %v2793_v62, %v2515_v63  ;;  %v2393_v62 = vld [vmem:[%s4169_s1 + $0x2a0] sm:$0xf]  ;;  %v2768_v63 = vld [vmem:[%s4169_s1 + $0x2a4] sm:$0xf0] }
  0x5f   : > { %854 = vmatpush.bf16.msra.mxu3 %v2246_v59  ;;  %1031 = vmatpush.bf16.msra.mxu0 %v2322_v9  ;;  %v2513_v59 = vld [vmem:[%s4169_s1 + $0x370] sm:$0xf] }
  0x60   : > { %1058 = vmatpush.bf16.msra.mxu1 %v2326_v0  ;;  %526 = vmatmul.bf16.gmra.mxu3 %v3034_v39  ;;  %v2227_v39 = vld [vmem:[%s4169_s1 + $0x198] sm:$0xf0]  ;;  %v2514_v4 = vor.u32 %v2794_v61, %v2513_v59  ;;  %v3556_v9 = vld [vmem:[%s3016_s11 + $0xc] sm:$0xff]   ;;  %v910_v0 = vshll.u32 %v3552_v7, 16  ;;  %v2494_v61 = vor.u32 %v2787_v57, %v2491_v58 }
  0x61   : > { %696 = vmatmul.bf16.gmra.mxu1 %v3438_v11  ;;  %v2230_v21 = vor.u32 %v2733_v14, %v2227_v39  ;;  %v915_v2 = vshll.u32 %v3556_v9, 16  ;;  %v2774_v14 = vld [vmem:[%s4169_s1 + $0x2d4] sm:$0xf0]  ;;  %v919_v59 = vshrl.u32 %v3556_v9, 16  ;;  %v2459_v58 = vld [vmem:[%s4169_s1 + $0x308] sm:$0xf0] }
  0x62   : > { %828 = vmatpush.bf16.msra.mxu2 %v2234_v12  ;;  %v908_v12 = vshrl.u32 %v3552_v7, 16  ;;  %v912_v13 = vrot.slane %v910_v0, 1  ;;  %v2418_v39 = vor.u32 %v2774_v14, %v2417_v30  ;;  %v2786_v0 = vld [vmem:[%s4169_s1 + $0x334] sm:$0xf0] }
  0x63   : > { %855 = vmatpush.bf16.msra.mxu3 %v2238_v10  ;;  %1032 = vmatpush.bf16.msra.mxu0 %v2314_v22  ;;  %v571_v10 = vsel %vm562_vm1, %v3505_v45, %v570_v8  ;;  %v917_v42 = vrot.slane %v915_v2, 1  ;;  %v2481_v8 = vld [vmem:[%s4169_s1 + $0x330] sm:$0xf]  ;;  %v2483_v2 = vld [vmem:[%s4169_s1 + $0x338] sm:$0xf0] }
  0x64   : > { %1059 = vmatpush.bf16.msra.mxu1 %v2318_v25  ;;  %v2409_v25 = vld [vmem:[%s4169_s1 + $0x2c0] sm:$0xf]  ;;  %v913_v34 = vor.u32 %v912_v13, %v908_v12  ;;  %v2482_v12 = vor.u32 %v2786_v0, %v2481_v8  ;;  %v2785_v13 = vld [vmem:[%s4169_s1 + $0x334] sm:$0xf]  ;;  %v2595_v0 = vld [vmem:[%s4169_s1 + $0x3f8] sm:$0xf0] }
  0x65   : > { %v2486_v30 = vor.u32 %v2785_v13, %v2483_v2  ;;  %v921_v14 = vor.u32 %v919_v59, %v917_v42 }
  0x66   : > { %829 = vmatpush.bf16.msra.mxu2 %v2226_v18  ;;  %v2773_v18 = vld [vmem:[%s4169_s1 + $0x2d4] sm:$0xf]  ;;  %v918_v44 = vsel %vm231_vm0, %v913_v34, %v917_v42  ;;  %v2782_v34 = vld [vmem:[%s4169_s1 + $0x314] sm:$0xf0] }
  0x67   : > { %856 = vmatpush.bf16.msra.mxu3 %v2230_v21  ;;  %1033 = vmatpush.bf16.msra.mxu0 %v2306_v37  ;;  %v2792_v21 = vld [vmem:[%s4169_s1 + $0x364] sm:$0xf0]  ;;  %v2422_v22 = vor.u32 %v2773_v18, %v2419_v19  ;;  %v2789_v37 = vld [vmem:[%s4169_s1 + $0x354] sm:$0xf] }
  0x68   : > { %1060 = vmatpush.bf16.msra.mxu1 %v2310_v41  ;;  %v2506_v23 = vor.u32 %v2792_v21, %v2505_v20  ;;  %v2502_v41 = vor.u32 %v2789_v37, %v2499_v40  ;;  %v2385_v21 = vld [vmem:[%s4169_s1 + $0x290] sm:$0xf]  ;;  %v2763_v37 = vld [vmem:[%s4169_s1 + $0x284] sm:$0xf]  ;;  %v2379_v40 = vld [vmem:[%s4169_s1 + $0x288] sm:$0xf0] }
  0x69   : > { %v2382_v42 = vor.u32 %v2763_v37, %v2379_v40  ;;  %v2577_v37 = vld [vmem:[%s4169_s1 + $0x3d0] sm:$0xf]  ;;  %v2805_v40 = vld [vmem:[%s4169_s1 + $0x3d4] sm:$0xf] }
  0x6a   : > { %830 = vmatpush.bf16.msra.mxu2 %v2218_v29  ;;  %v2411_v29 = vld [vmem:[%s4169_s1 + $0x2c8] sm:$0xf0] }
  0x6b   : > { %857 = vmatpush.bf16.msra.mxu3 %v2222_v31  ;;  %1034 = vmatpush.bf16.msra.mxu0 %v2298_v46  ;;  %v2410_v31 = vor.u32 %v2772_v27, %v2409_v25  ;;  %v2414_v32 = vor.u32 %v2771_v28, %v2411_v29  ;;  %v3617_v46 = vld [vmem:[%s3016_s11 + $0x14] sm:$0xff]   ;;  %v2783_v27 = vld [vmem:[%s4169_s1 + $0x324] sm:$0xf]  ;;  %v2475_v28 = vld [vmem:[%s4169_s1 + $0x328] sm:$0xf0] }
  0x6c   : > { %1061 = vmatpush.bf16.msra.mxu1 %v2302_v47  ;;  %v2401_v47 = vld [vmem:[%s4169_s1 + $0x2b0] sm:$0xf]  ;;  %v927_v29 = vshrl.u32 %v3617_v46, 16 }
  0x6d   : > { %504 = vmatmul.bf16.gmra.mxu2 %v3025_v35 }
  0x6e   : > { %674 = vmatmul.bf16.gmra.mxu0 %v3509_v48  ;;  %1208 = vmatpush.bf16.msrb.mxu2 %v2434_v53  ;;  %v2403_v53 = vld [vmem:[%s4169_s1 + $0x2b8] sm:$0xf0] }
  0x6f   : > { %1372 = vmatpush.bf16.msrb.mxu0 %v2514_v4  ;;  %v2406_v55 = vor.u32 %v2769_v50, %v2403_v53  ;;  %v2394_v4 = vor.u32 %v2768_v63, %v2393_v62 }
  0x70   : > { %531 = vmatmul.bf16.gmra.mxu3 %v3025_v35  ;;  %v2435_v35 = vld [vmem:[%s4169_s1 + $0x2f8] sm:$0xf0]  ;;  %1399 = vmatpush.bf16.msrb.mxu1 %v2518_v5  ;;  %v2395_v5 = vld [vmem:[%s4169_s1 + $0x2a8] sm:$0xf0] }
  0x71   : > { %701 = vmatmul.bf16.gmra.mxu1 %v3509_v48  ;;  %v2438_v56 = vor.u32 %v2777_v51, %v2435_v35  ;;  %v2402_v51 = vor.u32 %v2770_v49, %v2401_v47  ;;  %v2489_v35 = vld [vmem:[%s4169_s1 + $0x340] sm:$0xf]  ;;  %v2781_v47 = vld [vmem:[%s4169_s1 + $0x314] sm:$0xf]  ;;  %v2467_v49 = vld [vmem:[%s4169_s1 + $0x318] sm:$0xf0] }
  0x72   : > { %1209 = vmatpush.bf16.msrb.mxu2 %v2426_v60  ;;  %v923_v60 = vshll.u32 %v3617_v46, 16  ;;  %v2470_v50 = vor.u32 %v2781_v47, %v2467_v49  ;;  %v2824_v47 = vld [vmem:[%s4169_s1 + $0x464] sm:$0xf0] }
  0x73   : > { %1235 = vmatpush.bf16.msrb.mxu3 %v2438_v56  ;;  %1373 = vmatpush.bf16.msrb.mxu0 %v2506_v23  ;;  %v2490_v56 = vor.u32 %v2788_v54, %v2489_v35  ;;  %v2457_v35 = vld [vmem:[%s4169_s1 + $0x300] sm:$0xf]  ;;  %v2780_v54 = vld [vmem:[%s4169_s1 + $0x304] sm:$0xf0] }
  0x74   : > { %1400 = vmatpush.bf16.msrb.mxu1 %v2510_v26  ;;  %v925_v18 = vrot.slane %v923_v60, 1  ;;  %v2474_v26 = vor.u32 %v2784_v24, %v2473_v52  ;;  %v2458_v57 = vor.u32 %v2780_v54, %v2457_v35  ;;  %v2825_v24 = vld [vmem:[%s4169_s1 + $0x474] sm:$0xf]  ;;  %v2667_v35 = vld [vmem:[%s4169_s1 + $0x468] sm:$0xf0] }
  0x76   : > { %1210 = vmatpush.bf16.msrb.mxu2 %v2418_v39  ;;  %v2842_v39 = vunpack.c.h.bf16 %v3039_v43  ;;  %v926_v19 = vsel %vm231_vm0, %v921_v14, %v925_v18 }
  0x77   : > { %1236 = vmatpush.bf16.msrb.mxu3 %v2430_v3  ;;  %1374 = vmatpush.bf16.msrb.mxu0 %v2498_v38  ;;  %v2767_v3 = vld [vmem:[%s4169_s1 + $0x2a4] sm:$0xf]  ;;  %v2378_v38 = vor.u32 %v2764_v36, %v2377_v33 }
  0x78   : > { %1401 = vmatpush.bf16.msrb.mxu1 %v2502_v41  ;;  %v3673_v20 = vpack.c.bf16 %v3116_v17, %v2842_v39  ;;  %v2387_v17 = vld [vmem:[%s4169_s1 + $0x298] sm:$0xf0]  ;;  %v2465_v41 = vld [vmem:[%s4169_s1 + $0x310] sm:$0xf]  ;;  %v2808_v39 = vld [vmem:[%s4169_s1 + $0x3e4] sm:$0xf0] }
  0x7a   : > { %1211 = vmatpush.bf16.msrb.mxu2 %v2410_v31  ;;  %v931_v31 = vshll.u32 %v3673_v20, 16 }
  0x7b   : > { %1237 = vmatpush.bf16.msrb.mxu3 %v2422_v22  ;;  %1375 = vmatpush.bf16.msrb.mxu0 %v2490_v56  ;;  %v2766_v22 = vld [vmem:[%s4169_s1 + $0x294] sm:$0xf0] }
  0x7c   : > { %1402 = vmatpush.bf16.msrb.mxu1 %v2494_v61  ;;  %v2386_v23 = vor.u32 %v2766_v22, %v2385_v21  ;;  %v933_v53 = vrot.slane %v931_v31, 1  ;;  %v2846_v61 = vunpack.c.h.bf16 %v3089_v6  ;;  %v2809_v6 = vld [vmem:[%s4169_s1 + $0x3f4] sm:$0xf]  ;;  %v2587_v22 = vld [vmem:[%s4169_s1 + $0x3e8] sm:$0xf0] }
  0x7d   : > { %509 = vmatmul.bf16.gmra.mxu2 %v3039_v43 }
  0x7e   : > { %679 = vmatmul.bf16.gmra.mxu0 %v571_v10  ;;  %1212 = vmatpush.bf16.msrb.mxu2 %v2402_v51  ;;  %v929_v51 = vor.u32 %v927_v29, %v925_v18  ;;  %v3746_v63 = vpack.c.bf16 %v2846_v61, %v2846_v61  ;;  %v2585_v18 = vld [vmem:[%s4169_s1 + $0x3e0] sm:$0xf]  ;;  %v2803_v61 = vld [vmem:[%s4169_s1 + $0x3c4] sm:$0xf] }
  0x7f   : > { %1238 = vmatpush.bf16.msrb.mxu3 %v2414_v32  ;;  %1376 = vmatpush.bf16.msrb.mxu0 %v2482_v12  ;;  %v2478_v32 = vor.u32 %v2783_v27, %v2475_v28  ;;  %v2598_v12 = vor.u32 %v2809_v6, %v2595_v0  ;;  %v2586_v21 = vor.u32 %v2808_v39, %v2585_v18  ;;  %v2822_v6 = vld [vmem:[%s4169_s1 + $0x454] sm:$0xf0]  ;;  %v1116_v0 = vrot.slane %v3556_v9, 1  ;;  %v2659_v18 = vld [vmem:[%s4169_s1 + $0x458] sm:$0xf0] }
  0x80   : > { %536 = vmatmul.bf16.gmra.mxu3 %v3039_v43  ;;  %1403 = vmatpush.bf16.msrb.mxu1 %v2486_v30  ;;  %v2765_v43 = vld [vmem:[%s4169_s1 + $0x294] sm:$0xf]  ;;  %v934_v60 = vsel %vm231_vm0, %v929_v51, %v933_v53  ;;  %v935_v30 = vshrl.u32 %v3673_v20, 16  ;;  %v939_v14 = vshll.u32 %v3746_v63, 16 }
  0x81   : > { %706 = vmatmul.bf16.gmra.mxu1 %v571_v10  ;;  %v2398_v10 = vor.u32 %v2767_v3, %v2395_v5  ;;  %v2390_v25 = vor.u32 %v2765_v43, %v2387_v17  ;;  %v2593_v3 = vld [vmem:[%s4169_s1 + $0x3f0] sm:$0xf] }
  0x82   : > { %1213 = vmatpush.bf16.msrb.mxu2 %v2394_v4  ;;  %v2810_v4 = vld [vmem:[%s4169_s1 + $0x3f4] sm:$0xf0]  ;;  %v2673_v43 = vld [vmem:[%s4169_s1 + $0x470] sm:$0xf]  ;;  %v941_v27 = vrot.slane %v939_v14, 1 }
  0x83   : > { %1239 = vmatpush.bf16.msrb.mxu3 %v2406_v55  ;;  %1377 = vmatpush.bf16.msrb.mxu0 %v2474_v26  ;;  %v2779_v55 = vld [vmem:[%s4169_s1 + $0x304] sm:$0xf]  ;;  %v2594_v8 = vor.u32 %v2810_v4, %v2593_v3  ;;  %v937_v26 = vor.u32 %v935_v30, %v933_v53  ;;  %v2571_v3 = vld [vmem:[%s4169_s1 + $0x3c8] sm:$0xf0]  ;;  %v2657_v4 = vld [vmem:[%s4169_s1 + $0x450] sm:$0xf] }
  0x84   : > { %1404 = vmatpush.bf16.msrb.mxu1 %v2478_v32  ;;  %v2462_v62 = vor.u32 %v2779_v55, %v2459_v58  ;;  %v2823_v53 = vld [vmem:[%s4169_s1 + $0x464] sm:$0xf]  ;;  %v2569_v58 = vld [vmem:[%s4169_s1 + $0x3c0] sm:$0xf]  ;;  %v2658_v30 = vor.u32 %v2822_v6, %v2657_v4  ;;  %v2821_v14 = vld [vmem:[%s4169_s1 + $0x454] sm:$0xf] }
  0x85   : > { %v942_v36 = vsel %vm231_vm0, %v937_v26, %v941_v27  ;;  %v2670_v55 = vor.u32 %v2823_v53, %v2667_v35  ;;  %v2662_v39 = vor.u32 %v2821_v14, %v2659_v18  ;;  %v2563_v27 = vld [vmem:[%s4169_s1 + $0x3b8] sm:$0xf0]  ;;  %v2800_v53 = vld [vmem:[%s4169_s1 + $0x3a4] sm:$0xf0]  ;;  %v2817_v6 = vld [vmem:[%s4169_s1 + $0x434] sm:$0xf] }
  0x86   : > { %1214 = vmatpush.bf16.msrb.mxu2 %v2386_v23  ;;  %v2826_v23 = vld [vmem:[%s4169_s1 + $0x474] sm:$0xf0] }
  0x87   : > { %1240 = vmatpush.bf16.msrb.mxu3 %v2398_v10  ;;  %v2674_v52 = vor.u32 %v2826_v23, %v2673_v43  ;;  %v2897_v23 = vld [vmem:[%s3016_s11 + $0x8] sm:$0xff]  }
  0x88   : > { %1405 = vmatpush.bf16.msrb.mxu1 %v2470_v50 }
  0x8a   : > { %1215 = vmatpush.bf16.msrb.mxu2 %v2378_v38  ;;  %v2806_v38 = vld [vmem:[%s4169_s1 + $0x3d4] sm:$0xf0] }
  0x8b   : > { %1241 = vmatpush.bf16.msrb.mxu3 %v2390_v25  ;;  %v2675_v25 = vld [vmem:[%s4169_s1 + $0x478] sm:$0xf0] }
  0x8c   : > { %1406 = vmatpush.bf16.msrb.mxu1 %v2462_v62  ;;  %v2678_v28 = vor.u32 %v2825_v24, %v2675_v25  ;;  %v2801_v24 = vld [vmem:[%s4169_s1 + $0x3b4] sm:$0xf] }
  0x8d   : > { %831 = vmatmul.bf16.vlgmr.msra.gmra.mxu2 %v3552_v7 }
  0x8e   : > { %1035 = vmatmul.bf16.vlgmr.msra.gmra.mxu0 %v918_v44  ;;  %1551 = vmatpush.bf16.msra.mxu2 %v2594_v8  ;;  %v1115_v8 = vrot.slane %v3552_v7, 1 }
  0x8f   : > { %1242 = vmatpush.bf16.msrb.mxu3 %v2382_v42  ;;  %v2579_v42 = vld [vmem:[%s4169_s1 + $0x3d8] sm:$0xf0] }
  0x90   : > { %858 = vmatmul.bf16.vlgmr.msra.gmra.mxu3 %v3552_v7  ;;  %v2582_v50 = vor.u32 %v2805_v40, %v2579_v42  ;;  %v1117_v7 = vsel %vm562_vm1, %v1115_v8, %v1116_v0  ;;  %v2566_v40 = vor.u32 %v2801_v24, %v2563_v27  ;;  %v2651_v42 = vld [vmem:[%s4169_s1 + $0x448] sm:$0xf0]  ;;  %v2643_v8 = vld [vmem:[%s4169_s1 + $0x438] sm:$0xf0]  ;;  %v2633_v24 = vld [vmem:[%s4169_s1 + $0x420] sm:$0xf] }
  0x91   : > { %1062 = vmatmul.bf16.vlgmr.msra.gmra.mxu1 %v918_v44  ;;  %v2466_v44 = vor.u32 %v2782_v34, %v2465_v41  ;;  %v2578_v34 = vor.u32 %v2806_v38, %v2577_v37 }
  0x92   : > { %1552 = vmatpush.bf16.msra.mxu2 %v2586_v21  ;;  %1749 = vmatpush.bf16.msra.mxu1 %v2678_v28  ;;  %v2649_v28 = vld [vmem:[%s4169_s1 + $0x440] sm:$0xf] }
  0x93   : > { %1378 = vmatpush.bf16.msrb.mxu0 %v2466_v44  ;;  %1578 = vmatpush.bf16.msra.mxu3 %v2598_v12  ;;  %v2665_v44 = vld [vmem:[%s4169_s1 + $0x460] sm:$0xf]  ;;  %v2574_v12 = vor.u32 %v2803_v61, %v2571_v3  ;;  %v2818_v61 = vld [vmem:[%s4169_s1 + $0x434] sm:$0xf0] }
  0x94   : > { %v2666_v51 = vor.u32 %v2824_v47, %v2665_v44 }
  0x96   : > { %1553 = vmatpush.bf16.msra.mxu2 %v2578_v34  ;;  %1750 = vmatpush.bf16.msra.mxu1 %v2670_v55  ;;  %v2819_v34 = vld [vmem:[%s4169_s1 + $0x444] sm:$0xf] }
  0x97   : > { %1379 = vmatpush.bf16.msrb.mxu0 %v2458_v57  ;;  %v2654_v47 = vor.u32 %v2819_v34, %v2651_v42 }
  0x9a   : > { %1751 = vmatpush.bf16.msra.mxu1 %v2662_v39 }
  0x9b   : > { %1722 = vmatpush.bf16.msra.mxu0 %v2674_v52  ;;  %v2802_v52 = vld [vmem:[%s4169_s1 + $0x3b4] sm:$0xf0] }
  0x9d   : > { %836 = vmatmul.bf16.gmra.mxu2 %v3556_v9 }
  0x9e   : > { %1040 = vmatmul.bf16.gmra.mxu0 %v926_v19  ;;  %1752 = vmatpush.bf16.msra.mxu1 %v2654_v47  ;;  %v2796_v47 = vld [vmem:[%s4169_s1 + $0x384] sm:$0xf0] }
  0x9f   : > { %1723 = vmatpush.bf16.msra.mxu0 %v2666_v51  ;;  %v2553_v51 = vld [vmem:[%s4169_s1 + $0x3a0] sm:$0xf] }
  0xa0   : > { %863 = vmatmul.bf16.gmra.mxu3 %v3556_v9  ;;  %v2554_v55 = vor.u32 %v2800_v53, %v2553_v51  ;;  %v2798_v9 = vld [vmem:[%s4169_s1 + $0x394] sm:$0xf0]  ;;  %v2539_v51 = vld [vmem:[%s4169_s1 + $0x388] sm:$0xf0]  ;;  %v2625_v53 = vld [vmem:[%s4169_s1 + $0x410] sm:$0xf] }
  0xa1   : > { %1067 = vmatmul.bf16.gmra.mxu1 %v926_v19  ;;  %v2807_v19 = vld [vmem:[%s4169_s1 + $0x3e4] sm:$0xf] }
  0xa2   : > { %v2590_v17 = vor.u32 %v2807_v19, %v2587_v22 }
  0xa3   : > { %1724 = vmatpush.bf16.msra.mxu0 %v2658_v30 }
  0xa4   : > { %1579 = vmatpush.bf16.msra.mxu3 %v2590_v17  ;;  %v2561_v17 = vld [vmem:[%s4169_s1 + $0x3b0] sm:$0xf] }
  0xa5   : > { %v2562_v26 = vor.u32 %v2802_v52, %v2561_v17  ;;  %v2547_v52 = vld [vmem:[%s4169_s1 + $0x398] sm:$0xf0] }
  0xa8   : > { %1580 = vmatpush.bf16.msra.mxu3 %v2582_v50 }
  0xaa   : > { %v3735_v56 = vpop.f32.mrf.mxu0 }
  0xab   : > { %v3740_v59 = vpop.f32.mrf.mxu1 }
  0xac   : > { %1581 = vmatpush.bf16.msra.mxu3 %v2574_v12  ;;  %v2646_v12 = vor.u32 %v2817_v6, %v2643_v8 }
  0xad   : > { %841 = vmatmul.bf16.gmra.mxu2 %v3617_v46 }
  0xae   : > { %1045 = vmatmul.bf16.gmra.mxu0 %v934_v60  ;;  %1753 = vmatpush.bf16.msra.mxu1 %v2646_v12 }
  0xb0   : > { %868 = vmatmul.bf16.gmra.mxu3 %v3617_v46  ;;  %v3757_v5 = vpop.f32.mrf.mxu2 }
  0xb1   : > { %1072 = vmatmul.bf16.gmra.mxu1 %v934_v60  ;;  %v2804_v60 = vld [vmem:[%s4169_s1 + $0x3c4] sm:$0xf0]  ;;  %1582 = vmatpush.bf16.msra.mxu3 %v2566_v40 }
  0xb2   : > { %v3764_v13 = vpop.f32.mrf.mxu0  ;;  %v2570_v62 = vor.u32 %v2804_v60, %v2569_v58  ;;  %v2555_v58 = vld [vmem:[%s4169_s1 + $0x3a8] sm:$0xf0]  ;;  %v2641_v60 = vld [vmem:[%s4169_s1 + $0x430] sm:$0xf] }
  0xb3   : > { %v3762_v10 = vpop.f32.mrf.mxu3  ;;  %v3766_v2 = vpop.f32.mrf.mxu1  ;;  %v2642_v4 = vor.u32 %v2818_v61, %v2641_v60  ;;  %v2813_v61 = vld [vmem:[%s4169_s1 + $0x414] sm:$0xf] }
  0xb4   : > { %1554 = vmatpush.bf16.msra.mxu2 %v2570_v62  ;;  %v1118_v62 = vrot.slane %v3617_v46, 1 }
  0xb8   : > { %v3794_v29 = vpop.f32.mrf.mxu2  ;;  %1555 = vmatpush.bf16.msra.mxu2 %v2562_v26 }
  0xba   : > { %v3798_v32 = vpop.f32.mrf.mxu0 }
  0xbb   : > { %v3796_v31 = vpop.f32.mrf.mxu3  ;;  %v3800_v33 = vpop.f32.mrf.mxu1 }
  0xbc   : > { %1556 = vmatpush.bf16.msra.mxu2 %v2554_v55  ;;  %v1120_v55 = vrot.slane %v3673_v20, 1 }
  0xbd   : > { %846 = vmatmul.bf16.gmra.mxu2 %v3673_v20 }
  0xbe   : > { %1050 = vmatmul.bf16.gmra.mxu0 %v942_v36 }
  0xc0   : > { %873 = vmatmul.bf16.gmra.mxu3 %v3673_v20  ;;  %v376_v41 = vpop.f32.mrf.mxu2  ;;  %v2617_v20 = vld [vmem:[%s4169_s1 + $0x400] sm:$0xf] }
  0xc1   : > { %1077 = vmatmul.bf16.gmra.mxu1 %v942_v36  ;;  %v2820_v36 = vld [vmem:[%s4169_s1 + $0x444] sm:$0xf0] }
  0xc2   : > { %v3829_v54 = vpop.f32.mrf.mxu0  ;;  %v2650_v41 = vor.u32 %v2820_v36, %v2649_v28 }
  0xc3   : > { %v403_v49 = vpop.f32.mrf.mxu3  ;;  %v3831_v57 = vpop.f32.mrf.mxu1 }
  0xc4   : > { %1725 = vmatpush.bf16.msra.mxu0 %v2650_v41 }
  0xc8   : > { %v377_v19 = vpop.f32.mrf.mxu2  ;;  %1726 = vmatpush.bf16.msra.mxu0 %v2642_v4 }
  0xc9   : > { %v1119_v19 = vsel %vm562_vm1, %v1116_v0, %v1118_v62 }
  0xcb   : > { %v404_v21 = vpop.f32.mrf.mxu3  ;;  %v665_v22 = vpop.f32.mrf.mxu0 }
  0xcd   : > { %1216 = vmatmul.bf16.vlgmr.msrb.gmra.mxu2 %v1117_v7 }
  0xce   : > { %v692_v43 = vpop.f32.mrf.mxu1  ;;  %1380 = vmatmul.bf16.vlgmr.msrb.gmra.mxu0 %v2897_v23 }
  0xd0   : > { %1243 = vmatmul.bf16.vlgmr.msrb.gmra.mxu3 %v1117_v7  ;;  %v495_v25 = vpop.f32.mrf.mxu2 }
  0xd1   : > { %1407 = vmatmul.bf16.vlgmr.msrb.gmra.mxu1 %v2897_v23  ;;  %v496_v37 = vadd.f32 %v495_v25, %v3735_v56  ;;  %v2898_v23 = vld [vmem:[%s3016_s11 + $0x10] sm:$0xff]   ;;  %v2816_v25 = vld [vmem:[%s4169_s1 + $0x424] sm:$0xf0] }
  0xd2   : > { %v2634_v36 = vor.u32 %v2816_v25, %v2633_v24 }
  0xd3   : > { %v522_v38 = vpop.f32.mrf.mxu3  ;;  %v667_v49 = vpop.f32.mrf.mxu0  ;;  %v3889_v50 = vadd.f32 %v665_v22, %v496_v37  ;;  %v2815_v37 = vld [vmem:[%s4169_s1 + $0x424] sm:$0xf] }
  0xd4   : > { %v523_v44 = vadd.f32 %v522_v38, %v3740_v59  ;;  %v2799_v59 = vld [vmem:[%s4169_s1 + $0x3a4] sm:$0xf]  ;;  %v2635_v38 = vld [vmem:[%s4169_s1 + $0x428] sm:$0xf0]  ;;  %1727 = vmatpush.bf16.msra.mxu0 %v2634_v36 }
  0xd5   : > { %v2558_v3 = vor.u32 %v2799_v59, %v2555_v58  ;;  %v2638_v41 = vor.u32 %v2815_v37, %v2635_v38  ;;  %v2814_v59 = vld [vmem:[%s4169_s1 + $0x414] sm:$0xf0] }
  0xd6   : > { %v694_v56 = vpop.f32.mrf.mxu1  ;;  %v3900_v35 = vadd.f32 %v692_v43, %v523_v44  ;;  %v2537_v44 = vld [vmem:[%s4169_s1 + $0x380] sm:$0xf]  ;;  %v2626_v60 = vor.u32 %v2814_v59, %v2625_v53 }
  0xd7   : > { %1583 = vmatpush.bf16.msra.mxu3 %v2558_v3  ;;  %1754 = vmatpush.bf16.msra.mxu1 %v2638_v41  ;;  %v2627_v3 = vld [vmem:[%s4169_s1 + $0x418] sm:$0xf0] }
  0xd8   : > { %v497_v30 = vpop.f32.mrf.mxu2  ;;  %v2630_v4 = vor.u32 %v2813_v61, %v2627_v3  ;;  %1728 = vmatpush.bf16.msra.mxu0 %v2626_v60 }
  0xd9   : > { %v498_v14 = vadd.f32 %v497_v30, %v3764_v13  ;;  %v2545_v13 = vld [vmem:[%s4169_s1 + $0x390] sm:$0xf]  ;;  %v2812_v30 = vld [vmem:[%s4169_s1 + $0x404] sm:$0xf0] }
  0xda   : > { %v2546_v17 = vor.u32 %v2798_v9, %v2545_v13 }
  0xdb   : > { %v524_v18 = vpop.f32.mrf.mxu3  ;;  %v670_v21 = vpop.f32.mrf.mxu0  ;;  %v3925_v7 = vadd.f32 %v667_v49, %v498_v14  ;;  %1755 = vmatpush.bf16.msra.mxu1 %v2630_v4  ;;  %v2811_v14 = vld [vmem:[%s4169_s1 + $0x404] sm:$0xf] }
  0xdc   : > { %v525_v39 = vadd.f32 %v524_v18, %v3766_v2  ;;  %v2797_v2 = vld [vmem:[%s4169_s1 + $0x394] sm:$0xf]  ;;  %1557 = vmatpush.bf16.msra.mxu2 %v2546_v17 }
  0xdd   : > { %1221 = vmatmul.bf16.gmra.mxu2 %v1119_v19  ;;  %v2550_v28 = vor.u32 %v2797_v2, %v2547_v52 }
  0xde   : > { %v697_v22 = vpop.f32.mrf.mxu1  ;;  %v3927_v43 = vadd.f32 %v694_v56, %v525_v39  ;;  %1385 = vmatmul.bf16.gmra.mxu0 %v2898_v23  ;;  %v2538_v56 = vor.u32 %v2796_v47, %v2537_v44  ;;  %v2618_v39 = vor.u32 %v2812_v30, %v2617_v20 }
  0xdf   : > { %1584 = vmatpush.bf16.msra.mxu3 %v2550_v28 }
  0xe0   : > { %1248 = vmatmul.bf16.gmra.mxu3 %v1119_v19  ;;  %v500_v0 = vpop.f32.mrf.mxu2  ;;  %1558 = vmatpush.bf16.msra.mxu2 %v2538_v56  ;;  %v2619_v19 = vld [vmem:[%s4169_s1 + $0x408] sm:$0xf0] }
  0xe1   : > { %1412 = vmatmul.bf16.gmra.mxu1 %v2898_v23  ;;  %v501_v26 = vadd.f32 %v500_v0, %v3798_v32  ;;  %1729 = vmatpush.bf16.msra.mxu0 %v2618_v39 }
  0xe3   : > { %v527_v27 = vpop.f32.mrf.mxu3  ;;  %v672_v34 = vpop.f32.mrf.mxu0  ;;  %v3956_v42 = vadd.f32 %v670_v21, %v501_v26  ;;  %v1122_v26 = vrot.slane %v3746_v63, 1 }
  0xe4   : > { %v528_v40 = vadd.f32 %v527_v27, %v3800_v33  ;;  %v2795_v33 = vld [vmem:[%s4169_s1 + $0x384] sm:$0xf] }
  0xe5   : > { %v2542_v58 = vor.u32 %v2795_v33, %v2539_v51 }
  0xe6   : > { %v699_v32 = vpop.f32.mrf.mxu1  ;;  %v3967_v49 = vadd.f32 %v697_v22, %v528_v40  ;;  %v2622_v22 = vor.u32 %v2811_v14, %v2619_v19 }
  0xe7   : > { %1585 = vmatpush.bf16.msra.mxu3 %v2542_v58 }
  0xe8   : > { %v502_v6 = vpop.f32.mrf.mxu2  ;;  %1756 = vmatpush.bf16.msra.mxu1 %v2622_v22  ;;  %v181_v22 = vld [vmem:[%s3016_s11 + $0x28] sm:$0xf] }
  0xe9   : > { %v503_v8 = vadd.f32 %v502_v6, %v3829_v54  ;;  %v1121_v54 = vsel %vm562_vm1, %v1118_v62, %v1120_v55 }
  0xeb   : > { %v529_v12 = vpop.f32.mrf.mxu3  ;;  %v675_v21 = vpop.f32.mrf.mxu0  ;;  %v4002_v23 = vadd.f32 %v672_v34, %v503_v8  ;;  %v4022_v34 = vld [vmem:[%s3016_s11 + $0x20] sm:$0xff]  }
  0xec   : > { %v530_v18 = vadd.f32 %v529_v12, %v3831_v57  ;;  %v2899_v57 = vld [vmem:[%s3016_s11 + $0x18] sm:$0xff]   ;;  %v1457_v14 = vshll.u32 %v4022_v34, 16 }
  0xed   : > { %1226 = vmatmul.bf16.gmra.mxu2 %v1121_v54 }
  0xee   : > { %v702_v13 = vpop.f32.mrf.mxu1  ;;  %v4004_v9 = vadd.f32 %v699_v32, %v530_v18  ;;  %1390 = vmatmul.bf16.gmra.mxu0 %v2899_v57 }
  0xf0   : > { %1253 = vmatmul.bf16.gmra.mxu3 %v1121_v54  ;;  %v505_v46 = vpop.f32.mrf.mxu2 }
  0xf1   : > { %1417 = vmatmul.bf16.gmra.mxu1 %v2899_v57  ;;  %v506_v62 = vadd.f32 %v505_v46, %v3757_v5  ;;  %v1123_v5 = vsel %vm562_vm1, %v1120_v55, %v1122_v26  ;;  %v192_v46 = vunpack.c.l.bf16 %v181_v22 }
  0xf3   : > { %v532_v2 = vpop.f32.mrf.mxu3  ;;  %v677_v17 = vpop.f32.mrf.mxu0  ;;  %v4009_v52 = vadd.f32 %v675_v21, %v506_v62  ;;  %v1459_v21 = vrot.slane %v1457_v14, 1 }
  0xf4   : > { %v533_v0 = vadd.f32 %v532_v2, %v3762_v10 }
  0xf6   : > { %v704_v24 = vpop.f32.mrf.mxu1  ;;  %v4011_v25 = vadd.f32 %v702_v13, %v533_v0 }
  0xf8   : > { %v507_v27 = vpop.f32.mrf.mxu2 }
  0xf9   : > { %v508_v28 = vadd.f32 %v507_v27, %v3794_v29 }
  0xfb   : > { %v534_v36 = vpop.f32.mrf.mxu3  ;;  %v680_v38 = vpop.f32.mrf.mxu0  ;;  %v4017_v40 = vadd.f32 %v677_v17, %v508_v28  ;;  %v1461_v28 = vshrl.u32 %v4022_v34, 16 }
  0xfc   : > { %v535_v37 = vadd.f32 %v534_v36, %v3796_v31 }
  0xfd   : > { %1231 = vmatmul.bf16.gmra.mxu2 %v1123_v5 }
  0xfe   : > { %v707_v10 = vpop.f32.mrf.mxu1  ;;  %v4019_v41 = vadd.f32 %v704_v24, %v535_v37  ;;  %1395 = vmatmul.bf16.gmra.mxu0 %v4022_v34 }
  0xff   : > { %v1463_v10 = vor.u32 %v1461_v28, %v1459_v21 }
 0x100   : > { %1258 = vmatmul.bf16.gmra.mxu3 %v1123_v5  ;;  %v510_v63 = vpop.f32.mrf.mxu2 }
 0x101   : > { %1422 = vmatmul.bf16.gmra.mxu1 %v4022_v34 }
 0x103   : > { %v537_v29 = vpop.f32.mrf.mxu3  ;;  %v681_v32 = vpop.f32.mrf.mxu0 }
 0x106   : > { %v708_v31 = vpop.f32.mrf.mxu1 }
 0x108   : > { %v511_v44 = vpop.f32.mrf.mxu2 }
 0x10b   : > { %v538_v47 = vpop.f32.mrf.mxu3  ;;  %v1036_v33 = vpop.f32.mrf.mxu0 }
 0x10d   : > { %1559 = vmatmul.bf16.vlgmr.msra.gmra.mxu2 %v3229_v15 }
 0x10e   : > { %v1063_v56 = vpop.f32.mrf.mxu1  ;;  %1730 = vmatmul.bf16.vlgmr.msra.gmra.mxu0 %v3438_v11 }
 0x110   : > { %1586 = vmatmul.bf16.vlgmr.msra.gmra.mxu3 %v3229_v15  ;;  %v832_v51 = vpop.f32.mrf.mxu2 }
 0x111   : > { %1757 = vmatmul.bf16.vlgmr.msra.gmra.mxu1 %v3438_v11  ;;  %v877_v53 = vadd.f32 %v832_v51, %v3889_v50 }
 0x113   : > { %v859_v59 = vpop.f32.mrf.mxu3  ;;  %v1038_v58 = vpop.f32.mrf.mxu0  ;;  %v4032_v60 = vadd.f32 %v1036_v33, %v877_v53 }
 0x114   : > { %v878_v55 = vadd.f32 %v859_v59, %v3900_v35 }
 0x116   : > { %v1065_v61 = vpop.f32.mrf.mxu1  ;;  %v4034_v3 = vadd.f32 %v1063_v56, %v878_v55 }
 0x118   : > { %v834_v4 = vpop.f32.mrf.mxu2 }
 0x119   : > { %v879_v6 = vadd.f32 %v834_v4, %v3925_v7 }
 0x11b   : > { %v861_v15 = vpop.f32.mrf.mxu3  ;;  %v1041_v12 = vpop.f32.mrf.mxu0  ;;  %v4038_v11 = vadd.f32 %v1038_v58, %v879_v6 }
 0x11c   : > { %v880_v8 = vadd.f32 %v861_v15, %v3927_v43 }
 0x11d   : > { %1564 = vmatmul.bf16.gmra.mxu2 %v3113_v16 }
 0x11e   : > { %v1068_v20 = vpop.f32.mrf.mxu1  ;;  %v4040_v50 = vadd.f32 %v1065_v61, %v880_v8  ;;  %1735 = vmatmul.bf16.gmra.mxu0 %v3509_v48 }
 0x120   : > { %1591 = vmatmul.bf16.gmra.mxu3 %v3113_v16  ;;  %v837_v35 = vpop.f32.mrf.mxu2  ;;  %v1636_v16 = vrot.slane %v4022_v34, 1 }
 0x121   : > { %1762 = vmatmul.bf16.gmra.mxu1 %v3509_v48  ;;  %v881_v7 = vadd.f32 %v837_v35, %v3956_v42 }
 0x122   : > { %v1637_v2 = vsel %vm562_vm1, %v3505_v45, %v1636_v16 }
 0x123   : > { %v864_v30 = vpop.f32.mrf.mxu3  ;;  %v1043_v18 = vpop.f32.mrf.mxu0  ;;  %v4049_v54 = vadd.f32 %v1041_v12, %v881_v7 }
 0x124   : > { %v882_v43 = vadd.f32 %v864_v30, %v3967_v49  ;;  %v1460_v49 = vsel %vm231_vm0, %v3201_v1, %v1459_v21 }
 0x126   : > { %v1070_v39 = vpop.f32.mrf.mxu1  ;;  %v4051_v19 = vadd.f32 %v1068_v20, %v882_v43 }
 0x128   : > { %v839_v13 = vpop.f32.mrf.mxu2 }
 0x129   : > { %v883_v48 = vadd.f32 %v839_v13, %v4002_v23  ;;  %v1438_v23 = vpack.c.bf16 %v192_v46, %v192_v46 }
 0x12b   : > { %v866_v57 = vpop.f32.mrf.mxu3  ;;  %v1046_v62 = vpop.f32.mrf.mxu0  ;;  %v4061_v0 = vadd.f32 %v1043_v18, %v883_v48  ;;  %v1465_v36 = vshll.u32 %v1438_v23, 16  ;;  %v1638_v29 = vrot.slane %v1438_v23, 1 }
 0x12c   : > { %v884_v42 = vadd.f32 %v866_v57, %v4004_v9 }
 0x12d   : > { %1569 = vmatmul.bf16.gmra.mxu2 %v1460_v49  ;;  %v1467_v63 = vrot.slane %v1465_v36, 1 }
 0x12e   : > { %v1073_v17 = vpop.f32.mrf.mxu1  ;;  %v4063_v24 = vadd.f32 %v1070_v39, %v884_v42  ;;  %1740 = vmatmul.bf16.gmra.mxu0 %v1637_v2 }
 0x130   : > { %1596 = vmatmul.bf16.gmra.mxu3 %v1460_v49  ;;  %v842_v26 = vpop.f32.mrf.mxu2 }
 0x131   : > { %1767 = vmatmul.bf16.gmra.mxu1 %v1637_v2  ;;  %v885_v9 = vadd.f32 %v842_v26, %v4009_v52  ;;  %v1468_v52 = vsel %vm231_vm0, %v1463_v10, %v1467_v63  ;;  %vm1894_vm0 = vsmask.f32 1280 }
 0x132   : > { %vm1895_vm3 = vmand %vm1893_vm15, %vm1894_vm0 }
 0x133   : > { %v869_v27 = vpop.f32.mrf.mxu3  ;;  %v1048_v45 = vpop.f32.mrf.mxu0  ;;  %v1089_v37 = vadd.f32 %v1046_v62, %v885_v9 }
 0x134   : > { %v886_v1 = vadd.f32 %v869_v27, %v4011_v25  ;;  %v1639_v25 = vsel %vm562_vm1, %v1636_v16, %v1638_v29  ;;  %vm1896_vm1 = vcmask 1043459  }
 0x135   : > { %vm1898_vm4 = vmand %vm1896_vm1, %vm1897_vm2 }
 0x136   : > { %v1075_v5 = vpop.f32.mrf.mxu1  ;;  %v1090_v38 = vadd.f32 %v1073_v17, %v886_v1  ;;  %vm1899_vm5 = vmor %vm1898_vm4, %vm1895_vm3 }
 0x137   : > { %vm1907_vm10 = vmand %vm1896_vm1, %vm1906_vm7 }
 0x138   : > { %v844_v32 = vpop.f32.mrf.mxu2 }
 0x139   : > { %v887_v31 = vadd.f32 %v844_v32, %v4017_v40 }
 0x13b   : > { %v871_v44 = vpop.f32.mrf.mxu3  ;;  %v1051_v33 = vpop.f32.mrf.mxu0  ;;  %v1091_v34 = vadd.f32 %v1048_v45, %v887_v31 }
 0x13c   : > { %v888_v47 = vadd.f32 %v871_v44, %v4019_v41 }
 0x13d   : > { %1574 = vmatmul.bf16.gmra.mxu2 %v1468_v52 }
 0x13e   : > { %v1078_v56 = vpop.f32.mrf.mxu1  ;;  %v1092_v51 = vadd.f32 %v1075_v5, %v888_v47  ;;  %1745 = vmatmul.bf16.gmra.mxu0 %v1639_v25 }
 0x140   : > { %1601 = vmatmul.bf16.gmra.mxu3 %v1468_v52  ;;  %v847_v53 = vpop.f32.mrf.mxu2 }
 0x141   : > { %1772 = vmatmul.bf16.gmra.mxu1 %v1639_v25 }
 0x143   : > { %v874_v59 = vpop.f32.mrf.mxu3  ;;  %v1052_v55 = vpop.f32.mrf.mxu0 }
 0x146   : > { %v1079_v58 = vpop.f32.mrf.mxu1 }
 0x148   : > { %v848_v40 = vpop.f32.mrf.mxu2 }
 0x14b   : > { %v875_v61 = vpop.f32.mrf.mxu3  ;;  %v1381_v4 = vpop.f32.mrf.mxu0 }
 0x14e   : > { %v1408_v41 = vpop.f32.mrf.mxu1 }
 0x150   : > { %v1217_v6 = vpop.f32.mrf.mxu2 }
 0x151   : > { %v1262_v15 = vadd.f32 %v1217_v6, %v4032_v60 }
 0x153   : > { %v1244_v8 = vpop.f32.mrf.mxu3  ;;  %v1383_v20 = vpop.f32.mrf.mxu0  ;;  %v1426_v35 = vadd.f32 %v1381_v4, %v1262_v15 }
 0x154   : > { %v1263_v12 = vadd.f32 %v1244_v8, %v4034_v3 }
 0x156   : > { %v1410_v7 = vpop.f32.mrf.mxu1  ;;  %v1427_v30 = vadd.f32 %v1408_v41, %v1263_v12 }
 0x158   : > { %v1219_v43 = vpop.f32.mrf.mxu2 }
 0x159   : > { %v1264_v14 = vadd.f32 %v1219_v43, %v4038_v11 }
 0x15b   : > { %v1246_v18 = vpop.f32.mrf.mxu3  ;;  %v1386_v21 = vpop.f32.mrf.mxu0  ;;  %v1428_v16 = vadd.f32 %v1383_v20, %v1264_v14 }
 0x15c   : > { %v1265_v39 = vadd.f32 %v1246_v18, %v4040_v50 }
 0x15e   : > { %v1413_v22 = vpop.f32.mrf.mxu1  ;;  %v1429_v13 = vadd.f32 %v1410_v7, %v1265_v39 }
 0x160   : > { %v1222_v48 = vpop.f32.mrf.mxu2 }
 0x161   : > { %v1266_v60 = vadd.f32 %v1222_v48, %v4049_v54 }
 0x163   : > { %v1249_v57 = vpop.f32.mrf.mxu3  ;;  %v1388_v42 = vpop.f32.mrf.mxu0  ;;  %v4078_v49 = vadd.f32 %v1386_v21, %v1266_v60 }
 0x164   : > { %v1267_v3 = vadd.f32 %v1249_v57, %v4051_v19 }
 0x166   : > { %v1415_v46 = vpop.f32.mrf.mxu1  ;;  %v4080_v62 = vadd.f32 %v1413_v22, %v1267_v3 }
 0x168   : > { %v1224_v11 = vpop.f32.mrf.mxu2 }
 0x169   : > { %v1268_v2 = vadd.f32 %v1224_v11, %v4061_v0 }
 0x16b   : > { %v1251_v50 = vpop.f32.mrf.mxu3  ;;  %v1391_v23 = vpop.f32.mrf.mxu0  ;;  %v4084_v26 = vadd.f32 %v1388_v42, %v1268_v2 }
 0x16c   : > { %v1269_v17 = vadd.f32 %v1251_v50, %v4063_v24 }
 0x16e   : > { %v1418_v9 = vpop.f32.mrf.mxu1  ;;  %v4086_v54 = vadd.f32 %v1415_v46, %v1269_v17 }
 0x170   : > { %v1227_v27 = vpop.f32.mrf.mxu2 }
 0x171   : > { %v1270_v19 = vadd.f32 %v1227_v27, %v1089_v37 }
 0x173   : > { %v1254_v1 = vpop.f32.mrf.mxu3  ;;  %v1393_v36 = vpop.f32.mrf.mxu0  ;;  %v4088_v45 = vadd.f32 %v1391_v23, %v1270_v19 }
 0x174   : > { %v1271_v28 = vadd.f32 %v1254_v1, %v1090_v38 }
 0x176   : > { %v1420_v5 = vpop.f32.mrf.mxu1  ;;  %v4090_v10 = vadd.f32 %v1418_v9, %v1271_v28 }
 0x178   : > { %v1229_v0 = vpop.f32.mrf.mxu2 }
 0x179   : > { %v1272_v63 = vadd.f32 %v1229_v0, %v1091_v34 }
 0x17b   : > { %v1256_v29 = vpop.f32.mrf.mxu3  ;;  %v1396_v32 = vpop.f32.mrf.mxu0  ;;  %v4092_v31 = vadd.f32 %v1393_v36, %v1272_v63 }
 0x17c   : > { %v1273_v24 = vadd.f32 %v1256_v29, %v1092_v51  ;;  %v1788_v51 = vld [vmem:[%s4170_s2] sm:$0x3] }
 0x17d   : > { %v4099_v6 = vperm.slane %v1788_v51, 0  ;;  %v4101_v8 = vperm.slane %v1788_v51, 1 }
 0x17e   : > { %v1423_v44 = vpop.f32.mrf.mxu1  ;;  %v4094_v47 = vadd.f32 %v1420_v5, %v1273_v24 }
 0x180   : > { %v1232_v52 = vpop.f32.mrf.mxu2 }
 0x183   : > { %v1259_v37 = vpop.f32.mrf.mxu3  ;;  %v1397_v33 = vpop.f32.mrf.mxu0 }
 0x186   : > { %v1424_v38 = vpop.f32.mrf.mxu1 }
 0x188   : > { %v1233_v25 = vpop.f32.mrf.mxu2 }
 0x18b   : > { %v1260_v56 = vpop.f32.mrf.mxu3  ;;  %v1731_v53 = vpop.f32.mrf.mxu0 }
 0x18e   : > { %v1758_v59 = vpop.f32.mrf.mxu1 }
 0x190   : > { %v1560_v55 = vpop.f32.mrf.mxu2 }
 0x191   : > { %v1605_v40 = vadd.f32 %v1560_v55, %v1426_v35 }
 0x193   : > { %v1587_v58 = vpop.f32.mrf.mxu3  ;;  %v1733_v34 = vpop.f32.mrf.mxu0  ;;  %v1776_v41 = vadd.f32 %v1731_v53, %v1605_v40 }
 0x194   : > { %v1606_v61 = vadd.f32 %v1587_v58, %v1427_v30 }
 0x195   : > { %v1794_v14 = vadd.f32 %v4099_v6, %v1776_v41 }
 0x196   : > { %v1760_v4 = vpop.f32.mrf.mxu1  ;;  %v1777_v15 = vadd.f32 %v1758_v59, %v1606_v61 }
 0x197   : > { %v1806_v60 = vmax.f32 %v1794_v14, 0.0 }
 0x198   : > { %v1562_v12 = vpop.f32.mrf.mxu2  ;;  %v1795_v39 = vadd.f32 %v4101_v8, %v1777_v15 }
 0x199   : > { %v1607_v20 = vadd.f32 %v1562_v12, %v1428_v16 }
 0x19a   : > { %v1807_v3 = vmax.f32 %v1795_v39, 0.0 }
 0x19b   : > { %v1589_v7 = vpop.f32.mrf.mxu3  ;;  %v1778_v35 = vadd.f32 %v1733_v34, %v1607_v20  ;;  %v1736_v18 = vpop.f32.mrf.mxu0  ;;  %v1851_v20 = vld [vmem:[%s4122_s20] sm:$0x5] }
 0x19c   : > { %v1608_v43 = vadd.f32 %v1589_v7, %v1429_v13 }
 0x19d   : > { %v1796_v30 = vadd.f32 %v4099_v6, %v1778_v35 }
 0x19e   : > { %v1779_v21 = vadd.f32 %v1760_v4, %v1608_v43  ;;  %v1763_v22 = vpop.f32.mrf.mxu1 }
 0x19f   : > { %v1808_v57 = vmax.f32 %v1796_v30, 0.0 }
 0x1a0   : > { %v1797_v48 = vadd.f32 %v4101_v8, %v1779_v21  ;;  %v1565_v46 = vpop.f32.mrf.mxu2 }
 0x1a1   : > { %v1818_v16 = vmax.f32 %v1806_v60, %v1808_v57  ;;  %v1609_v13 = vadd.f32 %v1565_v46, %v4078_v49 }
 0x1a2   : > { %v1809_v42 = vmax.f32 %v1797_v48, 0.0 }
 0x1a3   : > { %v1592_v11 = vpop.f32.mrf.mxu3  ;;  %v1780_v17 = vadd.f32 %v1736_v18, %v1609_v13  ;;  %v1738_v23 = vpop.f32.mrf.mxu0 }
 0x1a4   : > { %v1819_v2 = vmax.f32 %v1807_v3, %v1809_v42  ;;  %v1610_v50 = vadd.f32 %v1592_v11, %v4080_v62 }
 0x1a5   : > { %v1798_v19 = vadd.f32 %v4099_v6, %v1780_v17 }
 0x1a6   : > { %v1781_v9 = vadd.f32 %v1763_v22, %v1610_v50  ;;  %v1765_v27 = vpop.f32.mrf.mxu1 }
 0x1a7   : > { %v1810_v28 = vmax.f32 %v1798_v19, 0.0 }
 0x1a8   : > { %v1799_v1 = vadd.f32 %v4101_v8, %v1781_v9  ;;  %v1567_v5 = vpop.f32.mrf.mxu2 }
 0x1a9   : > { %v1820_v0 = vmax.f32 %v1818_v16, %v1810_v28  ;;  %v1611_v24 = vadd.f32 %v1567_v5, %v4084_v26 }
 0x1aa   : > { %v1811_v36 = vmax.f32 %v1799_v1, 0.0 }
 0x1ab   : > { %v1594_v63 = vpop.f32.mrf.mxu3  ;;  %v1824_v49 = vrot.slane %v1820_v0, 1  ;;  %v1741_v32 = vpop.f32.mrf.mxu0  ;;  %v1830_v33 = vrot.slane %v1820_v0, 2  ;;  %v1782_v53 = vadd.f32 %v1738_v23, %v1611_v24 }
 0x1ac   : > { %v1821_v29 = vmax.f32 %v1819_v2, %v1811_v36  ;;  %v1612_v44 = vadd.f32 %v1594_v63, %v4086_v54 }
 0x1ad   : > { %v1828_v37 = vmax.f32 %v1820_v0, %v1824_v49  ;;  %v1800_v4 = vadd.f32 %v4099_v6, %v1782_v53 }
 0x1ae   : > { %v1825_v62 = vrot.slane %v1821_v29, 1  ;;  %v1768_v52 = vpop.f32.mrf.mxu1  ;;  %v1831_v25 = vrot.slane %v1821_v29, 2  ;;  %v1783_v55 = vadd.f32 %v1765_v27, %v1612_v44 }
 0x1af   : > { %v1834_v56 = vmax.f32 %v1828_v37, %v1830_v33  ;;  %v1812_v39 = vmax.f32 %v1800_v4, 0.0 }
 0x1b0   : > { %v1829_v38 = vmax.f32 %v1821_v29, %v1825_v62  ;;  %v1570_v54 = vpop.f32.mrf.mxu2  ;;  %v1801_v7 = vadd.f32 %v4101_v8, %v1783_v55 }
 0x1b1   : > { %v1613_v40 = vadd.f32 %v1570_v54, %v4088_v45 }
 0x1b2   : > { %v1835_v59 = vmax.f32 %v1829_v38, %v1831_v25  ;;  %v1813_v22 = vmax.f32 %v1801_v7, 0.0 }
 0x1b3   : > { %v1597_v34 = vpop.f32.mrf.mxu3  ;;  %v1784_v41 = vadd.f32 %v1741_v32, %v1613_v40  ;;  %v1743_v15 = vpop.f32.mrf.mxu0 }
 0x1b4   : > { %v1836_v51 = vpack.c.bf16 %v1835_v59, %v1834_v56  ;;  %v1614_v61 = vadd.f32 %v1597_v34, %v4090_v10  ;;  %v1900_v56 = vld [vmem:[%s4122_s20] sm:$0xa] }
 0x1b5   : > { %v1802_v14 = vadd.f32 %v4099_v6, %v1784_v41 }
 0x1b6   : > { %v1838_v12 = vrot.slane %v1836_v51, 2  ;;  %v1785_v45 = vadd.f32 %v1768_v52, %v1614_v61  ;;  %v1770_v43 = vpop.f32.mrf.mxu1 }
 0x1b7   : > { %v1814_v21 = vmax.f32 %v1802_v14, 0.0 }
 0x1b8   : > { %v1842_v10 = vsel %vm1839_vm8, %v1836_v51, %v1838_v12  ;;  %v1803_v35 = vadd.f32 %v4101_v8, %v1785_v45  ;;  %v1572_v48 = vpop.f32.mrf.mxu2 }
 0x1b9   : > { %v1852_v18 = vsel %vm1850_vm9, %v1842_v10, %v1851_v20  ;;  %v1866_v57 = vmax.f32 %v1812_v39, %v1814_v21  ;;  %v1615_v3 = vadd.f32 %v1572_v48, %v4092_v31  ;;  %v2679_v23 = vrot.slane %v1842_v10, 9  ;;  %vm1905_vm9 = vmand %vm1893_vm15, %vm1904_vm6 }
 0x1ba   : > { %1853 = vst [vmem:[%s4122_s20] sm:$0x5] %v1852_v18  ;;  %v1815_v30 = vmax.f32 %v1803_v35, 0.0  ;;  %vm1908_vm11 = vmor %vm1907_vm10, %vm1905_vm9 }
 0x1bb   : > { %v1599_v42 = vpop.f32.mrf.mxu3  ;;  %v1786_v13 = vadd.f32 %v1743_v15, %v1615_v3  ;;  %v1746_v11 = vpop.f32.mrf.mxu0 }
 0x1bc   : > { %v1867_v46 = vmax.f32 %v1813_v22, %v1815_v30  ;;  %v1616_v16 = vadd.f32 %v1599_v42, %v4094_v47 }
 0x1bd   : > { %v1804_v17 = vadd.f32 %v4099_v6, %v1786_v13 }
 0x1be   : > { %v1787_v2 = vadd.f32 %v1770_v43, %v1616_v16  ;;  %v1773_v50 = vpop.f32.mrf.mxu1 }
 0x1bf   : > { %v1816_v27 = vmax.f32 %v1804_v17, 0.0 }
 0x1c0   : > { %v1805_v9 = vadd.f32 %v4101_v8, %v1787_v2  ;;  %v1575_v28 = vpop.f32.mrf.mxu2 }
 0x1c1   : > { %v1863_v31 = vld [vmem:[%s4122_s20] sm:$0x5]  ;;  %v1868_v36 = vmax.f32 %v1866_v57, %v1816_v27 }
 0x1c2   : > { %v1864_v19 = vsel %vm1862_vm14, %v2679_v23, %v1863_v31  ;;  %v1817_v1 = vmax.f32 %v1805_v9, 0.0 }
 0x1c3   : > { %1865 = vst [vmem:[%s4122_s20] sm:$0x5] %v1864_v19  ;;  %v1602_v47 = vpop.f32.mrf.mxu3  ;;  %v1872_v0 = vrot.slane %v1868_v36, 1  ;;  %v1747_v63 = vpop.f32.mrf.mxu0  ;;  %v1878_v32 = vrot.slane %v1868_v36, 2 }
 0x1c4   : > { %v1869_v5 = vmax.f32 %v1867_v46, %v1817_v1 }
 0x1c5   : > { %v1876_v24 = vmax.f32 %v1868_v36, %v1872_v0 }
 0x1c6   : > { %v1873_v29 = vrot.slane %v1869_v5, 1  ;;  %v1774_v49 = vpop.f32.mrf.mxu1  ;;  %v1879_v6 = vrot.slane %v1869_v5, 2 }
 0x1c7   : > { %v1882_v44 = vmax.f32 %v1876_v24, %v1878_v32 }
 0x1c8   : > { %v1877_v62 = vmax.f32 %v1869_v5, %v1873_v29  ;;  %v1576_v52 = vpop.f32.mrf.mxu2 }
 0x1ca   : > { %v1883_v8 = vmax.f32 %v1877_v62, %v1879_v6 }
 0x1cb   : > { %v1603_v37 = vpop.f32.mrf.mxu3 }
 0x1cc   : > { %v1884_v33 = vpack.c.bf16 %v1883_v8, %v1882_v44 }
 0x1ce   : > { %v1886_v38 = vrot.slane %v1884_v33, 2 }
 0x1d0   : > { %v1889_v25 = vsel %vm1839_vm8, %v1884_v33, %v1886_v38 }
 0x1d1   : > { %v1891_v53 = vrot.slane %v1889_v25, 7 }
 0x1d3   : > { %v1901_v59 = vsel %vm1899_vm5, %v1891_v53, %v1900_v56 }
 0x1d4   : > { %1902 = vst [vmem:[%s4122_s20] sm:$0xa] %v1901_v59 }
 0x1db   : > { %v1909_v26 = vld [vmem:[%s4122_s20] sm:$0xa] }
 0x1dc   : > { %v1910_v55 = vsel %vm1908_vm11, %v1889_v25, %v1909_v26 }
 0x1dd   : > { %1911 = vst [vmem:[%s4122_s20] sm:$0xa] %v1910_v55 }
 0x1de PF: > { %s13_s12 = sadd.s32 1, %s2907_s12  }
 0x1df   : > { %p10_p4 = scmp.ge.s32.totalorder %s13_s12, 4  }
 0x1e1   :  { %12 = sbr.rel (!%p10_p4) target bundleno = 1 (0x1), region = 70 }

// kernel: scratch_mnist_forward.5
= control target key start
LH: loop header
LB: loop body
LE: loop exit
PB: predicated region body
PF: predicated region fallthrough
CT: control target
= control target key end

     0   :  { %s5532_s1 = inlined_call_operand.vmem [shape: bf16[1024,512], index: 1, kind: input, shape index: {}]   ;;  %s5533_s0 = inlined_call_operand.vmem [shape: bf16[8,1024], index: 0, kind: input, shape index: {}]   ;;  %s5534_s2 = inlined_call_operand.vmem [shape: f32[1,512], index: 2, kind: input, shape index: {}]   ;;  %s5535_s3 = inlined_call_operand.vmem [shape: bf16[512,128], index: 3, kind: input, shape index: {}]   ;;  %s5536_s4 = inlined_call_operand.vmem [shape: f32[1,128], index: 4, kind: input, shape index: {}]   ;;  %s5537_s5 = inlined_call_operand.vmem [shape: f32[8,128], index: 5, kind: output, shape index: {}]  }
   0x1   :  { %v2449_v0 = vld [vmem:[%s5532_s1 + $0xe0] sm:$0xf]  ;;  %v3517_v1 = vld [vmem:[%s5532_s1 + $0xec] sm:$0xf0] }
   0x2   :  { %v2577_v2 = vld [vmem:[%s5532_s1 + $0x1e0] sm:$0xf]  ;;  %v2450_v3 = vor.u32 %v3517_v1, %v2449_v0  ;;  %v3549_v4 = vld [vmem:[%s5532_s1 + $0x1ec] sm:$0xf0] }
   0x3   :  { %v2705_v5 = vld [vmem:[%s5532_s1 + $0x2e0] sm:$0xf]  ;;  %v3581_v6 = vld [vmem:[%s5532_s1 + $0x2ec] sm:$0xf0]  ;;  %v2578_v7 = vor.u32 %v3549_v4, %v2577_v2 }
   0x4   :  { %v2706_v8 = vor.u32 %v3581_v6, %v2705_v5  ;;  %v2833_v9 = vld [vmem:[%s5532_s1 + $0x3e0] sm:$0xf]  ;;  %v3613_v10 = vld [vmem:[%s5532_s1 + $0x3ec] sm:$0xf0]  ;;  %1598 = vmatpush.bf16.msra.mxu0 %v2450_v3 }
   0x5   :  { %v2433_v11 = vld [vmem:[%s5532_s1 + $0xc0] sm:$0xf]  ;;  %v2834_v12 = vor.u32 %v3613_v10, %v2833_v9  ;;  %v3513_v13 = vld [vmem:[%s5532_s1 + $0xcc] sm:$0xf0]  ;;  %1611 = vmatpush.bf16.msra.mxu1 %v2578_v7 }
   0x6   :  { %v2561_v14 = vld [vmem:[%s5532_s1 + $0x1c0] sm:$0xf]  ;;  %v3545_v15 = vld [vmem:[%s5532_s1 + $0x1cc] sm:$0xf0]  ;;  %1624 = vmatpush.bf16.msra.mxu2 %v2706_v8  ;;  %v2434_v16 = vor.u32 %v3513_v13, %v2433_v11 }
   0x7   :  { %v2562_v17 = vor.u32 %v3545_v15, %v2561_v14  ;;  %v2689_v18 = vld [vmem:[%s5532_s1 + $0x2c0] sm:$0xf]  ;;  %v3577_v19 = vld [vmem:[%s5532_s1 + $0x2cc] sm:$0xf0]  ;;  %1637 = vmatpush.bf16.msra.mxu3 %v2834_v12 }
   0x8   :  { %v2817_v20 = vld [vmem:[%s5532_s1 + $0x3c0] sm:$0xf]  ;;  %v2690_v21 = vor.u32 %v3577_v19, %v2689_v18  ;;  %v3609_v22 = vld [vmem:[%s5532_s1 + $0x3cc] sm:$0xf0]  ;;  %1599 = vmatpush.bf16.msra.mxu0 %v2434_v16 }
   0x9   :  { %v2417_v23 = vld [vmem:[%s5532_s1 + $0xa0] sm:$0xf]  ;;  %v3509_v24 = vld [vmem:[%s5532_s1 + $0xac] sm:$0xf0]  ;;  %v2818_v25 = vor.u32 %v3609_v22, %v2817_v20  ;;  %1612 = vmatpush.bf16.msra.mxu1 %v2562_v17 }
   0xa   :  { %v2545_v26 = vld [vmem:[%s5532_s1 + $0x1a0] sm:$0xf]  ;;  %v3541_v27 = vld [vmem:[%s5532_s1 + $0x1ac] sm:$0xf0]  ;;  %v2418_v29 = vor.u32 %v3509_v24, %v2417_v23  ;;  %1625 = vmatpush.bf16.msra.mxu2 %v2690_v21 }
   0xb   :  { %v2673_v28 = vld [vmem:[%s5532_s1 + $0x2a0] sm:$0xf]  ;;  %v3573_v30 = vld [vmem:[%s5532_s1 + $0x2ac] sm:$0xf0]  ;;  %v2546_v33 = vor.u32 %v3541_v27, %v2545_v26  ;;  %1638 = vmatpush.bf16.msra.mxu3 %v2818_v25 }
   0xc   :  { %v2801_v31 = vld [vmem:[%s5532_s1 + $0x3a0] sm:$0xf]  ;;  %v3605_v32 = vld [vmem:[%s5532_s1 + $0x3ac] sm:$0xf0]  ;;  %v2674_v34 = vor.u32 %v3573_v30, %v2673_v28  ;;  %1600 = vmatpush.bf16.msra.mxu0 %v2418_v29 }
   0xd   :  { %v2401_v35 = vld [vmem:[%s5532_s1 + $0x80] sm:$0xf]  ;;  %v3505_v36 = vld [vmem:[%s5532_s1 + $0x8c] sm:$0xf0]  ;;  %v2802_v38 = vor.u32 %v3605_v32, %v2801_v31  ;;  %1613 = vmatpush.bf16.msra.mxu1 %v2546_v33 }
   0xe   :  { %v2529_v37 = vld [vmem:[%s5532_s1 + $0x180] sm:$0xf]  ;;  %v3537_v39 = vld [vmem:[%s5532_s1 + $0x18c] sm:$0xf0]  ;;  %v2402_v44 = vor.u32 %v3505_v36, %v2401_v35  ;;  %1626 = vmatpush.bf16.msra.mxu2 %v2674_v34 }
   0xf   :  { %v2657_v40 = vld [vmem:[%s5532_s1 + $0x280] sm:$0xf]  ;;  %v3569_v41 = vld [vmem:[%s5532_s1 + $0x28c] sm:$0xf0]  ;;  %v2530_v45 = vor.u32 %v3537_v39, %v2529_v37  ;;  %1639 = vmatpush.bf16.msra.mxu3 %v2802_v38 }
  0x10   :  { %v2785_v42 = vld [vmem:[%s5532_s1 + $0x380] sm:$0xf]  ;;  %v3601_v43 = vld [vmem:[%s5532_s1 + $0x38c] sm:$0xf0]  ;;  %v2658_v46 = vor.u32 %v3569_v41, %v2657_v40  ;;  %1601 = vmatpush.bf16.msra.mxu0 %v2402_v44 }
  0x11   :  { %v2385_v47 = vld [vmem:[%s5532_s1 + $0x60] sm:$0xf]  ;;  %v3501_v48 = vld [vmem:[%s5532_s1 + $0x6c] sm:$0xf0]  ;;  %v2786_v50 = vor.u32 %v3601_v43, %v2785_v42  ;;  %1614 = vmatpush.bf16.msra.mxu1 %v2530_v45 }
  0x12   :  { %v2513_v49 = vld [vmem:[%s5532_s1 + $0x160] sm:$0xf]  ;;  %v3533_v51 = vld [vmem:[%s5532_s1 + $0x16c] sm:$0xf0]  ;;  %v2386_v56 = vor.u32 %v3501_v48, %v2385_v47  ;;  %1627 = vmatpush.bf16.msra.mxu2 %v2658_v46 }
  0x13   :  { %v2641_v52 = vld [vmem:[%s5532_s1 + $0x260] sm:$0xf]  ;;  %v3565_v53 = vld [vmem:[%s5532_s1 + $0x26c] sm:$0xf0]  ;;  %v2514_v57 = vor.u32 %v3533_v51, %v2513_v49  ;;  %1640 = vmatpush.bf16.msra.mxu3 %v2786_v50 }
  0x14   :  { %v2769_v54 = vld [vmem:[%s5532_s1 + $0x360] sm:$0xf]  ;;  %v3597_v55 = vld [vmem:[%s5532_s1 + $0x36c] sm:$0xf0]  ;;  %v2642_v58 = vor.u32 %v3565_v53, %v2641_v52  ;;  %1602 = vmatpush.bf16.msra.mxu0 %v2386_v56 }
  0x15   :  { %v2369_v59 = vld [vmem:[%s5532_s1 + $0x40] sm:$0xf]  ;;  %v3497_v60 = vld [vmem:[%s5532_s1 + $0x4c] sm:$0xf0]  ;;  %v2770_v62 = vor.u32 %v3597_v55, %v2769_v54  ;;  %1615 = vmatpush.bf16.msra.mxu1 %v2514_v57 }
  0x16   :  { %v2497_v61 = vld [vmem:[%s5532_s1 + $0x140] sm:$0xf]  ;;  %v3529_v63 = vld [vmem:[%s5532_s1 + $0x14c] sm:$0xf0]  ;;  %v2370_v4 = vor.u32 %v3497_v60, %v2369_v59  ;;  %1628 = vmatpush.bf16.msra.mxu2 %v2642_v58 }
  0x17   :  { %v2625_v0 = vld [vmem:[%s5532_s1 + $0x240] sm:$0xf]  ;;  %v3561_v1 = vld [vmem:[%s5532_s1 + $0x24c] sm:$0xf0]  ;;  %v2498_v5 = vor.u32 %v3529_v63, %v2497_v61  ;;  %1641 = vmatpush.bf16.msra.mxu3 %v2770_v62 }
  0x18   :  { %v2753_v2 = vld [vmem:[%s5532_s1 + $0x340] sm:$0xf]  ;;  %v3593_v3 = vld [vmem:[%s5532_s1 + $0x34c] sm:$0xf0]  ;;  %v2626_v6 = vor.u32 %v3561_v1, %v2625_v0  ;;  %1603 = vmatpush.bf16.msra.mxu0 %v2370_v4 }
  0x19   :  { %v2353_v7 = vld [vmem:[%s5532_s1 + $0x20] sm:$0xf]  ;;  %v3493_v8 = vld [vmem:[%s5532_s1 + $0x2c] sm:$0xf0]  ;;  %v2754_v10 = vor.u32 %v3593_v3, %v2753_v2  ;;  %1616 = vmatpush.bf16.msra.mxu1 %v2498_v5  ;;  %v21_v2 = vld [vmem:[%s5533_s0 + $0x8] sm:$0xff] }
  0x1a   :  { %v2481_v9 = vld [vmem:[%s5532_s1 + $0x120] sm:$0xf]  ;;  %v3525_v11 = vld [vmem:[%s5532_s1 + $0x12c] sm:$0xf0]  ;;  %v2354_v16 = vor.u32 %v3493_v8, %v2353_v7  ;;  %1629 = vmatpush.bf16.msra.mxu2 %v2626_v6  ;;  %v296_v8 = vunpack.c.l.b16 %v21_v2 }
  0x1b   :  { %v2609_v12 = vld [vmem:[%s5532_s1 + $0x220] sm:$0xf]  ;;  %v3557_v13 = vld [vmem:[%s5532_s1 + $0x22c] sm:$0xf0]  ;;  %v2482_v19 = vor.u32 %v3525_v11, %v2481_v9  ;;  %1642 = vmatpush.bf16.msra.mxu3 %v2754_v10  ;;  %v297_v10 = vunpack.c.h.b16 %v21_v2 }
  0x1c   :  { %v2737_v14 = vld [vmem:[%s5532_s1 + $0x320] sm:$0xf]  ;;  %v3589_v15 = vld [vmem:[%s5532_s1 + $0x32c] sm:$0xf0]  ;;  %v2610_v20 = vor.u32 %v3557_v13, %v2609_v12  ;;  %1604 = vmatpush.bf16.msra.mxu0 %v2354_v16 }
  0x1d   :  { %v2337_v17 = vld [vmem:[%s5532_s1] sm:$0xf]  ;;  %v3489_v18 = vld [vmem:[%s5532_s1 + $0xc] sm:$0xf0]  ;;  %v2738_v24 = vor.u32 %v3589_v15, %v2737_v14  ;;  %1617 = vmatpush.bf16.msra.mxu1 %v2482_v19 }
  0x1e   :  { %v2465_v21 = vld [vmem:[%s5532_s1 + $0x100] sm:$0xf]  ;;  %v3521_v22 = vld [vmem:[%s5532_s1 + $0x10c] sm:$0xf0]  ;;  %v2338_v31 = vor.u32 %v3489_v18, %v2337_v17  ;;  %1630 = vmatpush.bf16.msra.mxu2 %v2610_v20  ;;  %v4100_v18 = vpack.c.b16 %v296_v8, %v296_v8  ;;  %v4104_v20 = vpack.c.b16 %v297_v10, %v297_v10  ;;  %v3515_v8 = vld [vmem:[%s5532_s1 + $0xe4] sm:$0xf] }
  0x1f   :  { %v2593_v23 = vld [vmem:[%s5532_s1 + $0x200] sm:$0xf]  ;;  %v3553_v25 = vld [vmem:[%s5532_s1 + $0x20c] sm:$0xf0]  ;;  %v2466_v35 = vor.u32 %v3521_v22, %v2465_v21  ;;  %1643 = vmatpush.bf16.msra.mxu3 %v2738_v24  ;;  %v3547_v10 = vld [vmem:[%s5532_s1 + $0x1e4] sm:$0xf] }
  0x20   :  { %v2721_v26 = vld [vmem:[%s5532_s1 + $0x300] sm:$0xf]  ;;  %v3585_v27 = vld [vmem:[%s5532_s1 + $0x30c] sm:$0xf0]  ;;  %v2594_v36 = vor.u32 %v3553_v25, %v2593_v23  ;;  %1605 = vmatpush.bf16.msra.mxu0 %v2338_v31 }
  0x21   :  { %v2961_v28 = vld [vmem:[%s5532_s1 + $0x4e0] sm:$0xf]  ;;  %v3645_v29 = vld [vmem:[%s5532_s1 + $0x4ec] sm:$0xf0]  ;;  %v2722_v39 = vor.u32 %v3585_v27, %v2721_v26  ;;  %1618 = vmatpush.bf16.msra.mxu1 %v2466_v35 }
  0x22   :  { %v3089_v30 = vld [vmem:[%s5532_s1 + $0x5e0] sm:$0xf]  ;;  %v3677_v32 = vld [vmem:[%s5532_s1 + $0x5ec] sm:$0xf0]  ;;  %v2962_v40 = vor.u32 %v3645_v29, %v2961_v28  ;;  %1631 = vmatpush.bf16.msra.mxu2 %v2594_v36 }
  0x23   :  { %v3217_v33 = vld [vmem:[%s5532_s1 + $0x6e0] sm:$0xf]  ;;  %v3709_v34 = vld [vmem:[%s5532_s1 + $0x6ec] sm:$0xf0]  ;;  %v3090_v41 = vor.u32 %v3677_v32, %v3089_v30  ;;  %1644 = vmatpush.bf16.msra.mxu3 %v2722_v39 }
  0x24   :  { %v3345_v37 = vld [vmem:[%s5532_s1 + $0x7e0] sm:$0xf]  ;;  %v3741_v38 = vld [vmem:[%s5532_s1 + $0x7ec] sm:$0xf0]  ;;  %v3218_v42 = vor.u32 %v3709_v34, %v3217_v33  ;;  %1650 = vmatpush.bf16.msrb.mxu0 %v2962_v40 }
  0x25   :  { %v2945_v43 = vld [vmem:[%s5532_s1 + $0x4c0] sm:$0xf]  ;;  %v3641_v44 = vld [vmem:[%s5532_s1 + $0x4cc] sm:$0xf0]  ;;  %v3346_v46 = vor.u32 %v3741_v38, %v3345_v37  ;;  %1663 = vmatpush.bf16.msrb.mxu1 %v3090_v41  ;;  %1632 = vmatmul.bf16.vlgmr.msra.gmra.mxu2 %v4100_v18 }
  0x26   :  { %v3073_v45 = vld [vmem:[%s5532_s1 + $0x5c0] sm:$0xf]  ;;  %v3673_v47 = vld [vmem:[%s5532_s1 + $0x5cc] sm:$0xf0]  ;;  %v2946_v52 = vor.u32 %v3641_v44, %v2945_v43  ;;  %1676 = vmatpush.bf16.msrb.mxu2 %v3218_v42  ;;  %1645 = vmatmul.bf16.vlgmr.msra.gmra.mxu3 %v4104_v20 }
  0x27   :  { %v3201_v48 = vld [vmem:[%s5532_s1 + $0x6c0] sm:$0xf]  ;;  %v3705_v49 = vld [vmem:[%s5532_s1 + $0x6cc] sm:$0xf0]  ;;  %v3074_v54 = vor.u32 %v3673_v47, %v3073_v45  ;;  %1689 = vmatpush.bf16.msrb.mxu3 %v3346_v46 }
  0x28   :  { %v3329_v50 = vld [vmem:[%s5532_s1 + $0x7c0] sm:$0xf]  ;;  %v3737_v51 = vld [vmem:[%s5532_s1 + $0x7cc] sm:$0xf0]  ;;  %v3202_v55 = vor.u32 %v3705_v49, %v3201_v48  ;;  %1651 = vmatpush.bf16.msrb.mxu0 %v2946_v52 }
  0x29   :  { %v2929_v53 = vld [vmem:[%s5532_s1 + $0x4a0] sm:$0xf]  ;;  %v3637_v56 = vld [vmem:[%s5532_s1 + $0x4ac] sm:$0xf0]  ;;  %v3330_v59 = vor.u32 %v3737_v51, %v3329_v50  ;;  %1664 = vmatpush.bf16.msrb.mxu1 %v3074_v54 }
  0x2a   :  { %v3057_v57 = vld [vmem:[%s5532_s1 + $0x5a0] sm:$0xf]  ;;  %v3669_v58 = vld [vmem:[%s5532_s1 + $0x5ac] sm:$0xf0]  ;;  %v2930_v0 = vor.u32 %v3637_v56, %v2929_v53  ;;  %1677 = vmatpush.bf16.msrb.mxu2 %v3202_v55 }
  0x2b   :  { %v3185_v60 = vld [vmem:[%s5532_s1 + $0x6a0] sm:$0xf]  ;;  %v3701_v61 = vld [vmem:[%s5532_s1 + $0x6ac] sm:$0xf0]  ;;  %v3058_v1 = vor.u32 %v3669_v58, %v3057_v57  ;;  %1690 = vmatpush.bf16.msrb.mxu3 %v3330_v59 }
  0x2c   :  { %v3313_v62 = vld [vmem:[%s5532_s1 + $0x7a0] sm:$0xf]  ;;  %v3733_v63 = vld [vmem:[%s5532_s1 + $0x7ac] sm:$0xf0]  ;;  %v3186_v4 = vor.u32 %v3701_v61, %v3185_v60  ;;  %1652 = vmatpush.bf16.msrb.mxu0 %v2930_v0 }
  0x2d   :  { %v20_v3 = vld [vmem:[%s5533_s0] sm:$0xff]  ;;  %v3633_v6 = vld [vmem:[%s5532_s1 + $0x48c] sm:$0xf0]  ;;  %v3314_v11 = vor.u32 %v3733_v63, %v3313_v62  ;;  %1665 = vmatpush.bf16.msrb.mxu1 %v3058_v1 }
  0x2e   :  { %v2913_v5 = vld [vmem:[%s5532_s1 + $0x480] sm:$0xf]  ;;  %v294_v9 = vunpack.c.l.b16 %v20_v3  ;;  %v3665_v12 = vld [vmem:[%s5532_s1 + $0x58c] sm:$0xf0]  ;;  %v295_v15 = vunpack.c.h.b16 %v20_v3  ;;  %1678 = vmatpush.bf16.msrb.mxu2 %v3186_v4  ;;  %v23_v3 = vld [vmem:[%s5533_s0 + $0x18] sm:$0xff] }
  0x2f   :  { %v3041_v7 = vld [vmem:[%s5532_s1 + $0x580] sm:$0xf]  ;;  %v3697_v14 = vld [vmem:[%s5532_s1 + $0x68c] sm:$0xf0]  ;;  %v2914_v21 = vor.u32 %v3633_v6, %v2913_v5  ;;  %1691 = vmatpush.bf16.msrb.mxu3 %v3314_v11 }
  0x30   :  { %v3169_v13 = vld [vmem:[%s5532_s1 + $0x680] sm:$0xf]  ;;  %v3729_v17 = vld [vmem:[%s5532_s1 + $0x78c] sm:$0xf0]  ;;  %v4102_v19 = vpack.c.b16 %v294_v9, %v294_v9  ;;  %v4106_v22 = vpack.c.b16 %v295_v15, %v295_v15  ;;  %v3042_v23 = vor.u32 %v3665_v12, %v3041_v7  ;;  %v2451_v9 = vld [vmem:[%s5532_s1 + $0xf0] sm:$0xf0]  ;;  %v300_v15 = vunpack.c.l.b16 %v23_v3 }
  0x31   :  { %v3297_v16 = vld [vmem:[%s5532_s1 + $0x780] sm:$0xf]  ;;  %v3170_v24 = vor.u32 %v3697_v14, %v3169_v13  ;;  %v3629_v26 = vld [vmem:[%s5532_s1 + $0x46c] sm:$0xf0]  ;;  %1653 = vmatpush.bf16.msrb.mxu0 %v2914_v21  ;;  %v2579_v12 = vld [vmem:[%s5532_s1 + $0x1f0] sm:$0xf0] }
  0x32   :  { %v2897_v25 = vld [vmem:[%s5532_s1 + $0x460] sm:$0xf]  ;;  %v3298_v28 = vor.u32 %v3729_v17, %v3297_v16  ;;  %v3661_v29 = vld [vmem:[%s5532_s1 + $0x56c] sm:$0xf0]  ;;  %1606 = vmatmul.bf16.vlgmr.msra.gmra.mxu0 %v4102_v19  ;;  %1619 = vmatmul.bf16.vlgmr.msra.gmra.mxu1 %v4106_v22  ;;  %v3579_v13 = vld [vmem:[%s5532_s1 + $0x2e4] sm:$0xf] }
  0x33   :  { %v3025_v27 = vld [vmem:[%s5532_s1 + $0x560] sm:$0xf]  ;;  %v3693_v31 = vld [vmem:[%s5532_s1 + $0x66c] sm:$0xf0]  ;;  %v2898_v34 = vor.u32 %v3629_v26, %v2897_v25  ;;  %1666 = vmatpush.bf16.msrb.mxu1 %v3042_v23  ;;  %1679 = vmatpush.bf16.msrb.mxu2 %v3170_v24  ;;  %v2707_v14 = vld [vmem:[%s5532_s1 + $0x2f0] sm:$0xf0]  ;;  %v301_v25 = vunpack.c.h.b16 %v23_v3 }
  0x34   :  { %v3153_v30 = vld [vmem:[%s5532_s1 + $0x660] sm:$0xf]  ;;  %v3725_v33 = vld [vmem:[%s5532_s1 + $0x76c] sm:$0xf0]  ;;  %v3026_v35 = vor.u32 %v3661_v29, %v3025_v27  ;;  %1692 = vmatpush.bf16.msrb.mxu3 %v3298_v28  ;;  %v3611_v21 = vld [vmem:[%s5532_s1 + $0x3e4] sm:$0xf]  ;;  %v2454_v27 = vor.u32 %v3515_v8, %v2451_v9  ;;  %v2582_v29 = vor.u32 %v3547_v10, %v2579_v12 }
  0x35   :  { %v3281_v32 = vld [vmem:[%s5532_s1 + $0x760] sm:$0xf]  ;;  %v3154_v36 = vor.u32 %v3693_v31, %v3153_v30  ;;  %v3625_v38 = vld [vmem:[%s5532_s1 + $0x44c] sm:$0xf0]  ;;  %1654 = vmatpush.bf16.msrb.mxu0 %v2898_v34  ;;  %v2835_v23 = vld [vmem:[%s5532_s1 + $0x3f0] sm:$0xf0]  ;;  %v2710_v30 = vor.u32 %v3579_v13, %v2707_v14 }
  0x36   :  { %v2881_v37 = vld [vmem:[%s5532_s1 + $0x440] sm:$0xf]  ;;  %v3282_v40 = vor.u32 %v3725_v33, %v3281_v32  ;;  %v3657_v41 = vld [vmem:[%s5532_s1 + $0x54c] sm:$0xf0]  ;;  %v3511_v31 = vld [vmem:[%s5532_s1 + $0xc4] sm:$0xf]  ;;  %v2838_v34 = vor.u32 %v3611_v21, %v2835_v23 }
  0x37   :  { %v3009_v39 = vld [vmem:[%s5532_s1 + $0x540] sm:$0xf]  ;;  %v3689_v43 = vld [vmem:[%s5532_s1 + $0x64c] sm:$0xf0]  ;;  %v2882_v46 = vor.u32 %v3625_v38, %v2881_v37  ;;  %1667 = vmatpush.bf16.msrb.mxu1 %v3026_v35  ;;  %1680 = vmatpush.bf16.msrb.mxu2 %v3154_v36  ;;  %v2435_v32 = vld [vmem:[%s5532_s1 + $0xd0] sm:$0xf0]  ;;  %v4256_v38 = vpack.c.b16 %v300_v15, %v300_v15 }
  0x38   :  { %v3137_v42 = vld [vmem:[%s5532_s1 + $0x640] sm:$0xf]  ;;  %v3721_v45 = vld [vmem:[%s5532_s1 + $0x74c] sm:$0xf0]  ;;  %v3010_v47 = vor.u32 %v3657_v41, %v3009_v39  ;;  %1693 = vmatpush.bf16.msrb.mxu3 %v3282_v40  ;;  %v3543_v33 = vld [vmem:[%s5532_s1 + $0x1c4] sm:$0xf] }
  0x39   :  { %v3265_v44 = vld [vmem:[%s5532_s1 + $0x740] sm:$0xf]  ;;  %v3138_v48 = vor.u32 %v3689_v43, %v3137_v42  ;;  %v3621_v50 = vld [vmem:[%s5532_s1 + $0x42c] sm:$0xf0]  ;;  %1655 = vmatpush.bf16.msrb.mxu0 %v2882_v46  ;;  %v2563_v35 = vld [vmem:[%s5532_s1 + $0x1d0] sm:$0xf0]  ;;  %v4266_v42 = vpack.c.b16 %v301_v25, %v301_v25  ;;  %v2438_v43 = vor.u32 %v3511_v31, %v2435_v32 }
  0x3a   :  { %v2865_v49 = vld [vmem:[%s5532_s1 + $0x420] sm:$0xf]  ;;  %v3266_v52 = vor.u32 %v3721_v45, %v3265_v44  ;;  %v3653_v53 = vld [vmem:[%s5532_s1 + $0x52c] sm:$0xf0]  ;;  %v3575_v36 = vld [vmem:[%s5532_s1 + $0x2c4] sm:$0xf]  ;;  %v2566_v45 = vor.u32 %v3543_v33, %v2563_v35 }
  0x3b   :  { %v2993_v51 = vld [vmem:[%s5532_s1 + $0x520] sm:$0xf]  ;;  %v3685_v55 = vld [vmem:[%s5532_s1 + $0x62c] sm:$0xf0]  ;;  %v2866_v59 = vor.u32 %v3621_v50, %v2865_v49  ;;  %1668 = vmatpush.bf16.msrb.mxu1 %v3010_v47  ;;  %1681 = vmatpush.bf16.msrb.mxu2 %v3138_v48  ;;  %v2691_v37 = vld [vmem:[%s5532_s1 + $0x2d0] sm:$0xf0] }
  0x3c   :  { %v3121_v54 = vld [vmem:[%s5532_s1 + $0x620] sm:$0xf]  ;;  %v3717_v57 = vld [vmem:[%s5532_s1 + $0x72c] sm:$0xf0]  ;;  %v2994_v63 = vor.u32 %v3653_v53, %v2993_v51  ;;  %1694 = vmatpush.bf16.msrb.mxu3 %v3266_v52  ;;  %v3607_v39 = vld [vmem:[%s5532_s1 + $0x3c4] sm:$0xf]  ;;  %v2694_v46 = vor.u32 %v3575_v36, %v2691_v37 }
  0x3d   :  { %v3249_v56 = vld [vmem:[%s5532_s1 + $0x720] sm:$0xf]  ;;  %v3617_v60 = vld [vmem:[%s5532_s1 + $0x40c] sm:$0xf0]  ;;  %v3122_v0 = vor.u32 %v3685_v55, %v3121_v54  ;;  %1656 = vmatpush.bf16.msrb.mxu0 %v2866_v59  ;;  %v2819_v40 = vld [vmem:[%s5532_s1 + $0x3d0] sm:$0xf0] }
  0x3e   :  { %v2849_v58 = vld [vmem:[%s5532_s1 + $0x400] sm:$0xf]  ;;  %v3649_v62 = vld [vmem:[%s5532_s1 + $0x50c] sm:$0xf0]  ;;  %v3250_v4 = vor.u32 %v3717_v57, %v3249_v56  ;;  %v3507_v47 = vld [vmem:[%s5532_s1 + $0xa4] sm:$0xf]  ;;  %v2822_v50 = vor.u32 %v3607_v39, %v2819_v40 }
  0x3f   :  { %v2977_v61 = vld [vmem:[%s5532_s1 + $0x500] sm:$0xf]  ;;  %v3681_v2 = vld [vmem:[%s5532_s1 + $0x60c] sm:$0xf0]  ;;  %v2850_v11 = vor.u32 %v3617_v60, %v2849_v58  ;;  %1669 = vmatpush.bf16.msrb.mxu1 %v2994_v63  ;;  %1682 = vmatpush.bf16.msrb.mxu2 %v3122_v0  ;;  %v2419_v48 = vld [vmem:[%s5532_s1 + $0xb0] sm:$0xf0] }
  0x40   :  { %v3105_v1 = vld [vmem:[%s5532_s1 + $0x600] sm:$0xf]  ;;  %v3713_v6 = vld [vmem:[%s5532_s1 + $0x70c] sm:$0xf0]  ;;  %v2978_v16 = vor.u32 %v3649_v62, %v2977_v61  ;;  %1695 = vmatpush.bf16.msrb.mxu3 %v3250_v4  ;;  %v3539_v49 = vld [vmem:[%s5532_s1 + $0x1a4] sm:$0xf]  ;;  %v2422_v56 = vor.u32 %v3507_v47, %v2419_v48 }
  0x41   :  { %v3233_v5 = vld [vmem:[%s5532_s1 + $0x700] sm:$0xf]  ;;  %v22_v7 = vld [vmem:[%s5533_s0 + $0x10] sm:$0xff]  ;;  %v3106_v17 = vor.u32 %v3681_v2, %v3105_v1  ;;  %1657 = vmatpush.bf16.msrb.mxu0 %v2850_v11  ;;  %v3571_v52 = vld [vmem:[%s5532_s1 + $0x2a4] sm:$0xf] }
  0x42   :  { %v298_v24 = vunpack.c.l.b16 %v22_v7  ;;  %v3234_v26 = vor.u32 %v3713_v6, %v3233_v5  ;;  %v299_v28 = vunpack.c.h.b16 %v22_v7  ;;  %v2547_v51 = vld [vmem:[%s5532_s1 + $0x1b0] sm:$0xf0]  ;;  %v3603_v54 = vld [vmem:[%s5532_s1 + $0x3a4] sm:$0xf] }
  0x43   :  { %1670 = vmatpush.bf16.msrb.mxu1 %v2978_v16  ;;  %1683 = vmatpush.bf16.msrb.mxu2 %v3106_v17  ;;  %v2675_v53 = vld [vmem:[%s5532_s1 + $0x2b0] sm:$0xf0]  ;;  %v2550_v57 = vor.u32 %v3539_v49, %v2547_v51  ;;  %v3503_v59 = vld [vmem:[%s5532_s1 + $0x84] sm:$0xf] }
  0x44   :  { %v4264_v41 = vpack.c.b16 %v298_v24, %v298_v24  ;;  %1696 = vmatpush.bf16.msrb.mxu3 %v3234_v26  ;;  %v4268_v44 = vpack.c.b16 %v299_v28, %v299_v28  ;;  %v2803_v55 = vld [vmem:[%s5532_s1 + $0x3b0] sm:$0xf0]  ;;  %v2678_v58 = vor.u32 %v3571_v52, %v2675_v53  ;;  %v3535_v61 = vld [vmem:[%s5532_s1 + $0x184] sm:$0xf] }
  0x45   :  { %1702 = vmatpush.bf16.msra.mxu0 %v2454_v27  ;;  %v2403_v60 = vld [vmem:[%s5532_s1 + $0x90] sm:$0xf0]  ;;  %v2806_v62 = vor.u32 %v3603_v54, %v2803_v55  ;;  %v3567_v0 = vld [vmem:[%s5532_s1 + $0x284] sm:$0xf] }
  0x46   :  { %1684 = vmatmul.bf16.vlgmr.msrb.gmra.mxu2 %v4256_v38  ;;  %1658 = vmatmul.bf16.vlgmr.msrb.gmra.mxu0 %v4264_v41  ;;  %v2531_v63 = vld [vmem:[%s5532_s1 + $0x190] sm:$0xf0]  ;;  %v3599_v2 = vld [vmem:[%s5532_s1 + $0x384] sm:$0xf]  ;;  %v2406_v4 = vor.u32 %v3503_v59, %v2403_v60 }
  0x47   :  { %1715 = vmatpush.bf16.msra.mxu1 %v2582_v29  ;;  %1728 = vmatpush.bf16.msra.mxu2 %v2710_v30  ;;  %v2659_v1 = vld [vmem:[%s5532_s1 + $0x290] sm:$0xf0]  ;;  %v2534_v5 = vor.u32 %v3535_v61, %v2531_v63  ;;  %v3499_v7 = vld [vmem:[%s5532_s1 + $0x64] sm:$0xf] }
  0x48   :  { %1741 = vmatpush.bf16.msra.mxu3 %v2838_v34  ;;  %1671 = vmatmul.bf16.vlgmr.msrb.gmra.mxu1 %v4268_v44  ;;  %v2787_v3 = vld [vmem:[%s5532_s1 + $0x390] sm:$0xf0]  ;;  %v2662_v6 = vor.u32 %v3567_v0, %v2659_v1  ;;  %v3531_v9 = vld [vmem:[%s5532_s1 + $0x164] sm:$0xf] }
  0x49   :  { %1697 = vmatmul.bf16.vlgmr.msrb.gmra.mxu3 %v4266_v42  ;;  %1703 = vmatpush.bf16.msra.mxu0 %v2438_v43  ;;  %v2387_v8 = vld [vmem:[%s5532_s1 + $0x70] sm:$0xf0]  ;;  %v2790_v10 = vor.u32 %v3599_v2, %v2787_v3  ;;  %v3563_v12 = vld [vmem:[%s5532_s1 + $0x264] sm:$0xf] }
  0x4a   :  { %v2515_v11 = vld [vmem:[%s5532_s1 + $0x170] sm:$0xf0]  ;;  %v3595_v14 = vld [vmem:[%s5532_s1 + $0x364] sm:$0xf]  ;;  %v2390_v16 = vor.u32 %v3499_v7, %v2387_v8 }
  0x4b   :  { %1716 = vmatpush.bf16.msra.mxu1 %v2566_v45  ;;  %1729 = vmatpush.bf16.msra.mxu2 %v2694_v46  ;;  %v2643_v13 = vld [vmem:[%s5532_s1 + $0x270] sm:$0xf0]  ;;  %v2518_v17 = vor.u32 %v3531_v9, %v2515_v11  ;;  %v3495_v23 = vld [vmem:[%s5532_s1 + $0x44] sm:$0xf] }
  0x4c   :  { %1742 = vmatpush.bf16.msra.mxu3 %v2822_v50  ;;  %v2771_v15 = vld [vmem:[%s5532_s1 + $0x370] sm:$0xf0]  ;;  %v2646_v21 = vor.u32 %v3563_v12, %v2643_v13  ;;  %v3527_v25 = vld [vmem:[%s5532_s1 + $0x144] sm:$0xf] }
  0x4d   :  { %1704 = vmatpush.bf16.msra.mxu0 %v2422_v56  ;;  %v2371_v24 = vld [vmem:[%s5532_s1 + $0x50] sm:$0xf0]  ;;  %v2774_v26 = vor.u32 %v3595_v14, %v2771_v15  ;;  %v3559_v28 = vld [vmem:[%s5532_s1 + $0x244] sm:$0xf] }
  0x4e   :  { %v2499_v27 = vld [vmem:[%s5532_s1 + $0x150] sm:$0xf0]  ;;  %v3591_v30 = vld [vmem:[%s5532_s1 + $0x344] sm:$0xf]  ;;  %v2374_v32 = vor.u32 %v3495_v23, %v2371_v24 }
  0x4f   :  { %1717 = vmatpush.bf16.msra.mxu1 %v2550_v57  ;;  %1730 = vmatpush.bf16.msra.mxu2 %v2678_v58  ;;  %v2627_v29 = vld [vmem:[%s5532_s1 + $0x250] sm:$0xf0]  ;;  %v2502_v33 = vor.u32 %v3527_v25, %v2499_v27  ;;  %v3491_v35 = vld [vmem:[%s5532_s1 + $0x24] sm:$0xf] }
  0x50   :  { %1743 = vmatpush.bf16.msra.mxu3 %v2806_v62  ;;  %v2755_v31 = vld [vmem:[%s5532_s1 + $0x350] sm:$0xf0]  ;;  %v2630_v34 = vor.u32 %v3559_v28, %v2627_v29  ;;  %v3523_v37 = vld [vmem:[%s5532_s1 + $0x124] sm:$0xf] }
  0x51   :  { %1705 = vmatpush.bf16.msra.mxu0 %v2406_v4  ;;  %v2355_v36 = vld [vmem:[%s5532_s1 + $0x30] sm:$0xf0]  ;;  %v2758_v39 = vor.u32 %v3591_v30, %v2755_v31  ;;  %v3555_v43 = vld [vmem:[%s5532_s1 + $0x224] sm:$0xf] }
  0x52   :  { %v2483_v40 = vld [vmem:[%s5532_s1 + $0x130] sm:$0xf0]  ;;  %v3587_v46 = vld [vmem:[%s5532_s1 + $0x324] sm:$0xf]  ;;  %v2358_v48 = vor.u32 %v3491_v35, %v2355_v36 }
  0x53   :  { %1718 = vmatpush.bf16.msra.mxu1 %v2534_v5  ;;  %1731 = vmatpush.bf16.msra.mxu2 %v2662_v6  ;;  %v2611_v45 = vld [vmem:[%s5532_s1 + $0x230] sm:$0xf0]  ;;  %v3487_v49 = vld [vmem:[%s5532_s1 + $0x4] sm:$0xf]  ;;  %v2486_v51 = vor.u32 %v3523_v37, %v2483_v40 }
  0x54   :  { %1744 = vmatpush.bf16.msra.mxu3 %v2790_v10  ;;  %v2739_v47 = vld [vmem:[%s5532_s1 + $0x330] sm:$0xf0]  ;;  %v2614_v52 = vor.u32 %v3555_v43, %v2611_v45  ;;  %v3519_v53 = vld [vmem:[%s5532_s1 + $0x104] sm:$0xf] }
  0x55   :  { %1706 = vmatpush.bf16.msra.mxu0 %v2390_v16  ;;  %v2339_v50 = vld [vmem:[%s5532_s1 + $0x10] sm:$0xf0]  ;;  %v3551_v55 = vld [vmem:[%s5532_s1 + $0x204] sm:$0xf]  ;;  %v2742_v56 = vor.u32 %v3587_v46, %v2739_v47 }
  0x56   :  { %v2467_v54 = vld [vmem:[%s5532_s1 + $0x110] sm:$0xf0]  ;;  %v3583_v58 = vld [vmem:[%s5532_s1 + $0x304] sm:$0xf]  ;;  %v2342_v63 = vor.u32 %v3487_v49, %v2339_v50 }
  0x57   :  { %1719 = vmatpush.bf16.msra.mxu1 %v2518_v17  ;;  %1732 = vmatpush.bf16.msra.mxu2 %v2646_v21  ;;  %v2595_v57 = vld [vmem:[%s5532_s1 + $0x210] sm:$0xf0]  ;;  %v3643_v60 = vld [vmem:[%s5532_s1 + $0x4e4] sm:$0xf]  ;;  %v2470_v3 = vor.u32 %v3519_v53, %v2467_v54 }
  0x58   :  { %1745 = vmatpush.bf16.msra.mxu3 %v2774_v26  ;;  %v2723_v59 = vld [vmem:[%s5532_s1 + $0x310] sm:$0xf0]  ;;  %v3675_v62 = vld [vmem:[%s5532_s1 + $0x5e4] sm:$0xf]  ;;  %v2598_v4 = vor.u32 %v3551_v55, %v2595_v57 }
  0x59   :  { %1707 = vmatpush.bf16.msra.mxu0 %v2374_v32  ;;  %v2963_v61 = vld [vmem:[%s5532_s1 + $0x4f0] sm:$0xf0]  ;;  %v3707_v1 = vld [vmem:[%s5532_s1 + $0x6e4] sm:$0xf]  ;;  %v2726_v7 = vor.u32 %v3583_v58, %v2723_v59 }
  0x5a   :  { %v3091_v0 = vld [vmem:[%s5532_s1 + $0x5f0] sm:$0xf0]  ;;  %v3739_v5 = vld [vmem:[%s5532_s1 + $0x7e4] sm:$0xf]  ;;  %v2966_v8 = vor.u32 %v3643_v60, %v2963_v61 }
  0x5b   :  { %1720 = vmatpush.bf16.msra.mxu1 %v2502_v33  ;;  %1733 = vmatpush.bf16.msra.mxu2 %v2630_v34  ;;  %v3219_v2 = vld [vmem:[%s5532_s1 + $0x6f0] sm:$0xf0]  ;;  %v3094_v9 = vor.u32 %v3675_v62, %v3091_v0  ;;  %v3639_v11 = vld [vmem:[%s5532_s1 + $0x4c4] sm:$0xf] }
  0x5c   :  { %1746 = vmatpush.bf16.msra.mxu3 %v2758_v39  ;;  %v3347_v6 = vld [vmem:[%s5532_s1 + $0x7f0] sm:$0xf0]  ;;  %v3222_v10 = vor.u32 %v3707_v1, %v3219_v2  ;;  %v3671_v13 = vld [vmem:[%s5532_s1 + $0x5c4] sm:$0xf] }
  0x5d   :  { %1708 = vmatpush.bf16.msra.mxu0 %v2358_v48  ;;  %v2947_v12 = vld [vmem:[%s5532_s1 + $0x4d0] sm:$0xf0]  ;;  %v3350_v14 = vor.u32 %v3739_v5, %v3347_v6  ;;  %v3703_v16 = vld [vmem:[%s5532_s1 + $0x6c4] sm:$0xf] }
  0x5e   :  { %v3075_v15 = vld [vmem:[%s5532_s1 + $0x5d0] sm:$0xf0]  ;;  %v3735_v21 = vld [vmem:[%s5532_s1 + $0x7c4] sm:$0xf]  ;;  %v2950_v24 = vor.u32 %v3639_v11, %v2947_v12 }
  0x5f   :  { %1721 = vmatpush.bf16.msra.mxu1 %v2486_v51  ;;  %1734 = vmatpush.bf16.msra.mxu2 %v2614_v52  ;;  %v3203_v17 = vld [vmem:[%s5532_s1 + $0x6d0] sm:$0xf0]  ;;  %v3078_v25 = vor.u32 %v3671_v13, %v3075_v15  ;;  %v3635_v27 = vld [vmem:[%s5532_s1 + $0x4a4] sm:$0xf] }
  0x60   :  { %1747 = vmatpush.bf16.msra.mxu3 %v2742_v56  ;;  %v3331_v23 = vld [vmem:[%s5532_s1 + $0x7d0] sm:$0xf0]  ;;  %v3206_v26 = vor.u32 %v3703_v16, %v3203_v17  ;;  %v3667_v29 = vld [vmem:[%s5532_s1 + $0x5a4] sm:$0xf] }
  0x61   :  { %1709 = vmatpush.bf16.msra.mxu0 %v2342_v63  ;;  %v2931_v28 = vld [vmem:[%s5532_s1 + $0x4b0] sm:$0xf0]  ;;  %v3334_v30 = vor.u32 %v3735_v21, %v3331_v23  ;;  %v3699_v32 = vld [vmem:[%s5532_s1 + $0x6a4] sm:$0xf] }
  0x62   :  { %v3059_v31 = vld [vmem:[%s5532_s1 + $0x5b0] sm:$0xf0]  ;;  %v3731_v34 = vld [vmem:[%s5532_s1 + $0x7a4] sm:$0xf]  ;;  %v2934_v36 = vor.u32 %v3635_v27, %v2931_v28 }
  0x63   :  { %1722 = vmatpush.bf16.msra.mxu1 %v2470_v3  ;;  %1735 = vmatpush.bf16.msra.mxu2 %v2598_v4  ;;  %v3187_v33 = vld [vmem:[%s5532_s1 + $0x6b0] sm:$0xf0]  ;;  %v3062_v37 = vor.u32 %v3667_v29, %v3059_v31  ;;  %v3631_v40 = vld [vmem:[%s5532_s1 + $0x484] sm:$0xf] }
  0x64   :  { %1748 = vmatpush.bf16.msra.mxu3 %v2726_v7  ;;  %v3315_v35 = vld [vmem:[%s5532_s1 + $0x7b0] sm:$0xf0]  ;;  %1710 = vmatmul.bf16.vlgmr.msra.gmra.mxu0 %v4102_v19  ;;  %v3190_v39 = vor.u32 %v3699_v32, %v3187_v33  ;;  %v3663_v45 = vld [vmem:[%s5532_s1 + $0x584] sm:$0xf] }
  0x65   :  { %1754 = vmatpush.bf16.msrb.mxu0 %v2966_v8  ;;  %v2915_v43 = vld [vmem:[%s5532_s1 + $0x490] sm:$0xf0]  ;;  %v3318_v46 = vor.u32 %v3731_v34, %v3315_v35  ;;  %v3695_v48 = vld [vmem:[%s5532_s1 + $0x684] sm:$0xf] }
  0x66   :  { %1736 = vmatmul.bf16.vlgmr.msra.gmra.mxu2 %v4100_v18  ;;  %1723 = vmatmul.bf16.vlgmr.msra.gmra.mxu1 %v4106_v22  ;;  %v3043_v47 = vld [vmem:[%s5532_s1 + $0x590] sm:$0xf0]  ;;  %v3727_v50 = vld [vmem:[%s5532_s1 + $0x784] sm:$0xf]  ;;  %v2918_v52 = vor.u32 %v3631_v40, %v2915_v43  ;;  %v2457_v43 = vld [vmem:[%s5532_s1 + $0xe8] sm:$0xf] }
  0x67   :  { %1767 = vmatpush.bf16.msrb.mxu1 %v3094_v9  ;;  %1780 = vmatpush.bf16.msrb.mxu2 %v3222_v10  ;;  %v3171_v49 = vld [vmem:[%s5532_s1 + $0x690] sm:$0xf0]  ;;  %v3046_v53 = vor.u32 %v3663_v45, %v3043_v47  ;;  %v3627_v55 = vld [vmem:[%s5532_s1 + $0x464] sm:$0xf]  ;;  %v3518_v45 = vld [vmem:[%s5532_s1 + $0xf4] sm:$0xf0] }
  0x68   :  { %1793 = vmatpush.bf16.msrb.mxu3 %v3350_v14  ;;  %v3299_v51 = vld [vmem:[%s5532_s1 + $0x790] sm:$0xf0]  ;;  %v3174_v54 = vor.u32 %v3695_v48, %v3171_v49  ;;  %v3659_v57 = vld [vmem:[%s5532_s1 + $0x564] sm:$0xf]  ;;  %v3550_v48 = vld [vmem:[%s5532_s1 + $0x1f4] sm:$0xf0] }
  0x69   :  { %1749 = vmatmul.bf16.vlgmr.msra.gmra.mxu3 %v4104_v20  ;;  %1755 = vmatpush.bf16.msrb.mxu0 %v2950_v24  ;;  %v2899_v56 = vld [vmem:[%s5532_s1 + $0x470] sm:$0xf0]  ;;  %v3302_v58 = vor.u32 %v3727_v50, %v3299_v51  ;;  %v3691_v60 = vld [vmem:[%s5532_s1 + $0x664] sm:$0xf]  ;;  %v2713_v49 = vld [vmem:[%s5532_s1 + $0x2e8] sm:$0xf] }
  0x6a   :  { %v3027_v59 = vld [vmem:[%s5532_s1 + $0x570] sm:$0xf0]  ;;  %v3723_v62 = vld [vmem:[%s5532_s1 + $0x764] sm:$0xf]  ;;  %v2902_v0 = vor.u32 %v3627_v55, %v2899_v56  ;;  %v3582_v50 = vld [vmem:[%s5532_s1 + $0x2f4] sm:$0xf0]  ;;  %v2458_v56 = vor.u32 %v3518_v45, %v2457_v43 }
  0x6b   :  { %1768 = vmatpush.bf16.msrb.mxu1 %v3078_v25  ;;  %1781 = vmatpush.bf16.msrb.mxu2 %v3206_v26  ;;  %v3155_v61 = vld [vmem:[%s5532_s1 + $0x670] sm:$0xf0]  ;;  %v3030_v1 = vor.u32 %v3659_v57, %v3027_v59  ;;  %v3623_v3 = vld [vmem:[%s5532_s1 + $0x444] sm:$0xf]  ;;  %v2441_v59 = vld [vmem:[%s5532_s1 + $0xc8] sm:$0xf] }
  0x6c   :  { %1794 = vmatpush.bf16.msrb.mxu3 %v3334_v30  ;;  %v3283_v63 = vld [vmem:[%s5532_s1 + $0x770] sm:$0xf0]  ;;  %v3158_v2 = vor.u32 %v3691_v60, %v3155_v61  ;;  %v3655_v5 = vld [vmem:[%s5532_s1 + $0x544] sm:$0xf]  ;;  %v3514_v60 = vld [vmem:[%s5532_s1 + $0xd4] sm:$0xf0] }
  0x6d   :  { %1756 = vmatpush.bf16.msrb.mxu0 %v2934_v36  ;;  %v2883_v4 = vld [vmem:[%s5532_s1 + $0x450] sm:$0xf0]  ;;  %v3286_v6 = vor.u32 %v3723_v62, %v3283_v63  ;;  %v3687_v8 = vld [vmem:[%s5532_s1 + $0x644] sm:$0xf]  ;;  %v2569_v61 = vld [vmem:[%s5532_s1 + $0x1c8] sm:$0xf] }
  0x6e   :  { %v3011_v7 = vld [vmem:[%s5532_s1 + $0x550] sm:$0xf0]  ;;  %v3719_v10 = vld [vmem:[%s5532_s1 + $0x744] sm:$0xf]  ;;  %v2886_v12 = vor.u32 %v3623_v3, %v2883_v4  ;;  %v3546_v63 = vld [vmem:[%s5532_s1 + $0x1d4] sm:$0xf0]  ;;  %v2442_v4 = vor.u32 %v3514_v60, %v2441_v59 }
  0x6f   :  { %1769 = vmatpush.bf16.msrb.mxu1 %v3062_v37  ;;  %1782 = vmatpush.bf16.msrb.mxu2 %v3190_v39  ;;  %v3139_v9 = vld [vmem:[%s5532_s1 + $0x650] sm:$0xf0]  ;;  %v3014_v13 = vor.u32 %v3655_v5, %v3011_v7  ;;  %v3619_v15 = vld [vmem:[%s5532_s1 + $0x424] sm:$0xf]  ;;  %v3610_v3 = vld [vmem:[%s5532_s1 + $0x3d4] sm:$0xf0]  ;;  %v2570_v5 = vor.u32 %v3546_v63, %v2569_v61 }
  0x70   :  { %1795 = vmatpush.bf16.msrb.mxu3 %v3318_v46  ;;  %v3267_v11 = vld [vmem:[%s5532_s1 + $0x750] sm:$0xf0]  ;;  %v3142_v14 = vor.u32 %v3687_v8, %v3139_v9  ;;  %v3651_v17 = vld [vmem:[%s5532_s1 + $0x524] sm:$0xf]  ;;  %v2585_v46 = vld [vmem:[%s5532_s1 + $0x1e8] sm:$0xf] }
  0x71   :  { %1757 = vmatpush.bf16.msrb.mxu0 %v2918_v52  ;;  %v2867_v16 = vld [vmem:[%s5532_s1 + $0x430] sm:$0xf0]  ;;  %v3270_v21 = vor.u32 %v3719_v10, %v3267_v11  ;;  %v3683_v24 = vld [vmem:[%s5532_s1 + $0x624] sm:$0xf]  ;;  %v2586_v57 = vor.u32 %v3550_v48, %v2585_v46  ;;  %v2425_v7 = vld [vmem:[%s5532_s1 + $0xa8] sm:$0xf] }
  0x72   :  { %v2995_v23 = vld [vmem:[%s5532_s1 + $0x530] sm:$0xf0]  ;;  %v3715_v26 = vld [vmem:[%s5532_s1 + $0x724] sm:$0xf]  ;;  %v2870_v28 = vor.u32 %v3619_v15, %v2867_v16  ;;  %v3510_v8 = vld [vmem:[%s5532_s1 + $0xb4] sm:$0xf0] }
  0x73   :  { %1770 = vmatpush.bf16.msrb.mxu1 %v3046_v53  ;;  %1783 = vmatpush.bf16.msrb.mxu2 %v3174_v54  ;;  %v3123_v25 = vld [vmem:[%s5532_s1 + $0x630] sm:$0xf0]  ;;  %v3615_v29 = vld [vmem:[%s5532_s1 + $0x404] sm:$0xf]  ;;  %v2998_v31 = vor.u32 %v3651_v17, %v2995_v23  ;;  %v2841_v53 = vld [vmem:[%s5532_s1 + $0x3e8] sm:$0xf]  ;;  %v2426_v16 = vor.u32 %v3510_v8, %v2425_v7 }
  0x74   :  { %1796 = vmatpush.bf16.msrb.mxu3 %v3302_v58  ;;  %v3251_v27 = vld [vmem:[%s5532_s1 + $0x730] sm:$0xf0]  ;;  %v3126_v32 = vor.u32 %v3683_v24, %v3123_v25  ;;  %v3647_v33 = vld [vmem:[%s5532_s1 + $0x504] sm:$0xf]  ;;  %v3614_v54 = vld [vmem:[%s5532_s1 + $0x3f4] sm:$0xf0]  ;;  %v2714_v58 = vor.u32 %v3582_v50, %v2713_v49 }
  0x75   :  { %1758 = vmatpush.bf16.msrb.mxu0 %v2902_v0  ;;  %v2851_v30 = vld [vmem:[%s5532_s1 + $0x410] sm:$0xf0]  ;;  %v3679_v35 = vld [vmem:[%s5532_s1 + $0x604] sm:$0xf]  ;;  %v3254_v36 = vor.u32 %v3715_v26, %v3251_v27  ;;  %v2842_v62 = vor.u32 %v3614_v54, %v2841_v53  ;;  %v2697_v0 = vld [vmem:[%s5532_s1 + $0x2c8] sm:$0xf] }
  0x76   :  { %v2979_v34 = vld [vmem:[%s5532_s1 + $0x510] sm:$0xf0]  ;;  %v3711_v39 = vld [vmem:[%s5532_s1 + $0x704] sm:$0xf]  ;;  %v2854_v47 = vor.u32 %v3615_v29, %v2851_v30  ;;  %v2553_v9 = vld [vmem:[%s5532_s1 + $0x1a8] sm:$0xf] }
  0x77   :  { %1771 = vmatpush.bf16.msrb.mxu1 %v3030_v1  ;;  %1784 = vmatpush.bf16.msrb.mxu2 %v3158_v2  ;;  %v3107_v37 = vld [vmem:[%s5532_s1 + $0x610] sm:$0xf0]  ;;  %v2982_v51 = vor.u32 %v3647_v33, %v2979_v34  ;;  %v3578_v1 = vld [vmem:[%s5532_s1 + $0x2d4] sm:$0xf0]  ;;  %v2825_v2 = vld [vmem:[%s5532_s1 + $0x3c8] sm:$0xf] }
  0x78   :  { %1797 = vmatpush.bf16.msrb.mxu3 %v3286_v6  ;;  %v3235_v40 = vld [vmem:[%s5532_s1 + $0x710] sm:$0xf0]  ;;  %v3110_v52 = vor.u32 %v3679_v35, %v3107_v37  ;;  %v2698_v6 = vor.u32 %v3578_v1, %v2697_v0  ;;  %v2826_v10 = vor.u32 %v3610_v3, %v2825_v2  ;;  %v3542_v11 = vld [vmem:[%s5532_s1 + $0x1b4] sm:$0xf0]  ;;  %v2409_v23 = vld [vmem:[%s5532_s1 + $0x88] sm:$0xf] }
  0x79   :  { %1759 = vmatpush.bf16.msrb.mxu0 %v2886_v12  ;;  %v3238_v55 = vor.u32 %v3711_v39, %v3235_v40  ;;  %v2681_v12 = vld [vmem:[%s5532_s1 + $0x2a8] sm:$0xf]  ;;  %v3606_v15 = vld [vmem:[%s5532_s1 + $0x3b4] sm:$0xf0]  ;;  %v2554_v17 = vor.u32 %v3542_v11, %v2553_v9 }
  0x7a   :  { %v3506_v24 = vld [vmem:[%s5532_s1 + $0x94] sm:$0xf0]  ;;  %v2537_v25 = vld [vmem:[%s5532_s1 + $0x188] sm:$0xf] }
  0x7b   :  { %1772 = vmatpush.bf16.msrb.mxu1 %v3014_v13  ;;  %1785 = vmatpush.bf16.msrb.mxu2 %v3142_v14  ;;  %v3574_v13 = vld [vmem:[%s5532_s1 + $0x2b4] sm:$0xf0]  ;;  %v2809_v14 = vld [vmem:[%s5532_s1 + $0x3a8] sm:$0xf] }
  0x7c   :  { %1798 = vmatpush.bf16.msrb.mxu3 %v3270_v21  ;;  %v2682_v21 = vor.u32 %v3574_v13, %v2681_v12  ;;  %v2810_v26 = vor.u32 %v3606_v15, %v2809_v14  ;;  %v3538_v27 = vld [vmem:[%s5532_s1 + $0x194] sm:$0xf0]  ;;  %v2793_v30 = vld [vmem:[%s5532_s1 + $0x388] sm:$0xf] }
  0x7d   :  { %1760 = vmatpush.bf16.msrb.mxu0 %v2870_v28  ;;  %v2665_v28 = vld [vmem:[%s5532_s1 + $0x288] sm:$0xf]  ;;  %v3570_v29 = vld [vmem:[%s5532_s1 + $0x294] sm:$0xf0]  ;;  %v2538_v33 = vor.u32 %v3538_v27, %v2537_v25 }
  0x7e   :  { %v2666_v34 = vor.u32 %v3570_v29, %v2665_v28  ;;  %v2393_v35 = vld [vmem:[%s5532_s1 + $0x68] sm:$0xf]  ;;  %v3534_v40 = vld [vmem:[%s5532_s1 + $0x174] sm:$0xf0] }
  0x7f   :  { %1773 = vmatpush.bf16.msrb.mxu1 %v2998_v31  ;;  %1786 = vmatpush.bf16.msrb.mxu2 %v3126_v32  ;;  %v3602_v31 = vld [vmem:[%s5532_s1 + $0x394] sm:$0xf0]  ;;  %v2410_v32 = vor.u32 %v3506_v24, %v2409_v23  ;;  %v2521_v37 = vld [vmem:[%s5532_s1 + $0x168] sm:$0xf] }
  0x80   :  { %1799 = vmatpush.bf16.msrb.mxu3 %v3254_v36  ;;  %v3502_v36 = vld [vmem:[%s5532_s1 + $0x74] sm:$0xf0]  ;;  %v2794_v39 = vor.u32 %v3602_v31, %v2793_v30  ;;  %v2649_v43 = vld [vmem:[%s5532_s1 + $0x268] sm:$0xf]  ;;  %v2522_v49 = vor.u32 %v3534_v40, %v2521_v37 }
  0x81   :  { %1761 = vmatpush.bf16.msrb.mxu0 %v2854_v47  ;;  %v3566_v45 = vld [vmem:[%s5532_s1 + $0x274] sm:$0xf0]  ;;  %v2777_v46 = vld [vmem:[%s5532_s1 + $0x368] sm:$0xf]  ;;  %v2394_v48 = vor.u32 %v3502_v36, %v2393_v35 }
  0x82   :  { %v3598_v47 = vld [vmem:[%s5532_s1 + $0x374] sm:$0xf0]  ;;  %v2650_v50 = vor.u32 %v3566_v45, %v2649_v43  ;;  %v2505_v53 = vld [vmem:[%s5532_s1 + $0x148] sm:$0xf] }
  0x83   :  { %1774 = vmatpush.bf16.msrb.mxu1 %v2982_v51  ;;  %1787 = vmatpush.bf16.msrb.mxu2 %v3110_v52  ;;  %v2377_v51 = vld [vmem:[%s5532_s1 + $0x48] sm:$0xf]  ;;  %v3498_v52 = vld [vmem:[%s5532_s1 + $0x54] sm:$0xf0]  ;;  %v2778_v54 = vor.u32 %v3598_v47, %v2777_v46 }
  0x84   :  { %1800 = vmatpush.bf16.msrb.mxu3 %v3238_v55  ;;  %1762 = vmatmul.bf16.vlgmr.msrb.gmra.mxu0 %v4264_v41  ;;  %v3530_v55 = vld [vmem:[%s5532_s1 + $0x154] sm:$0xf0]  ;;  %v2378_v60 = vor.u32 %v3498_v52, %v2377_v51  ;;  %v2361_v63 = vld [vmem:[%s5532_s1 + $0x28] sm:$0xf] }
  0x85   :  { %1806 = vmatpush.bf16.msra.mxu0 %v2458_v56  ;;  %v2633_v56 = vld [vmem:[%s5532_s1 + $0x248] sm:$0xf]  ;;  %v3594_v59 = vld [vmem:[%s5532_s1 + $0x354] sm:$0xf0]  ;;  %v2506_v61 = vor.u32 %v3530_v55, %v2505_v53 }
  0x86   :  { %1788 = vmatmul.bf16.vlgmr.msrb.gmra.mxu2 %v4256_v38  ;;  %1775 = vmatmul.bf16.vlgmr.msrb.gmra.mxu1 %v4268_v44  ;;  %v3494_v0 = vld [vmem:[%s5532_s1 + $0x34] sm:$0xf0]  ;;  %v2489_v1 = vld [vmem:[%s5532_s1 + $0x128] sm:$0xf] }
  0x87   :  { %1819 = vmatpush.bf16.msra.mxu1 %v2586_v57  ;;  %1832 = vmatpush.bf16.msra.mxu2 %v2714_v58  ;;  %v3562_v57 = vld [vmem:[%s5532_s1 + $0x254] sm:$0xf0]  ;;  %v2761_v58 = vld [vmem:[%s5532_s1 + $0x348] sm:$0xf]  ;;  %v2362_v8 = vor.u32 %v3494_v0, %v2361_v63 }
  0x88   :  { %1845 = vmatpush.bf16.msra.mxu3 %v2842_v62  ;;  %v2634_v62 = vor.u32 %v3562_v57, %v2633_v56  ;;  %v2762_v2 = vor.u32 %v3594_v59, %v2761_v58  ;;  %v3526_v3 = vld [vmem:[%s5532_s1 + $0x134] sm:$0xf0]  ;;  %v2345_v9 = vld [vmem:[%s5532_s1 + $0x8] sm:$0xf] }
  0x89   :  { %1801 = vmatmul.bf16.vlgmr.msrb.gmra.mxu3 %v4266_v42  ;;  %1807 = vmatpush.bf16.msra.mxu0 %v2442_v4  ;;  %v2617_v4 = vld [vmem:[%s5532_s1 + $0x228] sm:$0xf]  ;;  %v3590_v7 = vld [vmem:[%s5532_s1 + $0x334] sm:$0xf0]  ;;  %v2490_v11 = vor.u32 %v3526_v3, %v2489_v1 }
  0x8a   :  { %v2473_v13 = vld [vmem:[%s5532_s1 + $0x108] sm:$0xf]  ;;  %v3522_v14 = vld [vmem:[%s5532_s1 + $0x114] sm:$0xf0] }
  0x8b   :  { %1820 = vmatpush.bf16.msra.mxu1 %v2570_v5  ;;  %1833 = vmatpush.bf16.msra.mxu2 %v2698_v6  ;;  %v3558_v5 = vld [vmem:[%s5532_s1 + $0x234] sm:$0xf0]  ;;  %v2745_v6 = vld [vmem:[%s5532_s1 + $0x328] sm:$0xf]  ;;  %v2474_v31 = vor.u32 %v3522_v14, %v2473_v13 }
  0x8c   :  { %1846 = vmatpush.bf16.msra.mxu3 %v2826_v10  ;;  %v3490_v10 = vld [vmem:[%s5532_s1 + $0x14] sm:$0xf0]  ;;  %v2618_v12 = vor.u32 %v3558_v5, %v2617_v4  ;;  %v2601_v15 = vld [vmem:[%s5532_s1 + $0x208] sm:$0xf] }
  0x8d   :  { %1808 = vmatpush.bf16.msra.mxu0 %v2426_v16  ;;  %v2746_v16 = vor.u32 %v3590_v7, %v2745_v6  ;;  %v3586_v23 = vld [vmem:[%s5532_s1 + $0x314] sm:$0xf0]  ;;  %v2969_v24 = vld [vmem:[%s5532_s1 + $0x4e8] sm:$0xf]  ;;  %v2346_v27 = vor.u32 %v3490_v10, %v2345_v9 }
  0x8e   :  { %v3646_v25 = vld [vmem:[%s5532_s1 + $0x4f4] sm:$0xf0]  ;;  %v3225_v29 = vld [vmem:[%s5532_s1 + $0x6e8] sm:$0xf] }
  0x8f   :  { %1821 = vmatpush.bf16.msra.mxu1 %v2554_v17  ;;  %1834 = vmatpush.bf16.msra.mxu2 %v2682_v21  ;;  %v3554_v17 = vld [vmem:[%s5532_s1 + $0x214] sm:$0xf0]  ;;  %v2729_v21 = vld [vmem:[%s5532_s1 + $0x308] sm:$0xf]  ;;  %v2970_v36 = vor.u32 %v3646_v25, %v2969_v24 }
  0x90   :  { %1847 = vmatpush.bf16.msra.mxu3 %v2810_v26  ;;  %v3097_v26 = vld [vmem:[%s5532_s1 + $0x5e8] sm:$0xf]  ;;  %v3678_v28 = vld [vmem:[%s5532_s1 + $0x5f4] sm:$0xf0]  ;;  %v2730_v35 = vor.u32 %v3586_v23, %v2729_v21 }
  0x91   :  { %1809 = vmatpush.bf16.msra.mxu0 %v2410_v32  ;;  %v3710_v30 = vld [vmem:[%s5532_s1 + $0x6f4] sm:$0xf0]  ;;  %v2602_v32 = vor.u32 %v3554_v17, %v2601_v15  ;;  %v3098_v37 = vor.u32 %v3678_v28, %v3097_v26  ;;  %v2953_v40 = vld [vmem:[%s5532_s1 + $0x4c8] sm:$0xf]  ;;  %v4931_v26 = vld [vmem:[%s5534_s2] sm:$0xf] }
  0x92   :  { %v3642_v43 = vld [vmem:[%s5532_s1 + $0x4d4] sm:$0xf0]  ;;  %v3081_v45 = vld [vmem:[%s5532_s1 + $0x5c8] sm:$0xf] }
  0x93   :  { %1822 = vmatpush.bf16.msra.mxu1 %v2538_v33  ;;  %1835 = vmatpush.bf16.msra.mxu2 %v2666_v34  ;;  %v3353_v33 = vld [vmem:[%s5532_s1 + $0x7e8] sm:$0xf]  ;;  %v3742_v34 = vld [vmem:[%s5532_s1 + $0x7f4] sm:$0xf0]  ;;  %v2954_v52 = vor.u32 %v3642_v43, %v2953_v40 }
  0x94   :  { %1848 = vmatpush.bf16.msra.mxu3 %v2794_v39  ;;  %v3226_v39 = vor.u32 %v3710_v30, %v3225_v29  ;;  %v3354_v46 = vor.u32 %v3742_v34, %v3353_v33  ;;  %v3674_v47 = vld [vmem:[%s5532_s1 + $0x5d4] sm:$0xf0]  ;;  %v2937_v55 = vld [vmem:[%s5532_s1 + $0x4a8] sm:$0xf] }
  0x95   :  { %1810 = vmatpush.bf16.msra.mxu0 %v2394_v48  ;;  %v3209_v48 = vld [vmem:[%s5532_s1 + $0x6c8] sm:$0xf]  ;;  %v3738_v51 = vld [vmem:[%s5532_s1 + $0x7d4] sm:$0xf0]  ;;  %v3082_v53 = vor.u32 %v3674_v47, %v3081_v45 }
  0x96   :  { %v3638_v56 = vld [vmem:[%s5532_s1 + $0x4b4] sm:$0xf0]  ;;  %v3065_v57 = vld [vmem:[%s5532_s1 + $0x5a8] sm:$0xf] }
  0x97   :  { %1823 = vmatpush.bf16.msra.mxu1 %v2522_v49  ;;  %1836 = vmatpush.bf16.msra.mxu2 %v2650_v50  ;;  %v3706_v49 = vld [vmem:[%s5532_s1 + $0x6d4] sm:$0xf0]  ;;  %v3337_v50 = vld [vmem:[%s5532_s1 + $0x7c8] sm:$0xf]  ;;  %v2938_v0 = vor.u32 %v3638_v56, %v2937_v55 }
  0x98   :  { %1849 = vmatpush.bf16.msra.mxu3 %v2778_v54  ;;  %v3210_v54 = vor.u32 %v3706_v49, %v3209_v48  ;;  %v3338_v58 = vor.u32 %v3738_v51, %v3337_v50  ;;  %v3670_v59 = vld [vmem:[%s5532_s1 + $0x5b4] sm:$0xf0]  ;;  %v2921_v3 = vld [vmem:[%s5532_s1 + $0x488] sm:$0xf] }
  0x99   :  { %1811 = vmatpush.bf16.msra.mxu0 %v2378_v60  ;;  %v3193_v60 = vld [vmem:[%s5532_s1 + $0x6a8] sm:$0xf]  ;;  %v3734_v63 = vld [vmem:[%s5532_s1 + $0x7b4] sm:$0xf0]  ;;  %v3066_v1 = vor.u32 %v3670_v59, %v3065_v57 }
  0x9a   :  { %v3634_v4 = vld [vmem:[%s5532_s1 + $0x494] sm:$0xf0]  ;;  %v3049_v5 = vld [vmem:[%s5532_s1 + $0x588] sm:$0xf] }
  0x9b   :  { %1824 = vmatpush.bf16.msra.mxu1 %v2506_v61  ;;  %1837 = vmatpush.bf16.msra.mxu2 %v2634_v62  ;;  %v3702_v61 = vld [vmem:[%s5532_s1 + $0x6b4] sm:$0xf0]  ;;  %v3321_v62 = vld [vmem:[%s5532_s1 + $0x7a8] sm:$0xf] }
  0x9c   :  { %1850 = vmatpush.bf16.msra.mxu3 %v2762_v2  ;;  %v3194_v2 = vor.u32 %v3702_v61, %v3193_v60  ;;  %v3322_v6 = vor.u32 %v3734_v63, %v3321_v62  ;;  %v3666_v7 = vld [vmem:[%s5532_s1 + $0x594] sm:$0xf0]  ;;  %v3305_v10 = vld [vmem:[%s5532_s1 + $0x788] sm:$0xf] }
  0x9d   :  { %1812 = vmatpush.bf16.msra.mxu0 %v2362_v8  ;;  %v3177_v8 = vld [vmem:[%s5532_s1 + $0x688] sm:$0xf]  ;;  %v3698_v9 = vld [vmem:[%s5532_s1 + $0x694] sm:$0xf0]  ;;  %v3050_v14 = vor.u32 %v3666_v7, %v3049_v5 }
  0x9e   :  { %v2905_v13 = vld [vmem:[%s5532_s1 + $0x468] sm:$0xf]  ;;  %v3178_v15 = vor.u32 %v3698_v9, %v3177_v8  ;;  %v3662_v21 = vld [vmem:[%s5532_s1 + $0x574] sm:$0xf0] }
  0x9f   :  { %1825 = vmatpush.bf16.msra.mxu1 %v2490_v11  ;;  %1838 = vmatpush.bf16.msra.mxu2 %v2618_v12  ;;  %v3730_v11 = vld [vmem:[%s5532_s1 + $0x794] sm:$0xf0]  ;;  %v2922_v12 = vor.u32 %v3634_v4, %v2921_v3  ;;  %v3033_v17 = vld [vmem:[%s5532_s1 + $0x568] sm:$0xf] }
  0xa0   :  { %1851 = vmatpush.bf16.msra.mxu3 %v2746_v16  ;;  %v3630_v16 = vld [vmem:[%s5532_s1 + $0x474] sm:$0xf0]  ;;  %v3306_v23 = vor.u32 %v3730_v11, %v3305_v10  ;;  %v3161_v24 = vld [vmem:[%s5532_s1 + $0x668] sm:$0xf] }
  0xa1   :  { %1813 = vmatpush.bf16.msra.mxu0 %v2346_v27  ;;  %v3694_v25 = vld [vmem:[%s5532_s1 + $0x674] sm:$0xf0]  ;;  %v3289_v27 = vld [vmem:[%s5532_s1 + $0x768] sm:$0xf]  ;;  %v2906_v29 = vor.u32 %v3630_v16, %v2905_v13  ;;  %v3516_v13 = vld [vmem:[%s5532_s1 + $0xec] sm:$0xf] }
  0xa2   :  { %v3726_v28 = vld [vmem:[%s5532_s1 + $0x774] sm:$0xf0]  ;;  %v2889_v30 = vld [vmem:[%s5532_s1 + $0x448] sm:$0xf] }
  0xa3   :  { %1826 = vmatpush.bf16.msra.mxu1 %v2474_v31  ;;  %1839 = vmatpush.bf16.msra.mxu2 %v2602_v32  ;;  %v3034_v31 = vor.u32 %v3662_v21, %v3033_v17  ;;  %v3162_v32 = vor.u32 %v3694_v25, %v3161_v24  ;;  %v3626_v33 = vld [vmem:[%s5532_s1 + $0x454] sm:$0xf0]  ;;  %v3017_v34 = vld [vmem:[%s5532_s1 + $0x548] sm:$0xf]  ;;  %v2587_v17 = vld [vmem:[%s5532_s1 + $0x1f8] sm:$0xf0] }
  0xa4   :  { %1852 = vmatpush.bf16.msra.mxu3 %v2730_v35  ;;  %1814 = vmatmul.bf16.vlgmr.msra.gmra.mxu0 %v4102_v19  ;;  %v282_v35 = vperm.slane %v4931_v26, 0  ;;  %v3690_v40 = vld [vmem:[%s5532_s1 + $0x654] sm:$0xf0]  ;;  %v3273_v43 = vld [vmem:[%s5532_s1 + $0x748] sm:$0xf] }
  0xa5   :  { %1858 = vmatpush.bf16.msrb.mxu0 %v2970_v36  ;;  %v3290_v36 = vor.u32 %v3726_v28, %v3289_v27  ;;  %v3722_v45 = vld [vmem:[%s5532_s1 + $0x754] sm:$0xf0]  ;;  %v2873_v50 = vld [vmem:[%s5532_s1 + $0x428] sm:$0xf]  ;;  %v3580_v21 = vld [vmem:[%s5532_s1 + $0x2ec] sm:$0xf] }
  0xa6   :  { %1840 = vmatmul.bf16.vlgmr.msra.gmra.mxu2 %v4100_v18  ;;  %1827 = vmatmul.bf16.vlgmr.msra.gmra.mxu1 %v4106_v22  ;;  %v3622_v51 = vld [vmem:[%s5532_s1 + $0x434] sm:$0xf0]  ;;  %v3274_v55 = vor.u32 %v3722_v45, %v3273_v43  ;;  %v3129_v57 = vld [vmem:[%s5532_s1 + $0x628] sm:$0xf]  ;;  %v2571_v43 = vld [vmem:[%s5532_s1 + $0x1d8] sm:$0xf0] }
  0xa7   :  { %1871 = vmatpush.bf16.msrb.mxu1 %v3098_v37  ;;  %1884 = vmatpush.bf16.msrb.mxu2 %v3226_v39  ;;  %v3658_v37 = vld [vmem:[%s5532_s1 + $0x554] sm:$0xf0]  ;;  %v3145_v39 = vld [vmem:[%s5532_s1 + $0x648] sm:$0xf]  ;;  %v2874_v62 = vor.u32 %v3622_v51, %v2873_v50  ;;  %v3576_v45 = vld [vmem:[%s5532_s1 + $0x2cc] sm:$0xf] }
  0xa8   :  { %1897 = vmatpush.bf16.msrb.mxu3 %v3354_v46  ;;  %v2890_v46 = vor.u32 %v3626_v33, %v2889_v30  ;;  %v3018_v48 = vor.u32 %v3658_v37, %v3017_v34  ;;  %v3146_v49 = vor.u32 %v3690_v40, %v3145_v39  ;;  %v3654_v56 = vld [vmem:[%s5532_s1 + $0x534] sm:$0xf0]  ;;  %v3257_v59 = vld [vmem:[%s5532_s1 + $0x728] sm:$0xf]  ;;  %v2843_v30 = vld [vmem:[%s5532_s1 + $0x3f8] sm:$0xf0] }
  0xa9   :  { %1853 = vmatmul.bf16.vlgmr.msra.gmra.mxu3 %v4104_v20  ;;  %1859 = vmatpush.bf16.msrb.mxu0 %v2954_v52  ;;  %v3001_v52 = vld [vmem:[%s5532_s1 + $0x528] sm:$0xf]  ;;  %v3718_v60 = vld [vmem:[%s5532_s1 + $0x734] sm:$0xf0]  ;;  %v2443_v37 = vld [vmem:[%s5532_s1 + $0xd8] sm:$0xf0] }
  0xaa   :  { %v2857_v63 = vld [vmem:[%s5532_s1 + $0x408] sm:$0xf]  ;;  %v3650_v4 = vld [vmem:[%s5532_s1 + $0x514] sm:$0xf0]  ;;  %v3258_v7 = vor.u32 %v3718_v60, %v3257_v59  ;;  %v3544_v39 = vld [vmem:[%s5532_s1 + $0x1cc] sm:$0xf] }
  0xab   :  { %1872 = vmatpush.bf16.msrb.mxu1 %v3082_v53  ;;  %1885 = vmatpush.bf16.msrb.mxu2 %v3210_v54  ;;  %v2985_v3 = vld [vmem:[%s5532_s1 + $0x508] sm:$0xf]  ;;  %v3682_v8 = vld [vmem:[%s5532_s1 + $0x614] sm:$0xf0]  ;;  %v3572_v59 = vld [vmem:[%s5532_s1 + $0x2ac] sm:$0xf] }
  0xac   :  { %1898 = vmatpush.bf16.msrb.mxu3 %v3338_v58  ;;  %v3686_v58 = vld [vmem:[%s5532_s1 + $0x634] sm:$0xf0]  ;;  %v3113_v5 = vld [vmem:[%s5532_s1 + $0x608] sm:$0xf]  ;;  %v2986_v27 = vor.u32 %v3650_v4, %v2985_v3  ;;  %v2683_v60 = vld [vmem:[%s5532_s1 + $0x2b8] sm:$0xf0] }
  0xad   :  { %1860 = vmatpush.bf16.msrb.mxu0 %v2938_v0  ;;  %v3618_v0 = vld [vmem:[%s5532_s1 + $0x414] sm:$0xf0]  ;;  %v3241_v9 = vld [vmem:[%s5532_s1 + $0x708] sm:$0xf]  ;;  %v3114_v28 = vor.u32 %v3682_v8, %v3113_v5  ;;  %v2411_v3 = vld [vmem:[%s5532_s1 + $0x98] sm:$0xf0] }
  0xae   :  { %v3714_v10 = vld [vmem:[%s5532_s1 + $0x714] sm:$0xf0]  ;;  %v2858_v16 = vor.u32 %v3618_v0, %v2857_v63  ;;  %v3536_v4 = vld [vmem:[%s5532_s1 + $0x18c] sm:$0xf]  ;;  %v2667_v8 = vld [vmem:[%s5532_s1 + $0x298] sm:$0xf0] }
  0xaf   :  { %1873 = vmatpush.bf16.msrb.mxu1 %v3066_v1  ;;  %1886 = vmatpush.bf16.msrb.mxu2 %v3194_v2  ;;  %v1607_v47 = vpop.f32.mrf.mxu0  ;;  %v1620_v54 = vpop.f32.mrf.mxu1  ;;  %v3002_v1 = vor.u32 %v3654_v56, %v3001_v52  ;;  %v3130_v2 = vor.u32 %v3686_v58, %v3129_v57  ;;  %v2574_v52 = vor.u32 %v3544_v39, %v2571_v43  ;;  %v3540_v56 = vld [vmem:[%s5532_s1 + $0x1ac] sm:$0xf]  ;;  %v2555_v58 = vld [vmem:[%s5532_s1 + $0x1b8] sm:$0xf0] }
  0xb0   :  { %1899 = vmatpush.bf16.msrb.mxu3 %v3322_v6  ;;  %v1608_v53 = vadd.f32 %v1607_v47, %v282_v35  ;;  %v1633_v6 = vpop.f32.mrf.mxu2  ;;  %v3608_v47 = vld [vmem:[%s5532_s1 + $0x3cc] sm:$0xf]  ;;  %v2558_v0 = vor.u32 %v3540_v56, %v2555_v58  ;;  %v2507_v43 = vld [vmem:[%s5532_s1 + $0x158] sm:$0xf0] }
  0xb1   :  { %1861 = vmatpush.bf16.msrb.mxu0 %v2922_v12  ;;  %v1646_v12 = vpop.f32.mrf.mxu3  ;;  %v3492_v56 = vld [vmem:[%s5532_s1 + $0x2c] sm:$0xf] }
  0xb2   :  { %v1621_v61 = vadd.f32 %v1620_v54, %v1608_v53  ;;  %v3508_v54 = vld [vmem:[%s5532_s1 + $0xac] sm:$0xf] }
  0xb3   :  { %1874 = vmatpush.bf16.msrb.mxu1 %v3050_v14  ;;  %1887 = vmatpush.bf16.msrb.mxu2 %v3178_v15  ;;  %v2459_v14 = vld [vmem:[%s5532_s1 + $0xf8] sm:$0xf0]  ;;  %v3548_v15 = vld [vmem:[%s5532_s1 + $0x1ec] sm:$0xf] }
  0xb4   :  { %1900 = vmatpush.bf16.msrb.mxu3 %v3306_v23  ;;  %v1634_v11 = vadd.f32 %v1633_v6, %v1621_v61  ;;  %v2715_v23 = vld [vmem:[%s5532_s1 + $0x2f8] sm:$0xf0]  ;;  %v2462_v33 = vor.u32 %v3516_v13, %v2459_v14  ;;  %v2590_v34 = vor.u32 %v3548_v15, %v2587_v17  ;;  %v3604_v61 = vld [vmem:[%s5532_s1 + $0x3ac] sm:$0xf] }
  0xb5   :  { %1862 = vmatpush.bf16.msrb.mxu0 %v2906_v29  ;;  %v3612_v29 = vld [vmem:[%s5532_s1 + $0x3ec] sm:$0xf]  ;;  %v2718_v35 = vor.u32 %v3580_v21, %v2715_v23  ;;  %v2539_v6 = vld [vmem:[%s5532_s1 + $0x198] sm:$0xf0] }
  0xb6   :  { %v5030_v24 = vadd.f32 %v1646_v12, %v1634_v11  ;;  %v2846_v40 = vor.u32 %v3612_v29, %v2843_v30  ;;  %v2542_v13 = vor.u32 %v3536_v4, %v2539_v6  ;;  %v3500_v15 = vld [vmem:[%s5532_s1 + $0x6c] sm:$0xf]  ;;  %v2651_v29 = vld [vmem:[%s5532_s1 + $0x278] sm:$0xf0] }
  0xb7   :  { %1875 = vmatpush.bf16.msrb.mxu1 %v3034_v31  ;;  %1888 = vmatpush.bf16.msrb.mxu2 %v3162_v32  ;;  %v1609_v25 = vpop.f32.mrf.mxu0  ;;  %v1622_v31 = vpop.f32.mrf.mxu1  ;;  %v3242_v32 = vor.u32 %v3714_v10, %v3241_v9  ;;  %v3600_v9 = vld [vmem:[%s5532_s1 + $0x38c] sm:$0xf]  ;;  %v2795_v10 = vld [vmem:[%s5532_s1 + $0x398] sm:$0xf0] }
  0xb8   :  { %1901 = vmatpush.bf16.msrb.mxu3 %v3290_v36  ;;  %v3512_v36 = vld [vmem:[%s5532_s1 + $0xcc] sm:$0xf]  ;;  %v2798_v25 = vor.u32 %v3600_v9, %v2795_v10  ;;  %v2347_v4 = vld [vmem:[%s5532_s1 + $0x18] sm:$0xf0] }
  0xb9   :  { %1863 = vmatpush.bf16.msrb.mxu0 %v2890_v46  ;;  %v2699_v46 = vld [vmem:[%s5532_s1 + $0x2d8] sm:$0xf0]  ;;  %v2446_v50 = vor.u32 %v3512_v36, %v2443_v37  ;;  %v1648_v51 = vpop.f32.mrf.mxu3  ;;  %v3532_v17 = vld [vmem:[%s5532_s1 + $0x16c] sm:$0xf] }
  0xba   :  { %v2702_v53 = vor.u32 %v3576_v45, %v2699_v46  ;;  %v3596_v30 = vld [vmem:[%s5532_s1 + $0x36c] sm:$0xf]  ;;  %v2379_v36 = vld [vmem:[%s5532_s1 + $0x58] sm:$0xf0] }
  0xbb   :  { %1876 = vmatpush.bf16.msrb.mxu1 %v3018_v48  ;;  %1889 = vmatpush.bf16.msrb.mxu2 %v3146_v49  ;;  %v2827_v48 = vld [vmem:[%s5532_s1 + $0x3d8] sm:$0xf0]  ;;  %v1635_v49 = vpop.f32.mrf.mxu2  ;;  %v3528_v37 = vld [vmem:[%s5532_s1 + $0x14c] sm:$0xf] }
  0xbc   :  { %1902 = vmatpush.bf16.msrb.mxu3 %v3274_v55  ;;  %v2427_v55 = vld [vmem:[%s5532_s1 + $0xb8] sm:$0xf0]  ;;  %v2830_v57 = vor.u32 %v3608_v47, %v2827_v48  ;;  %v3560_v45 = vld [vmem:[%s5532_s1 + $0x24c] sm:$0xf] }
  0xbd   :  { %1864 = vmatpush.bf16.msrb.mxu0 %v2874_v62  ;;  %v2811_v62 = vld [vmem:[%s5532_s1 + $0x3b8] sm:$0xf0]  ;;  %v2430_v63 = vor.u32 %v3508_v54, %v2427_v55  ;;  %v3592_v49 = vld [vmem:[%s5532_s1 + $0x34c] sm:$0xf]  ;;  %v2510_v54 = vor.u32 %v3528_v37, %v2507_v43 }
  0xbe   :  { %v2814_v5 = vor.u32 %v3604_v61, %v2811_v62  ;;  %v2635_v46 = vld [vmem:[%s5532_s1 + $0x258] sm:$0xf0]  ;;  %v3524_v58 = vld [vmem:[%s5532_s1 + $0x12c] sm:$0xf] }
  0xbf   :  { %1877 = vmatpush.bf16.msrb.mxu1 %v3002_v1  ;;  %1890 = vmatpush.bf16.msrb.mxu2 %v3130_v2  ;;  %v2686_v1 = vor.u32 %v3572_v59, %v2683_v60  ;;  %v3504_v2 = vld [vmem:[%s5532_s1 + $0x8c] sm:$0xf]  ;;  %v2638_v55 = vor.u32 %v3560_v45, %v2635_v46  ;;  %v2491_v61 = vld [vmem:[%s5532_s1 + $0x138] sm:$0xf0] }
  0xc0   :  { %1903 = vmatpush.bf16.msrb.mxu3 %v3258_v7  ;;  %v3568_v7 = vld [vmem:[%s5532_s1 + $0x28c] sm:$0xf]  ;;  %v2414_v11 = vor.u32 %v3504_v2, %v2411_v3  ;;  %v2955_v37 = vld [vmem:[%s5532_s1 + $0x4d8] sm:$0xf0] }
  0xc1   :  { %1865 = vmatpush.bf16.msrb.mxu0 %v2858_v16  ;;  %v2670_v14 = vor.u32 %v3568_v7, %v2667_v8  ;;  %v2395_v16 = vld [vmem:[%s5532_s1 + $0x78] sm:$0xf0]  ;;  %v3556_v62 = vld [vmem:[%s5532_s1 + $0x22c] sm:$0xf] }
  0xc2   :  { %v3488_v3 = vld [vmem:[%s5532_s1 + $0xc] sm:$0xf]  ;;  %v2475_v8 = vld [vmem:[%s5532_s1 + $0x118] sm:$0xf0] }
  0xc3   :  { %1878 = vmatpush.bf16.msrb.mxu1 %v2986_v27  ;;  %1891 = vmatpush.bf16.msrb.mxu2 %v3114_v28  ;;  %v1659_v12 = vpop.f32.mrf.mxu0  ;;  %v2523_v27 = vld [vmem:[%s5532_s1 + $0x178] sm:$0xf0]  ;;  %v3564_v28 = vld [vmem:[%s5532_s1 + $0x26c] sm:$0xf] }
  0xc4   :  { %1904 = vmatpush.bf16.msrb.mxu3 %v3242_v32  ;;  %1866 = vmatmul.bf16.vlgmr.msrb.gmra.mxu0 %v4264_v41  ;;  %v1660_v21 = vadd.f32 %v1659_v12, %v5030_v24  ;;  %v2779_v24 = vld [vmem:[%s5532_s1 + $0x378] sm:$0xf0]  ;;  %v2398_v32 = vor.u32 %v3500_v15, %v2395_v16  ;;  %v3520_v7 = vld [vmem:[%s5532_s1 + $0x10c] sm:$0xf] }
  0xc5   :  { %1910 = vmatpush.bf16.msra.mxu0 %v2462_v33  ;;  %v1672_v23 = vpop.f32.mrf.mxu1  ;;  %v2526_v33 = vor.u32 %v3532_v17, %v2523_v27  ;;  %v3552_v9 = vld [vmem:[%s5532_s1 + $0x20c] sm:$0xf]  ;;  %v2603_v12 = vld [vmem:[%s5532_s1 + $0x218] sm:$0xf0] }
  0xc6   :  { %1892 = vmatmul.bf16.vlgmr.msrb.gmra.mxu2 %v4256_v38  ;;  %1879 = vmatmul.bf16.vlgmr.msrb.gmra.mxu1 %v4268_v44  ;;  %v1673_v31 = vadd.f32 %v1672_v23, %v1660_v21  ;;  %v3644_v16 = vld [vmem:[%s5532_s1 + $0x4ec] sm:$0xf]  ;;  %v2971_v17 = vld [vmem:[%s5532_s1 + $0x4f8] sm:$0xf0]  ;;  %v2350_v23 = vor.u32 %v3488_v3, %v2347_v4 }
  0xc7   :  { %1923 = vmatpush.bf16.msra.mxu1 %v2590_v34  ;;  %1936 = vmatpush.bf16.msra.mxu2 %v2718_v35  ;;  %v2654_v34 = vor.u32 %v3564_v28, %v2651_v29  ;;  %v3496_v35 = vld [vmem:[%s5532_s1 + $0x4c] sm:$0xf]  ;;  %v3227_v28 = vld [vmem:[%s5532_s1 + $0x6f8] sm:$0xf0]  ;;  %v2478_v29 = vor.u32 %v3520_v7, %v2475_v8 }
  0xc8   :  { %1949 = vmatpush.bf16.msra.mxu3 %v2846_v40  ;;  %v2782_v40 = vor.u32 %v3596_v30, %v2779_v24  ;;  %v2382_v51 = vor.u32 %v3496_v35, %v2379_v36  ;;  %v3676_v21 = vld [vmem:[%s5532_s1 + $0x5ec] sm:$0xf]  ;;  %v2606_v30 = vor.u32 %v3552_v9, %v2603_v12  ;;  %v3083_v43 = vld [vmem:[%s5532_s1 + $0x5d8] sm:$0xf0] }
  0xc9   :  { %1905 = vmatmul.bf16.vlgmr.msrb.gmra.mxu3 %v4266_v42  ;;  %1911 = vmatpush.bf16.msra.mxu0 %v2446_v50  ;;  %v1685_v39 = vpop.f32.mrf.mxu2  ;;  %v2763_v50 = vld [vmem:[%s5532_s1 + $0x358] sm:$0xf0]  ;;  %v3708_v27 = vld [vmem:[%s5532_s1 + $0x6ec] sm:$0xf] }
  0xca   :  { %v1686_v47 = vadd.f32 %v1685_v39, %v1673_v31  ;;  %v2766_v60 = vor.u32 %v3592_v49, %v2763_v50  ;;  %v3740_v24 = vld [vmem:[%s5532_s1 + $0x7ec] sm:$0xf]  ;;  %v3355_v31 = vld [vmem:[%s5532_s1 + $0x7f8] sm:$0xf0]  ;;  %v3230_v35 = vor.u32 %v3708_v27, %v3227_v28 }
  0xcb   :  { %1924 = vmatpush.bf16.msra.mxu1 %v2574_v52  ;;  %1937 = vmatpush.bf16.msra.mxu2 %v2702_v53  ;;  %v1661_v53 = vpop.f32.mrf.mxu0  ;;  %v3640_v36 = vld [vmem:[%s5532_s1 + $0x4cc] sm:$0xf]  ;;  %v3211_v46 = vld [vmem:[%s5532_s1 + $0x6d8] sm:$0xf0] }
  0xcc   :  { %1950 = vmatpush.bf16.msra.mxu3 %v2830_v57  ;;  %v1698_v48 = vpop.f32.mrf.mxu3  ;;  %v2363_v57 = vld [vmem:[%s5532_s1 + $0x38] sm:$0xf0]  ;;  %v3672_v39 = vld [vmem:[%s5532_s1 + $0x5cc] sm:$0xf]  ;;  %v2958_v49 = vor.u32 %v3640_v36, %v2955_v37 }
  0xcd   :  { %1912 = vmatpush.bf16.msra.mxu0 %v2430_v63  ;;  %v5163_v52 = vadd.f32 %v1698_v48, %v1686_v47  ;;  %v1674_v59 = vpop.f32.mrf.mxu1  ;;  %v2619_v63 = vld [vmem:[%s5532_s1 + $0x238] sm:$0xf0]  ;;  %v2366_v2 = vor.u32 %v3492_v56, %v2363_v57  ;;  %v3704_v45 = vld [vmem:[%s5532_s1 + $0x6cc] sm:$0xf]  ;;  %v3086_v50 = vor.u32 %v3672_v39, %v3083_v43 }
  0xce   :  { %v2622_v6 = vor.u32 %v3556_v62, %v2619_v63  ;;  %v3736_v47 = vld [vmem:[%s5532_s1 + $0x7cc] sm:$0xf]  ;;  %v3339_v48 = vld [vmem:[%s5532_s1 + $0x7d8] sm:$0xf0] }
  0xcf   :  { %1925 = vmatpush.bf16.msra.mxu1 %v2558_v0  ;;  %1938 = vmatpush.bf16.msra.mxu2 %v2686_v1  ;;  %v3588_v0 = vld [vmem:[%s5532_s1 + $0x32c] sm:$0xf]  ;;  %v2747_v1 = vld [vmem:[%s5532_s1 + $0x338] sm:$0xf0]  ;;  %v3342_v56 = vor.u32 %v3736_v47, %v3339_v48 }
  0xd0   :  { %1951 = vmatpush.bf16.msra.mxu3 %v2814_v5  ;;  %v2494_v5 = vor.u32 %v3524_v58, %v2491_v61  ;;  %v3636_v53 = vld [vmem:[%s5532_s1 + $0x4ac] sm:$0xf]  ;;  %v3067_v57 = vld [vmem:[%s5532_s1 + $0x5b8] sm:$0xf0] }
  0xd1   :  { %1913 = vmatpush.bf16.msra.mxu0 %v2414_v11  ;;  %v1687_v10 = vpop.f32.mrf.mxu2  ;;  %v2750_v11 = vor.u32 %v3588_v0, %v2747_v1  ;;  %v3700_v58 = vld [vmem:[%s5532_s1 + $0x6ac] sm:$0xf]  ;;  %v3195_v59 = vld [vmem:[%s5532_s1 + $0x6b8] sm:$0xf0] }
  0xd2   :  { %v3198_v63 = vor.u32 %v3700_v58, %v3195_v59  ;;  %v3632_v0 = vld [vmem:[%s5532_s1 + $0x48c] sm:$0xf]  ;;  %v2923_v1 = vld [vmem:[%s5532_s1 + $0x498] sm:$0xf0] }
  0xd3   :  { %1926 = vmatpush.bf16.msra.mxu1 %v2542_v13  ;;  %1939 = vmatpush.bf16.msra.mxu2 %v2670_v14  ;;  %v3584_v13 = vld [vmem:[%s5532_s1 + $0x30c] sm:$0xf]  ;;  %v2731_v14 = vld [vmem:[%s5532_s1 + $0x318] sm:$0xf0] }
  0xd4   :  { %1952 = vmatpush.bf16.msra.mxu3 %v2798_v25  ;;  %v1700_v15 = vpop.f32.mrf.mxu3  ;;  %v3099_v25 = vld [vmem:[%s5532_s1 + $0x5f8] sm:$0xf0]  ;;  %v3728_v4 = vld [vmem:[%s5532_s1 + $0x78c] sm:$0xf] }
  0xd5   :  { %1914 = vmatpush.bf16.msra.mxu0 %v2398_v32  ;;  %v2734_v32 = vor.u32 %v3584_v13, %v2731_v14  ;;  %v3179_v3 = vld [vmem:[%s5532_s1 + $0x698] sm:$0xf0]  ;;  %v3628_v10 = vld [vmem:[%s5532_s1 + $0x46c] sm:$0xf] }
  0xd6   :  { %v3660_v12 = vld [vmem:[%s5532_s1 + $0x56c] sm:$0xf]  ;;  %v3035_v15 = vld [vmem:[%s5532_s1 + $0x578] sm:$0xf0] }
  0xd7   :  { %1927 = vmatpush.bf16.msra.mxu1 %v2526_v33  ;;  %1940 = vmatpush.bf16.msra.mxu2 %v2654_v34  ;;  %v2974_v33 = vor.u32 %v3644_v16, %v2971_v17  ;;  %v3102_v34 = vor.u32 %v3676_v21, %v3099_v25  ;;  %v3692_v16 = vld [vmem:[%s5532_s1 + $0x66c] sm:$0xf]  ;;  %v3163_v17 = vld [vmem:[%s5532_s1 + $0x678] sm:$0xf0]  ;;  %v3038_v27 = vor.u32 %v3660_v12, %v3035_v15 }
  0xd8   :  { %1953 = vmatpush.bf16.msra.mxu3 %v2782_v40  ;;  %v3358_v40 = vor.u32 %v3740_v24, %v3355_v31  ;;  %v3724_v21 = vld [vmem:[%s5532_s1 + $0x76c] sm:$0xf]  ;;  %v3166_v28 = vor.u32 %v3692_v16, %v3163_v17  ;;  %v3275_v39 = vld [vmem:[%s5532_s1 + $0x758] sm:$0xf0] }
  0xd9   :  { %1915 = vmatpush.bf16.msra.mxu0 %v2382_v51  ;;  %v3214_v51 = vor.u32 %v3704_v45, %v3211_v46  ;;  %v3656_v24 = vld [vmem:[%s5532_s1 + $0x54c] sm:$0xf]  ;;  %v2875_v48 = vld [vmem:[%s5532_s1 + $0x438] sm:$0xf0] }
  0xda   :  { %v3720_v37 = vld [vmem:[%s5532_s1 + $0x74c] sm:$0xf]  ;;  %v3758_v12 = vld [vmem:[%s5535_s3 + $0x78] sm:$0xff] }
  0xdb   :  { %1928 = vmatpush.bf16.msra.mxu1 %v2510_v54  ;;  %1941 = vmatpush.bf16.msra.mxu2 %v2638_v55  ;;  %v2939_v54 = vld [vmem:[%s5532_s1 + $0x4b8] sm:$0xf0]  ;;  %v3668_v55 = vld [vmem:[%s5532_s1 + $0x5ac] sm:$0xf] }
  0xdc   :  { %1954 = vmatpush.bf16.msra.mxu3 %v2766_v60  ;;  %v3732_v60 = vld [vmem:[%s5532_s1 + $0x7ac] sm:$0xf]  ;;  %v2942_v61 = vor.u32 %v3636_v53, %v2939_v54  ;;  %v3070_v62 = vor.u32 %v3668_v55, %v3067_v57  ;;  %v3003_v53 = vld [vmem:[%s5532_s1 + $0x538] sm:$0xf0] }
  0xdd   :  { %1916 = vmatpush.bf16.msra.mxu0 %v2366_v2  ;;  %v3696_v2 = vld [vmem:[%s5532_s1 + $0x68c] sm:$0xf]  ;;  %v3131_v55 = vld [vmem:[%s5532_s1 + $0x638] sm:$0xf0] }
  0xde   :  { %v3182_v9 = vor.u32 %v3696_v2, %v3179_v3  ;;  %v3620_v47 = vld [vmem:[%s5532_s1 + $0x42c] sm:$0xf]  ;;  %v3259_v57 = vld [vmem:[%s5532_s1 + $0x738] sm:$0xf0] }
  0xdf   :  { %1929 = vmatpush.bf16.msra.mxu1 %v2494_v5  ;;  %1942 = vmatpush.bf16.msra.mxu2 %v2622_v6  ;;  %v3307_v5 = vld [vmem:[%s5532_s1 + $0x798] sm:$0xf0]  ;;  %v2926_v6 = vor.u32 %v3632_v0, %v2923_v1  ;;  %v3684_v54 = vld [vmem:[%s5532_s1 + $0x62c] sm:$0xf]  ;;  %v2878_v58 = vor.u32 %v3620_v47, %v2875_v48 }
  0xe0   :  { %1955 = vmatpush.bf16.msra.mxu3 %v2750_v11  ;;  %v2907_v11 = vld [vmem:[%s5532_s1 + $0x478] sm:$0xf0]  ;;  %v3310_v14 = vor.u32 %v3728_v4, %v3307_v5  ;;  %v3616_v59 = vld [vmem:[%s5532_s1 + $0x40c] sm:$0xf] }
  0xe1   :  { %1917 = vmatpush.bf16.msra.mxu0 %v2350_v23  ;;  %v5313_v7 = vpop.f32.mrf.mxu0  ;;  %v3291_v23 = vld [vmem:[%s5532_s1 + $0x778] sm:$0xf0]  ;;  %v2910_v25 = vor.u32 %v3628_v10, %v2907_v11  ;;  %v3712_v3 = vld [vmem:[%s5532_s1 + $0x70c] sm:$0xf] }
  0xe2   :  { %v3243_v4 = vld [vmem:[%s5532_s1 + $0x718] sm:$0xf0]  ;;  %v3748_v17 = vld [vmem:[%s5535_s3 + $0x28] sm:$0xff] }
  0xe3   :  { %1930 = vmatpush.bf16.msra.mxu1 %v2478_v29  ;;  %1943 = vmatpush.bf16.msra.mxu2 %v2606_v30  ;;  %v5324_v13 = vpop.f32.mrf.mxu1  ;;  %v3624_v29 = vld [vmem:[%s5532_s1 + $0x44c] sm:$0xf]  ;;  %v2891_v30 = vld [vmem:[%s5532_s1 + $0x458] sm:$0xf0] }
  0xe4   :  { %1956 = vmatpush.bf16.msra.mxu3 %v2734_v32  ;;  %1918 = vmatmul.bf16.vlgmr.msra.gmra.mxu0 %v4102_v19  ;;  %v3664_v19 = vld [vmem:[%s5532_s1 + $0x58c] sm:$0xf]  ;;  %v3294_v32 = vor.u32 %v3724_v21, %v3291_v23  ;;  %v3750_v10 = vld [vmem:[%s5535_s3 + $0x38] sm:$0xff]  ;;  %v3755_v23 = vld [vmem:[%s5535_s3 + $0x60] sm:$0xff] }
  0xe5   :  { %1962 = vmatpush.bf16.msrb.mxu0 %v2974_v33  ;;  %v3019_v33 = vld [vmem:[%s5532_s1 + $0x558] sm:$0xf0] }
  0xe6   :  { %1944 = vmatmul.bf16.vlgmr.msra.gmra.mxu2 %v4100_v18  ;;  %v3323_v18 = vld [vmem:[%s5532_s1 + $0x7b8] sm:$0xf0]  ;;  %1931 = vmatmul.bf16.vlgmr.msra.gmra.mxu1 %v4106_v22  ;;  %v3022_v45 = vor.u32 %v3656_v24, %v3019_v33  ;;  %v3745_v33 = vld [vmem:[%s5535_s3 + $0x10] sm:$0xff] }
  0xe7   :  { %1975 = vmatpush.bf16.msrb.mxu1 %v3102_v34  ;;  %1988 = vmatpush.bf16.msrb.mxu2 %v3230_v35  ;;  %v3051_v22 = vld [vmem:[%s5532_s1 + $0x598] sm:$0xf0]  ;;  %v3688_v34 = vld [vmem:[%s5532_s1 + $0x64c] sm:$0xf] }
  0xe8   :  { %2001 = vmatpush.bf16.msrb.mxu3 %v3358_v40  ;;  %v3054_v8 = vor.u32 %v3664_v19, %v3051_v22  ;;  %v3147_v35 = vld [vmem:[%s5532_s1 + $0x658] sm:$0xf0]  ;;  %v2894_v40 = vor.u32 %v3624_v29, %v2891_v30  ;;  %v3680_v19 = vld [vmem:[%s5532_s1 + $0x60c] sm:$0xf]  ;;  %v283_v22 = vperm.slane %v4931_v26, 1 }
  0xe9   :  { %1957 = vmatmul.bf16.vlgmr.msra.gmra.mxu3 %v4104_v20  ;;  %1963 = vmatpush.bf16.msrb.mxu0 %v2958_v49  ;;  %v3326_v20 = vor.u32 %v3732_v60, %v3323_v18  ;;  %v5350_v31 = vpop.f32.mrf.mxu2  ;;  %v1713_v43 = vpop.f32.mrf.mxu0  ;;  %v3150_v46 = vor.u32 %v3688_v34, %v3147_v35  ;;  %v3652_v49 = vld [vmem:[%s5532_s1 + $0x52c] sm:$0xf]  ;;  %v3134_v18 = vor.u32 %v3684_v54, %v3131_v55  ;;  %v3766_v16 = vld [vmem:[%s5535_s3 + $0xb8] sm:$0xff]  ;;  %v3761_v54 = vld [vmem:[%s5535_s3 + $0x90] sm:$0xff] }
  0xea   :  { %v3006_v60 = vor.u32 %v3652_v49, %v3003_v53  ;;  %v1712_v11 = vadd.f32 %v5313_v7, %v283_v22  ;;  %v3757_v7 = vld [vmem:[%s5535_s3 + $0x70] sm:$0xff]  ;;  %v3764_v29 = vld [vmem:[%s5535_s3 + $0xa8] sm:$0xff]  ;;  %v3754_v30 = vld [vmem:[%s5535_s3 + $0x58] sm:$0xff]  ;;  %v2014_v53 = vpack.c.bf16 %v5163_v52, %v5163_v52 }
  0xeb   :  { %1976 = vmatpush.bf16.msrb.mxu1 %v3086_v50  ;;  %1989 = vmatpush.bf16.msrb.mxu2 %v3214_v51  ;;  %v1726_v50 = vpop.f32.mrf.mxu1  ;;  %v3278_v51 = vor.u32 %v3720_v37, %v3275_v39  ;;  %v3762_v39 = vld [vmem:[%s5535_s3 + $0x98] sm:$0xff]  ;;  %v3744_v43 = vld [vmem:[%s5535_s3 + $0x8] sm:$0xff]  ;;  %v3743_v49 = vld [vmem:[%s5535_s3] sm:$0xff] }
  0xec   :  { %2002 = vmatpush.bf16.msrb.mxu3 %v3342_v56  ;;  %v5361_v36 = vpop.f32.mrf.mxu3  ;;  %v3716_v56 = vld [vmem:[%s5532_s1 + $0x72c] sm:$0xf]  ;;  %v1725_v15 = vadd.f32 %v5324_v13, %v1712_v11  ;;  %v3751_v50 = vld [vmem:[%s5535_s3 + $0x40] sm:$0xff] }
  0xed   :  { %1964 = vmatpush.bf16.msrb.mxu0 %v2942_v61  ;;  %v2859_v61 = vld [vmem:[%s5532_s1 + $0x418] sm:$0xf0]  ;;  %v3262_v1 = vor.u32 %v3716_v56, %v3259_v57  ;;  %v3760_v57 = vld [vmem:[%s5535_s3 + $0x88] sm:$0xff]  ;;  %v3759_v52 = vld [vmem:[%s5535_s3 + $0x80] sm:$0xff] }
  0xee   :  { %v2862_v5 = vor.u32 %v3616_v59, %v2859_v61  ;;  %v1738_v13 = vadd.f32 %v5350_v31, %v1725_v15  ;;  %v284_v61 = vperm.slane %v4931_v26, 2 }
  0xef   :  { %1977 = vmatpush.bf16.msrb.mxu1 %v3070_v62  ;;  %1990 = vmatpush.bf16.msrb.mxu2 %v3198_v63  ;;  %v3648_v62 = vld [vmem:[%s5532_s1 + $0x50c] sm:$0xf]  ;;  %v2987_v63 = vld [vmem:[%s5532_s1 + $0x518] sm:$0xf0] }
  0xf0   :  { %2003 = vmatpush.bf16.msrb.mxu3 %v3326_v20  ;;  %v3115_v20 = vld [vmem:[%s5532_s1 + $0x618] sm:$0xf0] }
  0xf1   :  { %1965 = vmatpush.bf16.msrb.mxu0 %v2926_v6  ;;  %v1739_v0 = vpop.f32.mrf.mxu2  ;;  %v2990_v6 = vor.u32 %v3648_v62, %v2987_v63 }
  0xf3   :  { %1978 = vmatpush.bf16.msrb.mxu1 %v3054_v8  ;;  %1991 = vmatpush.bf16.msrb.mxu2 %v3182_v9  ;;  %v3118_v8 = vor.u32 %v3680_v19, %v3115_v20  ;;  %v3246_v9 = vor.u32 %v3712_v3, %v3243_v4 }
  0xf4   :  { %2004 = vmatpush.bf16.msrb.mxu3 %v3310_v14  ;;  %v1752_v2 = vpop.f32.mrf.mxu3  ;;  %v3749_v14 = vld [vmem:[%s5535_s3 + $0x30] sm:$0xff] }
  0xf5   :  { %1966 = vmatpush.bf16.msrb.mxu0 %v2910_v25 }
  0xf7   :  { %1979 = vmatpush.bf16.msrb.mxu1 %v3038_v27  ;;  %1992 = vmatpush.bf16.msrb.mxu2 %v3166_v28  ;;  %v3746_v27 = vld [vmem:[%s5535_s3 + $0x18] sm:$0xff] }
  0xf8   :  { %2005 = vmatpush.bf16.msrb.mxu3 %v3294_v32  ;;  %v3763_v32 = vld [vmem:[%s5535_s3 + $0xa0] sm:$0xff] }
  0xf9   :  { %1967 = vmatpush.bf16.msrb.mxu0 %v2894_v40 }
  0xfb   :  { %1980 = vmatpush.bf16.msrb.mxu1 %v3022_v45  ;;  %1993 = vmatpush.bf16.msrb.mxu2 %v3150_v46  ;;  %v3752_v45 = vld [vmem:[%s5535_s3 + $0x48] sm:$0xff] }
  0xfc   :  { %2006 = vmatpush.bf16.msrb.mxu3 %v3278_v51 }
  0xfd   :  { %1968 = vmatpush.bf16.msrb.mxu0 %v2878_v58 }
  0xff   :  { %1981 = vmatpush.bf16.msrb.mxu1 %v3006_v60  ;;  %1994 = vmatpush.bf16.msrb.mxu2 %v3134_v18 }
 0x100   :  { %2007 = vmatpush.bf16.msrb.mxu3 %v3262_v1 }
 0x101   :  { %1969 = vmatpush.bf16.msrb.mxu0 %v2862_v5  ;;  %v1763_v21 = vpop.f32.mrf.mxu0  ;;  %v3774_v5 = vld [vmem:[%s5535_s3 + $0xf8] sm:$0xff] }
 0x103   :  { %1982 = vmatpush.bf16.msrb.mxu1 %v2990_v6  ;;  %1995 = vmatpush.bf16.msrb.mxu2 %v3118_v8  ;;  %v1776_v25 = vpop.f32.mrf.mxu1 }
 0x104   :  { %2008 = vmatpush.bf16.msrb.mxu3 %v3246_v9  ;;  %1970 = vmatmul.bf16.vlgmr.msrb.gmra.mxu0 %v4264_v41  ;;  %v3756_v41 = vld [vmem:[%s5535_s3 + $0x68] sm:$0xff] }
 0x105   :  { %2278 = vmatpush.bf16.msra.mxu0 %v3750_v10  ;;  %v3773_v10 = vld [vmem:[%s5535_s3 + $0xf0] sm:$0xff] }
 0x106   :  { %1983 = vmatmul.bf16.vlgmr.msrb.gmra.mxu1 %v4268_v44  ;;  %1996 = vmatmul.bf16.vlgmr.msrb.gmra.mxu2 %v4256_v38  ;;  %v3765_v44 = vld [vmem:[%s5535_s3 + $0xb0] sm:$0xff]  ;;  %v1751_v38 = vadd.f32 %v5361_v36, %v1738_v13 }
 0x107   :  { %2291 = vmatpush.bf16.msra.mxu1 %v3758_v12  ;;  %2009 = vmatmul.bf16.vlgmr.msrb.gmra.mxu3 %v4266_v42  ;;  %v3747_v42 = vld [vmem:[%s5535_s3 + $0x20] sm:$0xff]  ;;  %v3753_v36 = vld [vmem:[%s5535_s3 + $0x50] sm:$0xff] }
 0x108   :  { %2304 = vmatpush.bf16.msra.mxu2 %v3766_v16  ;;  %v1764_v28 = vadd.f32 %v1763_v21, %v1751_v38  ;;  %2317 = vmatpush.bf16.msra.mxu3 %v3774_v5  ;;  %v3772_v16 = vld [vmem:[%s5535_s3 + $0xe8] sm:$0xff] }
 0x109   :  { %2279 = vmatpush.bf16.msra.mxu0 %v3749_v14  ;;  %v1789_v24 = vpop.f32.mrf.mxu2  ;;  %v1765_v35 = vpop.f32.mrf.mxu0  ;;  %v3768_v21 = vld [vmem:[%s5535_s3 + $0xc8] sm:$0xff] }
 0x10a   :  { %v1777_v34 = vadd.f32 %v1776_v25, %v1764_v28 }
 0x10b   :  { %2292 = vmatpush.bf16.msra.mxu1 %v3757_v7  ;;  %v1778_v37 = vpop.f32.mrf.mxu1 }
 0x10c   :  { %2305 = vmatpush.bf16.msra.mxu2 %v3765_v44  ;;  %v1802_v31 = vpop.f32.mrf.mxu3  ;;  %v1790_v40 = vadd.f32 %v1789_v24, %v1777_v34  ;;  %2318 = vmatpush.bf16.msra.mxu3 %v3773_v10  ;;  %v3769_v44 = vld [vmem:[%s5535_s3 + $0xd0] sm:$0xff] }
 0x10d   :  { %2280 = vmatpush.bf16.msra.mxu0 %v3748_v17  ;;  %v3771_v17 = vld [vmem:[%s5535_s3 + $0xe0] sm:$0xff] }
 0x10e   :  { %v1803_v48 = vadd.f32 %v1802_v31, %v1790_v40 }
 0x10f   :  { %2293 = vmatpush.bf16.msra.mxu1 %v3756_v41  ;;  %v3770_v41 = vld [vmem:[%s5535_s3 + $0xd8] sm:$0xff] }
 0x110   :  { %2306 = vmatpush.bf16.msra.mxu2 %v3764_v29  ;;  %v2015_v51 = vpack.c.bf16 %v1803_v48, %v1803_v48  ;;  %2319 = vmatpush.bf16.msra.mxu3 %v3772_v16 }
 0x111   :  { %2281 = vmatpush.bf16.msra.mxu0 %v3747_v42  ;;  %v1791_v46 = vpop.f32.mrf.mxu2 }
 0x113   :  { %2294 = vmatpush.bf16.msra.mxu1 %v3755_v23 }
 0x114   :  { %2307 = vmatpush.bf16.msra.mxu2 %v3763_v32  ;;  %v1804_v47 = vpop.f32.mrf.mxu3  ;;  %2320 = vmatpush.bf16.msra.mxu3 %v3771_v17 }
 0x115   :  { %2282 = vmatpush.bf16.msra.mxu0 %v3746_v27  ;;  %v3767_v27 = vld [vmem:[%s5535_s3 + $0xc0] sm:$0xff] }
 0x117   :  { %2295 = vmatpush.bf16.msra.mxu1 %v3754_v30  ;;  %v285_v30 = vperm.slane %v4931_v26, 3 }
 0x118   :  { %2308 = vmatpush.bf16.msra.mxu2 %v3762_v39  ;;  %2321 = vmatpush.bf16.msra.mxu3 %v3770_v41 }
 0x119   :  { %2283 = vmatpush.bf16.msra.mxu0 %v3745_v33 }
 0x11b   :  { %2296 = vmatpush.bf16.msra.mxu1 %v3753_v36 }
 0x11c   :  { %2309 = vmatpush.bf16.msra.mxu2 %v3761_v54  ;;  %2322 = vmatpush.bf16.msra.mxu3 %v3769_v44 }
 0x11d   :  { %2284 = vmatpush.bf16.msra.mxu0 %v3744_v43 }
 0x11f   :  { %2297 = vmatpush.bf16.msra.mxu1 %v3752_v45 }
 0x120   :  { %2310 = vmatpush.bf16.msra.mxu2 %v3760_v57  ;;  %2323 = vmatpush.bf16.msra.mxu3 %v3768_v21 }
 0x121   :  { %2285 = vmatpush.bf16.msra.mxu0 %v3743_v49  ;;  %v1815_v55 = vpop.f32.mrf.mxu0 }
 0x122   :  { %v1816_v0 = vadd.f32 %v1815_v55, %v284_v61 }
 0x123   :  { %2298 = vmatpush.bf16.msra.mxu1 %v3751_v50  ;;  %v1828_v56 = vpop.f32.mrf.mxu1 }
 0x124   :  { %2286 = vmatmul.bf16.vlgmr.msra.gmra.mxu0 %v2014_v53  ;;  %2311 = vmatpush.bf16.msra.mxu2 %v3759_v52  ;;  %v1829_v1 = vadd.f32 %v1828_v56, %v1816_v0  ;;  %v3775_v53 = vld [vmem:[%s5536_s4] ss:$0 sm:$0xff] }
 0x125   :  { %2324 = vmatpush.bf16.msra.mxu3 %v3767_v27 }
 0x126   :  { %2299 = vmatmul.bf16.vlgmr.msra.gmra.mxu1 %v2015_v51 }
 0x129   :  { %v1841_v58 = vpop.f32.mrf.mxu2  ;;  %v1817_v60 = vpop.f32.mrf.mxu0 }
 0x12a   :  { %v1842_v19 = vadd.f32 %v1841_v58, %v1829_v1 }
 0x12b   :  { %v1830_v18 = vpop.f32.mrf.mxu1 }
 0x12c   :  { %v1854_v59 = vpop.f32.mrf.mxu3 }
 0x12d   :  { %v1855_v20 = vadd.f32 %v1854_v59, %v1842_v19 }
 0x131   :  { %v1843_v62 = vpop.f32.mrf.mxu2 }
 0x134   :  { %v1856_v63 = vpop.f32.mrf.mxu3 }
 0x141   :  { %v1867_v22 = vpop.f32.mrf.mxu0 }
 0x142   :  { %v1868_v2 = vadd.f32 %v1867_v22, %v1855_v20 }
 0x143   :  { %v1880_v3 = vpop.f32.mrf.mxu1 }
 0x144   :  { %v1881_v4 = vadd.f32 %v1880_v3, %v1868_v2 }
 0x149   :  { %v1893_v6 = vpop.f32.mrf.mxu2  ;;  %v1869_v12 = vpop.f32.mrf.mxu0 }
 0x14a   :  { %v1894_v8 = vadd.f32 %v1893_v6, %v1881_v4 }
 0x14b   :  { %v1882_v14 = vpop.f32.mrf.mxu1 }
 0x14c   :  { %v1906_v9 = vpop.f32.mrf.mxu3 }
 0x14d   :  { %v1907_v11 = vadd.f32 %v1906_v9, %v1894_v8 }
 0x14f   :  { %v2016_v15 = vpack.c.bf16 %v1907_v11, %v1907_v11 }
 0x151   :  { %2312 = vmatmul.bf16.vlgmr.msra.gmra.mxu2 %v2016_v15  ;;  %v1895_v7 = vpop.f32.mrf.mxu2 }
 0x154   :  { %v1908_v13 = vpop.f32.mrf.mxu3 }
 0x161   :  { %v1919_v38 = vpop.f32.mrf.mxu0 }
 0x162   :  { %v1920_v32 = vadd.f32 %v1919_v38, %v285_v30 }
 0x163   :  { %v1932_v42 = vpop.f32.mrf.mxu1 }
 0x164   :  { %v1933_v33 = vadd.f32 %v1932_v42, %v1920_v32 }
 0x169   :  { %v1945_v23 = vpop.f32.mrf.mxu2  ;;  %v1921_v28 = vpop.f32.mrf.mxu0 }
 0x16a   :  { %v1946_v34 = vadd.f32 %v1945_v23, %v1933_v33 }
 0x16b   :  { %v1934_v29 = vpop.f32.mrf.mxu1 }
 0x16c   :  { %v1958_v25 = vpop.f32.mrf.mxu3 }
 0x16d   :  { %v1959_v35 = vadd.f32 %v1958_v25, %v1946_v34 }
 0x171   :  { %v1947_v24 = vpop.f32.mrf.mxu2 }
 0x174   :  { %v1960_v31 = vpop.f32.mrf.mxu3 }
 0x181   :  { %v1971_v36 = vpop.f32.mrf.mxu0 }
 0x182   :  { %v1972_v39 = vadd.f32 %v1971_v36, %v1959_v35 }
 0x183   :  { %v1984_v37 = vpop.f32.mrf.mxu1 }
 0x184   :  { %v1985_v40 = vadd.f32 %v1984_v37, %v1972_v39 }
 0x189   :  { %v1997_v43 = vpop.f32.mrf.mxu2  ;;  %v1973_v47 = vpop.f32.mrf.mxu0 }
 0x18a   :  { %v1998_v45 = vadd.f32 %v1997_v43, %v1985_v40  ;;  %v2010_v46 = vpop.f32.mrf.mxu3 }
 0x18b   :  { %v1986_v48 = vpop.f32.mrf.mxu1 }
 0x18c   :  { %v2011_v49 = vadd.f32 %v2010_v46, %v1998_v45 }
 0x18e   :  { %v2017_v50 = vpack.c.bf16 %v2011_v49, %v2011_v49 }
 0x190   :  { %2325 = vmatmul.bf16.vlgmr.msra.gmra.mxu3 %v2017_v50 }
 0x191   :  { %v1999_v51 = vpop.f32.mrf.mxu2 }
 0x192   :  { %v2012_v26 = vpop.f32.mrf.mxu3 }
 0x1a1   :  { %v2287_v54 = vpop.f32.mrf.mxu0 }
 0x1a2   :  { %v2288_v55 = vadd.f32 %v3775_v53, %v2287_v54 }
 0x1a3   :  { %v2300_v56 = vpop.f32.mrf.mxu1 }
 0x1a4   :  { %v2301_v57 = vadd.f32 %v2300_v56, %v2288_v55 }
 0x1a9   :  { %v2289_v58 = vpop.f32.mrf.mxu0 }
 0x1ab   :  { %v2302_v59 = vpop.f32.mrf.mxu1 }
 0x1d4   :  { %v2313_v60 = vpop.f32.mrf.mxu2 }
 0x1d5   :  { %v2314_v18 = vadd.f32 %v2313_v60, %v2301_v57 }
 0x1dc   :  { %v2315_v52 = vpop.f32.mrf.mxu2 }
 0x213   :  { %v2326_v61 = vpop.f32.mrf.mxu3 }
 0x214   :  { %v2327_v62 = vadd.f32 %v2326_v61, %v2314_v18 }
 0x216   :  { %2330 = vst [vmem:[%s5537_s5] sm:$0xff] %v2327_v62 }
 0x21b   :  { %v2328_v63 = vpop.f32.mrf.mxu3 }

</bundles_post_ra>
